<compile_context>
chip_gen: v5e
topology: v5e:2x2
jax: 0.10.0
libtpu: 0.0.40
codegen_flags: <defaults>
</compile_context>

<pallas_src>
import jax
import jax.numpy as jnp
from jax.experimental import pallas as pl
from jax.experimental.pallas import tpu as pltpu


def _round_up(x, m):
    return (x + m - 1) // m * m


def _fold_bn(gamma, beta, mean, var, eps=1e-5):
    scale = gamma / jnp.sqrt(var + eps)
    return scale, beta - mean * scale


# ---------------------------------------------------------------------------
# Fused Pallas kernel: one grid step == one image (NHWC, channels-last).
# ---------------------------------------------------------------------------
def _bottleneck_fused_kernel(x_ref, w1_ref, w2_ref, w3_ref,
                             s1_ref, b1_ref, s2_ref, b2_ref, s3_ref, b3_ref,
                             o_ref, pad_ref):
    """Per-grid-step shapes:
         x_ref   : (1, H, W, Cin)   f32
         w1_ref  : (Cin, P)         bf16   (P = planes padded to 128 lanes)
         w2_ref  : (3, 3P, P)       bf16   (kh rows; kw taps stacked along K)
         w3_ref  : (P, Cout)        bf16
         s*/b*   : (1, P|Cout)      f32    folded BN scale / bias
         o_ref   : (1, H, W, Cout)  f32
         pad_ref : VMEM (H+2, W+2, P) bf16 zero-halo staging for the 3x3 conv
    """
    _, H, W, Cin = x_ref.shape
    P = w1_ref.shape[1]
    Cout = w3_ref.shape[1]
    M = H * W

    # Input rows kept in f32 for the exact identity-residual add.
    x2d = x_ref[...].reshape(M, Cin)

    # ---- conv1 (1x1) + bn1 + relu  (bf16 MXU, f32 accumulate) -------------
    y1 = jnp.dot(x2d.astype(jnp.bfloat16), w1_ref[...],
                 preferred_element_type=jnp.float32)
    y1 = jnp.maximum(y1 * s1_ref[...] + b1_ref[...], 0.0)

    # Stage into the zero-halo VMEM scratch.  Only the 1-px border is zeroed
    # (interior fully overwritten every step; per-step zeroing is megacore-safe).
    zrow = jnp.zeros((1, W + 2, P), jnp.bfloat16)
    zcol = jnp.zeros((H, 1, P), jnp.bfloat16)
    pad_ref[0:1, :, :] = zrow
    pad_ref[H + 1:H + 2, :, :] = zrow
    pad_ref[1:H + 1, 0:1, :] = zcol
    pad_ref[1:H + 1, W + 1:W + 2, :] = zcol
    pad_ref[1:H + 1, 1:W + 1, :] = y1.astype(jnp.bfloat16).reshape(H, W, P)

    # ---- conv2 (3x3, pad=1, stride=1) + bn2 + relu ------------------------
    # One K = 3*P matmul per kh row (kw taps concatenated along the contraction
    # dim), accumulated as a traced value chain (no VMEM RMW accumulator).
    acc = None
    for kh in range(3):
        patch = jnp.concatenate(
            [pad_ref[kh:kh + H, kw:kw + W, :] for kw in range(3)],
            axis=-1).reshape(M, 3 * P)
        d = jnp.dot(patch, w2_ref[kh], preferred_element_type=jnp.float32)
        acc = d if acc is None else acc + d
    y2 = jnp.maximum(acc * s2_ref[...] + b2_ref[...], 0.0)

    # ---- conv3 (1x1) + bn3 + identity residual + relu ---------------------
    y3 = jnp.dot(y2.astype(jnp.bfloat16), w3_ref[...],
                 preferred_element_type=jnp.float32)
    y3 = y3 * s3_ref[...] + b3_ref[...] + x2d                 # residual in f32
    o_ref[...] = jnp.maximum(y3, 0.0).reshape(1, H, W, Cout)


def _bottleneck_pallas(x_nhwc, w1p, w2p, w3p, s1, b1, s2, b2, s3, b3):
    N, H, W, Cin = x_nhwc.shape
    P = w1p.shape[1]
    Cout = w3p.shape[1]

    flops = 2 * N * H * W * (Cin * P + 9 * P * P + P * Cout)
    bytes_accessed = (
        x_nhwc.size * 4 + N * H * W * Cout * 4
        + (w1p.size + w2p.size + w3p.size) * 2
        + (s1.size + b1.size + s2.size + b2.size + s3.size + b3.size) * 4)

    return pl.pallas_call(
        _bottleneck_fused_kernel,
        out_shape=jax.ShapeDtypeStruct((N, H, W, Cout), jnp.float32),
        grid=(N,),
        in_specs=[
            pl.BlockSpec((1, H, W, Cin), lambda n: (n, 0, 0, 0)),   # x
            pl.BlockSpec((Cin, P), lambda n: (0, 0)),               # w1
            pl.BlockSpec((3, 3 * P, P), lambda n: (0, 0, 0)),       # w2
            pl.BlockSpec((P, Cout), lambda n: (0, 0)),              # w3
            pl.BlockSpec((1, P), lambda n: (0, 0)),                 # s1
            pl.BlockSpec((1, P), lambda n: (0, 0)),                 # b1
            pl.BlockSpec((1, P), lambda n: (0, 0)),                 # s2
            pl.BlockSpec((1, P), lambda n: (0, 0)),                 # b2
            pl.BlockSpec((1, Cout), lambda n: (0, 0)),              # s3
            pl.BlockSpec((1, Cout), lambda n: (0, 0)),              # b3
        ],
        out_specs=pl.BlockSpec((1, H, W, Cout), lambda n: (n, 0, 0, 0)),
        scratch_shapes=[
            pltpu.VMEM((H + 2, W + 2, P), jnp.bfloat16),   # zero-halo conv1 out
        ],
        compiler_params=pltpu.CompilerParams(
            dimension_semantics=("parallel",),
            vmem_limit_bytes=48 * 1024 * 1024),
        cost_estimate=pl.CostEstimate(
            flops=flops, transcendentals=0, bytes_accessed=bytes_accessed),
    )(x_nhwc, w1p, w2p, w3p, s1, b1, s2, b2, s3, b3)


# ---------------------------------------------------------------------------
# One-time parameter preparation (hoisted out of the per-call jitted path).
# ---------------------------------------------------------------------------
def prepare_params(p, eps=1e-5):
    Cin, planes = p["w1"].shape
    Cout = p["w3"].shape[1]
    assert Cin == Cout, "identity residual requires inplanes == planes*expansion"
    P = _round_up(planes, 128)
    # TODO(synk): for small `planes`, keep the contraction dims at the bf16
    # sublane granularity (16) and lane-pad only the output-channel dims.

    s1, b1 = _fold_bn(*p["bn1"], eps)
    s2, b2 = _fold_bn(*p["bn2"], eps)
    s3, b3 = _fold_bn(*p["bn3"], eps)

    def padv(v):
        return jnp.zeros((1, P), jnp.float32).at[0, :v.shape[0]].set(v)

    # Padded channels stay exactly zero through (zero weights) x (zero folded
    # BN scale/bias) x ReLU, so lane-padding `planes` to 128 is exact.
    w1p = (jnp.zeros((Cin, P), jnp.bfloat16)
           .at[:, :planes].set(p["w1"].astype(jnp.bfloat16)))
    w2p = (jnp.zeros((3, 3, P, P), jnp.bfloat16)
           .at[:, :, :planes, :planes].set(p["w2"].astype(jnp.bfloat16))
           .reshape(3, 3 * P, P))                    # kw taps stacked along K
    w3p = (jnp.zeros((P, Cout), jnp.bfloat16)
           .at[:planes, :].set(p["w3"].astype(jnp.bfloat16)))

    return {
        "w1p": w1p, "w2p": w2p, "w3p": w3p,
        "s1": padv(s1), "b1": padv(b1),
        "s2": padv(s2), "b2": padv(b2),
        "s3": s3.reshape(1, Cout).astype(jnp.float32),
        "b3": b3.reshape(1, Cout).astype(jnp.float32),
    }


@jax.jit
def bottleneck_forward_nhwc(x_nhwc, prepped):
    """Fused Bottleneck forward, NHWC (channels-last) in and out.
    Semantics match the PyTorch module (stride=1, downsample=None,
    inference-mode BatchNorm folded into per-channel scale/bias)."""
    # TODO(synk): stride>1 / downsample branch not implemented.
    pp = prepped
    return _bottleneck_pallas(
        x_nhwc.astype(jnp.float32),
        pp["w1p"], pp["w2p"], pp["w3p"],
        pp["s1"], pp["b1"], pp["s2"], pp["b2"], pp["s3"], pp["b3"])


# ---------------------------------------------------------------------------
# Plain-JAX reference (same bf16-matmul / f32-accumulate policy), NHWC.
# ---------------------------------------------------------------------------
def _reference_nhwc(x, p):
    def conv(inp, w, padding):
        return jax.lax.conv_general_dilated(
            inp.astype(jnp.bfloat16), w.astype(jnp.bfloat16), (1, 1), padding,
            dimension_numbers=("NHWC", "HWIO", "NHWC"),
            preferred_element_type=jnp.float32)

    x = x.astype(jnp.float32)
    s1, b1 = _fold_bn(*p["bn1"])
    out = jnp.maximum(conv(x, p["w1"][None, None], "VALID") * s1 + b1, 0.0)
    s2, b2 = _fold_bn(*p["bn2"])
    out = jnp.maximum(conv(out, p["w2"], "SAME") * s2 + b2, 0.0)
    s3, b3 = _fold_bn(*p["bn3"])
    out = conv(out, p["w3"][None, None], "VALID") * s3 + b3
    return jnp.maximum(out + x, 0.0)


# ---------------------------------------------------------------------------
# Deterministic parameter init + run
# ---------------------------------------------------------------------------
def init_params(key, inplanes, planes, expansion=4):
    outplanes = planes * expansion
    ks = jax.random.split(key, 6)

    def bn(k, c):
        kg, kb, km, kv = jax.random.split(k, 4)
        gamma = 1.0 + 0.1 * jax.random.normal(kg, (c,), jnp.float32)
        beta = 0.1 * jax.random.normal(kb, (c,), jnp.float32)
        mean = 0.05 * jax.random.normal(km, (c,), jnp.float32)
        var = 1.0 + 0.1 * jnp.abs(jax.random.normal(kv, (c,), jnp.float32))
        return (gamma, beta, mean, var)

    return {
        "w1": (2.0 / inplanes) ** 0.5
              * jax.random.normal(ks[0], (inplanes, planes), jnp.float32),
        "bn1": bn(ks[1], planes),
        "w2": (2.0 / (9 * planes)) ** 0.5
              * jax.random.normal(ks[2], (3, 3, planes, planes), jnp.float32),
        "bn2": bn(ks[3], planes),
        "w3": (2.0 / planes) ** 0.5
              * jax.random.normal(ks[4], (planes, outplanes), jnp.float32),
        "bn3": bn(ks[5], outplanes),
    }


if __name__ == "__main__":
    key = jax.random.PRNGKey(0)
    k_x, k_p = jax.random.split(key)

    # Bottleneck(inplanes=128, planes=32): inplanes == planes*expansion so the
    # identity residual is valid; NHWC end-to-end (no wrapper transposes).
    N, H, W, inplanes, planes = 2, 16, 16, 128, 32
    x = jax.random.normal(k_x, (N, H, W, inplanes), jnp.float32)
    params = init_params(k_p, inplanes, planes)
    prepped = prepare_params(params)          # one-time, outside the hot path

    out = jax.block_until_ready(bottleneck_forward_nhwc(x, prepped))
    ref = jax.block_until_ready(_reference_nhwc(x, params))

    assert out.shape == (N, H, W, planes * 4), out.shape
    max_err = float(jnp.max(jnp.abs(out - ref)))
    assert jnp.allclose(out, ref, atol=2e-2, rtol=2e-2), max_err
    print("KERNEL_OK")
</pallas_src>

<mosaic_0001>
module attributes {stable_mosaic.version = 11 : i64} {
  func.func @_bottleneck_fused_kernel(%arg0: i32, %arg1: memref<1x16x16x128xf32, #tpu.memory_space<vmem>>, %arg2: memref<128x128xbf16, #tpu.memory_space<vmem>>, %arg3: memref<3x384x128xbf16, #tpu.memory_space<vmem>>, %arg4: memref<128x128xbf16, #tpu.memory_space<vmem>>, %arg5: memref<1x128xf32, #tpu.memory_space<vmem>>, %arg6: memref<1x128xf32, #tpu.memory_space<vmem>>, %arg7: memref<1x128xf32, #tpu.memory_space<vmem>>, %arg8: memref<1x128xf32, #tpu.memory_space<vmem>>, %arg9: memref<1x128xf32, #tpu.memory_space<vmem>>, %arg10: memref<1x128xf32, #tpu.memory_space<vmem>>, %arg11: memref<1x16x16x128xf32, #tpu.memory_space<vmem>>, %arg12: memref<18x18x128xbf16, #tpu.memory_space<vmem>>) attributes {dimension_semantics = [#tpu.dimension_semantics<parallel>], iteration_bounds = array<i64: 2>, scalar_prefetch = 0 : i64, scratch_operands = 1 : i64, tpu.core_type = #tpu.core_type<tc>, window_params = [{transform_indices = @transform_0, window_bounds = array<i64: 1, 16, 16, 128>}, {pipeline_mode = #tpu.pipeline_mode<synchronous>, transform_indices = @transform_1, window_bounds = array<i64: 128, 128>}, {pipeline_mode = #tpu.pipeline_mode<synchronous>, transform_indices = @transform_2, window_bounds = array<i64: 3, 384, 128>}, {pipeline_mode = #tpu.pipeline_mode<synchronous>, transform_indices = @transform_3, window_bounds = array<i64: 128, 128>}, {pipeline_mode = #tpu.pipeline_mode<synchronous>, transform_indices = @transform_4, window_bounds = array<i64: 1, 128>}, {pipeline_mode = #tpu.pipeline_mode<synchronous>, transform_indices = @transform_5, window_bounds = array<i64: 1, 128>}, {pipeline_mode = #tpu.pipeline_mode<synchronous>, transform_indices = @transform_6, window_bounds = array<i64: 1, 128>}, {pipeline_mode = #tpu.pipeline_mode<synchronous>, transform_indices = @transform_7, window_bounds = array<i64: 1, 128>}, {pipeline_mode = #tpu.pipeline_mode<synchronous>, transform_indices = @transform_8, window_bounds = array<i64: 1, 128>}, {pipeline_mode = #tpu.pipeline_mode<synchronous>, transform_indices = @transform_9, window_bounds = array<i64: 1, 128>}, {transform_indices = @transform_10, window_bounds = array<i64: 1, 16, 16, 128>}]} {
    %c0 = arith.constant 0 : index
    %c0_0 = arith.constant 0 : index
    %c0_1 = arith.constant 0 : index
    %c0_2 = arith.constant 0 : index
    %0 = vector.load %arg1[%c0, %c0_0, %c0_1, %c0_2] : memref<1x16x16x128xf32, #tpu.memory_space<vmem>>, vector<1x16x16x128xf32>
    %1 = vector.shape_cast %0 : vector<1x16x16x128xf32> to vector<256x128xf32>
    %2 = arith.truncf %1 : vector<256x128xf32> to vector<256x128xbf16>
    %c0_3 = arith.constant 0 : index
    %c0_4 = arith.constant 0 : index
    %3 = vector.load %arg2[%c0_3, %c0_4] : memref<128x128xbf16, #tpu.memory_space<vmem>>, vector<128x128xbf16>
    %cst = arith.constant dense<0.000000e+00> : vector<256x128xf32>
    %4 = tpu.matmul %2, %3, %cst {dimension_numbers = #tpu.dot_dimension_numbers<[1], [0], [0], [1], [0, 0, 1, 1], [], []>} : vector<256x128xbf16>, vector<128x128xbf16>, vector<256x128xf32> -> vector<256x128xf32>
    %c0_5 = arith.constant 0 : index
    %c0_6 = arith.constant 0 : index
    %5 = vector.load %arg5[%c0_5, %c0_6] : memref<1x128xf32, #tpu.memory_space<vmem>>, vector<1x128xf32>
    %6 = vector.broadcast %5 : vector<1x128xf32> to vector<256x128xf32>
    %7 = arith.mulf %4, %6 : vector<256x128xf32>
    %c0_7 = arith.constant 0 : index
    %c0_8 = arith.constant 0 : index
    %8 = vector.load %arg6[%c0_7, %c0_8] : memref<1x128xf32, #tpu.memory_space<vmem>>, vector<1x128xf32>
    %9 = vector.broadcast %8 : vector<1x128xf32> to vector<256x128xf32>
    %10 = arith.addf %7, %9 : vector<256x128xf32>
    %cst_9 = arith.constant 0.000000e+00 : f32
    %11 = vector.broadcast %cst_9 : f32 to vector<256x128xf32>
    %12 = arith.maximumf %10, %11 : vector<256x128xf32>
    %cst_10 = arith.constant 0.000000e+00 : bf16
    %13 = vector.broadcast %cst_10 : bf16 to vector<1x18x128xbf16>
    %cst_11 = arith.constant 0.000000e+00 : bf16
    %14 = vector.broadcast %cst_11 : bf16 to vector<16x1x128xbf16>
    %c0_12 = arith.constant 0 : index
    %c0_13 = arith.constant 0 : index
    %c0_14 = arith.constant 0 : index
    %15 = vector.load %arg12[%c0_12, %c0_13, %c0_14] : memref<18x18x128xbf16, #tpu.memory_space<vmem>>, vector<1x18x128xbf16>
    tpu.vector_store %arg12[%c0_12, %c0_13, %c0_14], %13 {strides = array<i32>} : memref<18x18x128xbf16, #tpu.memory_space<vmem>>, vector<1x18x128xbf16>,
    %c17 = arith.constant 17 : index
    %c0_15 = arith.constant 0 : index
    %c0_16 = arith.constant 0 : index
    %16 = vector.load %arg12[%c17, %c0_15, %c0_16] : memref<18x18x128xbf16, #tpu.memory_space<vmem>>, vector<1x18x128xbf16>
    tpu.vector_store %arg12[%c17, %c0_15, %c0_16], %13 {strides = array<i32>} : memref<18x18x128xbf16, #tpu.memory_space<vmem>>, vector<1x18x128xbf16>,
    %c1 = arith.constant 1 : index
    %c0_17 = arith.constant 0 : index
    %c0_18 = arith.constant 0 : index
    %17 = vector.load %arg12[%c1, %c0_17, %c0_18] : memref<18x18x128xbf16, #tpu.memory_space<vmem>>, vector<16x1x128xbf16>
    tpu.vector_store %arg12[%c1, %c0_17, %c0_18], %14 {strides = array<i32>} : memref<18x18x128xbf16, #tpu.memory_space<vmem>>, vector<16x1x128xbf16>,
    %c1_19 = arith.constant 1 : index
    %c17_20 = arith.constant 17 : index
    %c0_21 = arith.constant 0 : index
    %18 = vector.load %arg12[%c1_19, %c17_20, %c0_21] : memref<18x18x128xbf16, #tpu.memory_space<vmem>>, vector<16x1x128xbf16>
    tpu.vector_store %arg12[%c1_19, %c17_20, %c0_21], %14 {strides = array<i32>} : memref<18x18x128xbf16, #tpu.memory_space<vmem>>, vector<16x1x128xbf16>,
    %19 = arith.truncf %12 : vector<256x128xf32> to vector<256x128xbf16>
    %20 = vector.shape_cast %19 : vector<256x128xbf16> to vector<16x16x128xbf16>
    %c1_22 = arith.constant 1 : index
    %c1_23 = arith.constant 1 : index
    %c0_24 = arith.constant 0 : index
    %21 = vector.load %arg12[%c1_22, %c1_23, %c0_24] : memref<18x18x128xbf16, #tpu.memory_space<vmem>>, vector<16x16x128xbf16>
    tpu.vector_store %arg12[%c1_22, %c1_23, %c0_24], %20 {strides = array<i32>} : memref<18x18x128xbf16, #tpu.memory_space<vmem>>, vector<16x16x128xbf16>,
    %c0_25 = arith.constant 0 : index
    %c0_26 = arith.constant 0 : index
    %c0_27 = arith.constant 0 : index
    %22 = vector.load %arg12[%c0_25, %c0_26, %c0_27] : memref<18x18x128xbf16, #tpu.memory_space<vmem>>, vector<16x16x128xbf16>
    %c0_28 = arith.constant 0 : index
    %c1_29 = arith.constant 1 : index
    %c0_30 = arith.constant 0 : index
    %23 = vector.load %arg12[%c0_28, %c1_29, %c0_30] : memref<18x18x128xbf16, #tpu.memory_space<vmem>>, vector<16x16x128xbf16>
    %c0_31 = arith.constant 0 : index
    %c2 = arith.constant 2 : index
    %c0_32 = arith.constant 0 : index
    %24 = vector.load %arg12[%c0_31, %c2, %c0_32] : memref<18x18x128xbf16, #tpu.memory_space<vmem>>, vector<16x16x128xbf16>
    %25 = tpu.concatenate %22, %23, %24 in 2 : vector<16x16x128xbf16>, vector<16x16x128xbf16>, vector<16x16x128xbf16> -> vector<16x16x384xbf16>
    %26 = vector.shape_cast %25 : vector<16x16x384xbf16> to vector<256x384xbf16>
    %c0_33 = arith.constant 0 : index
    %c0_34 = arith.constant 0 : index
    %c0_35 = arith.constant 0 : index
    %27 = vector.load %arg3[%c0_33, %c0_34, %c0_35] : memref<3x384x128xbf16, #tpu.memory_space<vmem>>, vector<1x384x128xbf16>
    %28 = vector.shape_cast %27 : vector<1x384x128xbf16> to vector<384x128xbf16>
    %cst_36 = arith.constant dense<0.000000e+00> : vector<256x128xf32>
    %29 = tpu.matmul %26, %28, %cst_36 {dimension_numbers = #tpu.dot_dimension_numbers<[1], [0], [0], [1], [0, 0, 1, 1], [], []>} : vector<256x384xbf16>, vector<384x128xbf16>, vector<256x128xf32> -> vector<256x128xf32>
    %c1_37 = arith.constant 1 : index
    %c0_38 = arith.constant 0 : index
    %c0_39 = arith.constant 0 : index
    %30 = vector.load %arg12[%c1_37, %c0_38, %c0_39] : memref<18x18x128xbf16, #tpu.memory_space<vmem>>, vector<16x16x128xbf16>
    %c1_40 = arith.constant 1 : index
    %c1_41 = arith.constant 1 : index
    %c0_42 = arith.constant 0 : index
    %31 = vector.load %arg12[%c1_40, %c1_41, %c0_42] : memref<18x18x128xbf16, #tpu.memory_space<vmem>>, vector<16x16x128xbf16>
    %c1_43 = arith.constant 1 : index
    %c2_44 = arith.constant 2 : index
    %c0_45 = arith.constant 0 : index
    %32 = vector.load %arg12[%c1_43, %c2_44, %c0_45] : memref<18x18x128xbf16, #tpu.memory_space<vmem>>, vector<16x16x128xbf16>
    %33 = tpu.concatenate %30, %31, %32 in 2 : vector<16x16x128xbf16>, vector<16x16x128xbf16>, vector<16x16x128xbf16> -> vector<16x16x384xbf16>
    %34 = vector.shape_cast %33 : vector<16x16x384xbf16> to vector<256x384xbf16>
    %c1_46 = arith.constant 1 : index
    %c0_47 = arith.constant 0 : index
    %c0_48 = arith.constant 0 : index
    %35 = vector.load %arg3[%c1_46, %c0_47, %c0_48] : memref<3x384x128xbf16, #tpu.memory_space<vmem>>, vector<1x384x128xbf16>
    %36 = vector.shape_cast %35 : vector<1x384x128xbf16> to vector<384x128xbf16>
    %cst_49 = arith.constant dense<0.000000e+00> : vector<256x128xf32>
    %37 = tpu.matmul %34, %36, %cst_49 {dimension_numbers = #tpu.dot_dimension_numbers<[1], [0], [0], [1], [0, 0, 1, 1], [], []>} : vector<256x384xbf16>, vector<384x128xbf16>, vector<256x128xf32> -> vector<256x128xf32>
    %38 = arith.addf %29, %37 : vector<256x128xf32>
    %c2_50 = arith.constant 2 : index
    %c0_51 = arith.constant 0 : index
    %c0_52 = arith.constant 0 : index
    %39 = vector.load %arg12[%c2_50, %c0_51, %c0_52] : memref<18x18x128xbf16, #tpu.memory_space<vmem>>, vector<16x16x128xbf16>
    %c2_53 = arith.constant 2 : index
    %c1_54 = arith.constant 1 : index
    %c0_55 = arith.constant 0 : index
    %40 = vector.load %arg12[%c2_53, %c1_54, %c0_55] : memref<18x18x128xbf16, #tpu.memory_space<vmem>>, vector<16x16x128xbf16>
    %c2_56 = arith.constant 2 : index
    %c2_57 = arith.constant 2 : index
    %c0_58 = arith.constant 0 : index
    %41 = vector.load %arg12[%c2_56, %c2_57, %c0_58] : memref<18x18x128xbf16, #tpu.memory_space<vmem>>, vector<16x16x128xbf16>
    %42 = tpu.concatenate %39, %40, %41 in 2 : vector<16x16x128xbf16>, vector<16x16x128xbf16>, vector<16x16x128xbf16> -> vector<16x16x384xbf16>
    %43 = vector.shape_cast %42 : vector<16x16x384xbf16> to vector<256x384xbf16>
    %c2_59 = arith.constant 2 : index
    %c0_60 = arith.constant 0 : index
    %c0_61 = arith.constant 0 : index
    %44 = vector.load %arg3[%c2_59, %c0_60, %c0_61] : memref<3x384x128xbf16, #tpu.memory_space<vmem>>, vector<1x384x128xbf16>
    %45 = vector.shape_cast %44 : vector<1x384x128xbf16> to vector<384x128xbf16>
    %cst_62 = arith.constant dense<0.000000e+00> : vector<256x128xf32>
    %46 = tpu.matmul %43, %45, %cst_62 {dimension_numbers = #tpu.dot_dimension_numbers<[1], [0], [0], [1], [0, 0, 1, 1], [], []>} : vector<256x384xbf16>, vector<384x128xbf16>, vector<256x128xf32> -> vector<256x128xf32>
    %47 = arith.addf %38, %46 : vector<256x128xf32>
    %c0_63 = arith.constant 0 : index
    %c0_64 = arith.constant 0 : index
    %48 = vector.load %arg7[%c0_63, %c0_64] : memref<1x128xf32, #tpu.memory_space<vmem>>, vector<1x128xf32>
    %49 = vector.broadcast %48 : vector<1x128xf32> to vector<256x128xf32>
    %50 = arith.mulf %47, %49 : vector<256x128xf32>
    %c0_65 = arith.constant 0 : index
    %c0_66 = arith.constant 0 : index
    %51 = vector.load %arg8[%c0_65, %c0_66] : memref<1x128xf32, #tpu.memory_space<vmem>>, vector<1x128xf32>
    %52 = vector.broadcast %51 : vector<1x128xf32> to vector<256x128xf32>
    %53 = arith.addf %50, %52 : vector<256x128xf32>
    %cst_67 = arith.constant 0.000000e+00 : f32
    %54 = vector.broadcast %cst_67 : f32 to vector<256x128xf32>
    %55 = arith.maximumf %53, %54 : vector<256x128xf32>
    %56 = arith.truncf %55 : vector<256x128xf32> to vector<256x128xbf16>
    %c0_68 = arith.constant 0 : index
    %c0_69 = arith.constant 0 : index
    %57 = vector.load %arg4[%c0_68, %c0_69] : memref<128x128xbf16, #tpu.memory_space<vmem>>, vector<128x128xbf16>
    %cst_70 = arith.constant dense<0.000000e+00> : vector<256x128xf32>
    %58 = tpu.matmul %56, %57, %cst_70 {dimension_numbers = #tpu.dot_dimension_numbers<[1], [0], [0], [1], [0, 0, 1, 1], [], []>} : vector<256x128xbf16>, vector<128x128xbf16>, vector<256x128xf32> -> vector<256x128xf32>
    %c0_71 = arith.constant 0 : index
    %c0_72 = arith.constant 0 : index
    %59 = vector.load %arg9[%c0_71, %c0_72] : memref<1x128xf32, #tpu.memory_space<vmem>>, vector<1x128xf32>
    %60 = vector.broadcast %59 : vector<1x128xf32> to vector<256x128xf32>
    %61 = arith.mulf %58, %60 : vector<256x128xf32>
    %c0_73 = arith.constant 0 : index
    %c0_74 = arith.constant 0 : index
    %62 = vector.load %arg10[%c0_73, %c0_74] : memref<1x128xf32, #tpu.memory_space<vmem>>, vector<1x128xf32>
    %63 = vector.broadcast %62 : vector<1x128xf32> to vector<256x128xf32>
    %64 = arith.addf %61, %63 : vector<256x128xf32>
    %65 = arith.addf %64, %1 : vector<256x128xf32>
    %cst_75 = arith.constant 0.000000e+00 : f32
    %66 = vector.broadcast %cst_75 : f32 to vector<256x128xf32>
    %67 = arith.maximumf %65, %66 : vector<256x128xf32>
    %68 = vector.shape_cast %67 : vector<256x128xf32> to vector<1x16x16x128xf32>
    %c0_76 = arith.constant 0 : index
    %c0_77 = arith.constant 0 : index
    %c0_78 = arith.constant 0 : index
    %c0_79 = arith.constant 0 : index
    %69 = vector.load %arg11[%c0_76, %c0_77, %c0_78, %c0_79] : memref<1x16x16x128xf32, #tpu.memory_space<vmem>>, vector<1x16x16x128xf32>
    tpu.vector_store %arg11[%c0_76, %c0_77, %c0_78, %c0_79], %68 {strides = array<i32>} : memref<1x16x16x128xf32, #tpu.memory_space<vmem>>, vector<1x16x16x128xf32>,
    return
  }
  func.func @transform_0(%arg0: i32) -> (i32, i32, i32, i32) {
    %c0_i32 = arith.constant 0 : i32
    %c0_i32_0 = arith.constant 0 : i32
    %c0_i32_1 = arith.constant 0 : i32
    %c0_i32_2 = arith.constant 0 : i32
    return %arg0, %c0_i32, %c0_i32_0, %c0_i32_1 : i32, i32, i32, i32
  }
  func.func @transform_1(%arg0: i32) -> (i32, i32) {
    %c0_i32 = arith.constant 0 : i32
    %c0_i32_0 = arith.constant 0 : i32
    %c0_i32_1 = arith.constant 0 : i32
    return %c0_i32, %c0_i32_0 : i32, i32
  }
  func.func @transform_2(%arg0: i32) -> (i32, i32, i32) {
    %c0_i32 = arith.constant 0 : i32
    %c0_i32_0 = arith.constant 0 : i32
    %c0_i32_1 = arith.constant 0 : i32
    %c0_i32_2 = arith.constant 0 : i32
    return %c0_i32, %c0_i32_0, %c0_i32_1 : i32, i32, i32
  }
  func.func @transform_3(%arg0: i32) -> (i32, i32) {
    %c0_i32 = arith.constant 0 : i32
    %c0_i32_0 = arith.constant 0 : i32
    %c0_i32_1 = arith.constant 0 : i32
    return %c0_i32, %c0_i32_0 : i32, i32
  }
  func.func @transform_4(%arg0: i32) -> (i32, i32) {
    %c0_i32 = arith.constant 0 : i32
    %c0_i32_0 = arith.constant 0 : i32
    %c0_i32_1 = arith.constant 0 : i32
    return %c0_i32, %c0_i32_0 : i32, i32
  }
  func.func @transform_5(%arg0: i32) -> (i32, i32) {
    %c0_i32 = arith.constant 0 : i32
    %c0_i32_0 = arith.constant 0 : i32
    %c0_i32_1 = arith.constant 0 : i32
    return %c0_i32, %c0_i32_0 : i32, i32
  }
  func.func @transform_6(%arg0: i32) -> (i32, i32) {
    %c0_i32 = arith.constant 0 : i32
    %c0_i32_0 = arith.constant 0 : i32
    %c0_i32_1 = arith.constant 0 : i32
    return %c0_i32, %c0_i32_0 : i32, i32
  }
  func.func @transform_7(%arg0: i32) -> (i32, i32) {
    %c0_i32 = arith.constant 0 : i32
    %c0_i32_0 = arith.constant 0 : i32
    %c0_i32_1 = arith.constant 0 : i32
    return %c0_i32, %c0_i32_0 : i32, i32
  }
  func.func @transform_8(%arg0: i32) -> (i32, i32) {
    %c0_i32 = arith.constant 0 : i32
    %c0_i32_0 = arith.constant 0 : i32
    %c0_i32_1 = arith.constant 0 : i32
    return %c0_i32, %c0_i32_0 : i32, i32
  }
  func.func @transform_9(%arg0: i32) -> (i32, i32) {
    %c0_i32 = arith.constant 0 : i32
    %c0_i32_0 = arith.constant 0 : i32
    %c0_i32_1 = arith.constant 0 : i32
    return %c0_i32, %c0_i32_0 : i32, i32
  }
  func.func @transform_10(%arg0: i32) -> (i32, i32, i32, i32) {
    %c0_i32 = arith.constant 0 : i32
    %c0_i32_0 = arith.constant 0 : i32
    %c0_i32_1 = arith.constant 0 : i32
    %c0_i32_2 = arith.constant 0 : i32
    return %arg0, %c0_i32, %c0_i32_0, %c0_i32_1 : i32, i32, i32, i32
  }
}

</mosaic_0001>

<bundles_post_ra>
// kernel: bottleneck_forward_nhwc.1
= control target key start
LH: loop header
LB: loop body
LE: loop exit
PB: predicated region body
PF: predicated region fallthrough
CT: control target
= control target key end

     0   :  { %s8101_s0 = inlined_call_operand.hbm [shape: f32[2,16,16,128], index: 0, kind: input, shape index: {}]   ;;  %s8102_s1 = inlined_call_operand.hbm [shape: bf16[128,128], index: 1, kind: input, shape index: {}]   ;;  %s8103_s2 = inlined_call_operand.hbm [shape: bf16[3,384,128], index: 2, kind: input, shape index: {}]   ;;  %s8104_s3 = inlined_call_operand.hbm [shape: bf16[128,128], index: 3, kind: input, shape index: {}]   ;;  %s8105_s4 = inlined_call_operand.vmem [shape: f32[1,128], index: 4, kind: input, shape index: {}]   ;;  %s8106_s5 = inlined_call_operand.hbm [shape: f32[1,128], index: 5, kind: input, shape index: {}]   ;;  %s8107_s6 = inlined_call_operand.vmem [shape: f32[1,128], index: 6, kind: input, shape index: {}]   ;;  %s8108_s7 = inlined_call_operand.hbm [shape: f32[1,128], index: 7, kind: input, shape index: {}]   ;;  %s8109_s8 = inlined_call_operand.vmem [shape: f32[1,128], index: 8, kind: input, shape index: {}]   ;;  %s8110_s9 = inlined_call_operand.hbm [shape: f32[1,128], index: 9, kind: input, shape index: {}]   ;;  %s8111_s10 = inlined_call_operand.hbm [shape: f32[2,16,16,128], index: 10, kind: output, shape index: {}]  }
   0x1   :  { %8132 = sst [smem:[#allocation65_spill]] %s8102_s1 }
   0x2   :  { %8133 = sst [smem:[#allocation66_spill]] %s8103_s2 }
   0x3   :  { %8134 = sst [smem:[#allocation67_spill]] %s8104_s3 }
   0x4   :  { %8135 = sst [smem:[#allocation68_spill]] %s8106_s5 }
   0x5   :  { %8136 = sst [smem:[#allocation69_spill]] %s8108_s7 }
   0x6   :  { %15 = vsyncpa [#allocation4], 0 }
   0x7   :  { %17 = vsyncpa [#allocation4 + $0x1], 0 }
   0x8   :  { %18 = vsyncpa [#allocation7], 0 }
   0x9   :  { %19 = vsyncpa [#allocation10], 0 }
   0xa   :  { %20 = vsyncpa [#allocation13], 0 }
   0xb   :  { %21 = vsyncpa [#allocation5], 0 }
   0xc   :  { %23 = vsyncpa [#allocation5 + $0x1], 0  ;;  %s6204_s13 = smov 0   ;;  %s6206_s14 = smov 0  }
   0xd   :  { %s6208_s15 = smov 0   ;;  %s6210_s16 = smov 0  }
   0xe LB: > { %s8137_s1 = sld [smem:[#allocation65_spill]]  ;;  %s6228_s20 = sadd.s32 4294967295, %s6134_s16   ;;  %s6134_s16 = sphi %s6210_s16, %s8297_s16   ;;  %s6130_s15 = sphi %s6208_s15, %s8296_s15   ;;  %s6126_s14 = sphi %s6206_s14, %s8295_s14   ;;  %s6122_s13 = sphi %s6204_s13, %s8294_s13  }
   0xf   : > { %p4942_p0 = scmp.ge.s32.totalorder %s6134_s16, 1  ;;  %p50_p1 = scmp.eq.s32.totalorder %s6228_s20, 0 }
  0x10   : > { %p275_p2 = scmp.lt.s32.totalorder %s6134_s16, 3  ;;  %s6136_s22 = smov [#allocation6]  }
  0x11   : > { %s288_s23 = sshll.u32 %s6136_s22, 4  ;;  %s8139_s3 = sld [smem:[#allocation67_spill]]  ;;  %s289_s23 = int_to_ptr.vmem [resolvable:$true] %s288_s23 }
  0x12   : > { %p6233_p3 = pnand %p4942_p0, %p275_p2  ;;  %s8141_s7 = sld [smem:[#allocation69_spill]] }
  0x13   : > { %s6137_s11 = smov [#allocation9]   ;;  %s6138_s17 = smov 64  }
  0x14   : > { %s286_s19 = sshll.u32 %s8137_s1, 4  ;;  %p5651_p4 = pneg %p6233_p3  ;;  %s287_s19 = int_to_ptr.hbm [resolvable:$true] %s286_s19 }
  0x15   : > { %s316_s12 = sshll.u32 %s6137_s11, 4  ;;  %s6139_s18 = smov 4   ;;  %s317_s12 = int_to_ptr.vmem [resolvable:$true] %s316_s12 }
  0x16   : > { %p6245_p6 = pnand %p5651_p4, %p50_p1  ;;  %s8142_s2 = sld [smem:[#allocation66_spill]] }
  0x17   : > { %s314_s26 = sshll.u32 %s8139_s3, 4  ;;  %s6140_s1 = smov [#allocation12]   ;;  %s315_s26 = int_to_ptr.hbm [resolvable:$true] %s314_s26 }
  0x18   : > { %s347_s30 = sshll.u32 %s8141_s7, 4  ;;  %s349_s3 = sshll.u32 %s6140_s1, 4  ;;  %s348_s30 = int_to_ptr.hbm [resolvable:$true] %s347_s30  ;;  %s350_s3 = int_to_ptr.vmem [resolvable:$true] %s349_s3 }
  0x19   : > { %5654 = dma.hbm_to_vmem [thread:$0]  (!%p6245_p6), %s287_s19, 1024, %s289_s23, [#allocation7], %s6138_s17, %s6138_s17, %s6139_s18  }
  0x1a   : > { %5660 = dma.hbm_to_vmem [thread:$0]  (!%p6245_p6), %s315_s26, 1024, %s317_s12, [#allocation10], %s6138_s17, %s6138_s17, %s6139_s18  }
  0x1b   : > { %5666 = dma.hbm_to_vmem [thread:$0]  (!%p6245_p6), %s348_s30, 16, %s350_s3, [#allocation13]  }
  0x1c   : > { %s300_s25 = sshll.u32 %s8142_s2, 4  ;;  %s6141_s28 = smov [#allocation8]   ;;  %s301_s25 = int_to_ptr.hbm [resolvable:$true] %s300_s25 }
  0x1d   : > { %s302_s29 = sshll.u32 %s6141_s28, 4  ;;  %s8143_s5 = sld [smem:[#allocation68_spill]]  ;;  %s303_s29 = int_to_ptr.vmem [resolvable:$true] %s302_s29 }
  0x1e   : > { %5657 = dma.hbm_to_vmem [thread:$0]  (!%p6245_p6), %s301_s25, 9216, %s303_s29, [#allocation7], %s6138_s17, %s6138_s17, %s6139_s18  }
  0x1f   : > { %s362_s3 = sshll.u32 %s8110_s9, 4  ;;  %s6142_s30 = smov [#allocation11]   ;;  %s363_s3 = int_to_ptr.hbm [resolvable:$true] %s362_s3 }
  0x20   : > { %s334_s12 = sshll.u32 %s6142_s30, 4  ;;  %s6143_s22 = smov [#allocation14]   ;;  %s335_s12 = int_to_ptr.vmem [resolvable:$true] %s334_s12 }
  0x21   : > { %s364_s17 = sshll.u32 %s6143_s22, 4  ;;  %s4941_s18 = sadd.s32 4294967294, %s6134_s16   ;;  %s365_s17 = int_to_ptr.vmem [resolvable:$true] %s364_s17 }
  0x22   : > { %5669 = dma.hbm_to_vmem [thread:$0]  (!%p6245_p6), %s363_s3, 16, %s365_s17, [#allocation13]  }
  0x23   : > { %s332_s26 = sshll.u32 %s8143_s5, 4  ;;  %s6275_s24 = sadd.s32 1, %s6134_s16   ;;  %s333_s26 = int_to_ptr.hbm [resolvable:$true] %s332_s26 }
  0x24   : > { %5663 = dma.hbm_to_vmem [thread:$0]  (!%p6245_p6), %s333_s26, 16, %s335_s12, [#allocation10]  }
  0x25   : > { %s33_s25 = ssub.s32 %s6134_s16, %s6275_s24  ;;  %s36_s28 = sadd.s32 1, %s6130_s15 }
  0x26   : > { %p34_p7 = scmp.eq.s32.totalorder %s33_s25, 0  ;;  %p43_p8 = scmp.ne.s32.totalorder %s6130_s15, %s6126_s14 }
  0x27   : > { %p44_p9 = scmp.eq.s32.totalorder %s6134_s16, 0  ;;  %p49_p10 = scmp.ne.s32.totalorder %s6126_s14, %s6122_s13 }
  0x28   : > { %s6286_s29 = scalar_select %p34_p7, %s6130_s15, %s36_s28  }
  0x29   : > { %p6288_p11 = por %p44_p9, %p43_p8  ;;  %p6294_p12 = por %p50_p1, %p49_p10 }
  0x2a   : > { %p262_p13 = scmp.eq.s32.totalorder %s6228_s20, 1  ;;  %p268_p0 = scmp.eq.s32.totalorder %s4941_s18, 1 }
  0x2b   : > { %p5684_p2 = scmp.lt.s32.totalorder %s6134_s16, 2  ;;  %s375_s23 = sand.u32 1, %s6130_s15  }
  0x2c   : > { %p6301_p4 = por %p262_p13, %p43_p8  ;;  %p6305_p6 = por %p268_p0, %p49_p10 }
  0x2d   : > { %s4950_s11 = sshll.u32 %s375_s23, 8  ;;  %s5319_s3 = sshll.u32 %s6134_s16, 8 }
  0x2e   : > { %s384_s22 = scalar_lea.hbm %s8101_s0, %s5319_s3  ;;  %s379_s17 = scalar_lea.vmem [#allocation3], %s4950_s11 }
  0x2f   : > { %s387_s25 = sshll.u32 %s379_s17, 4  ;;  %s385_s28 = sshll.u32 %s384_s22, 4  ;;  %s388_s25 = int_to_ptr.vmem [resolvable:$true] %s387_s25  ;;  %s386_s28 = int_to_ptr.hbm [resolvable:$true] %s385_s28 }
  0x30   : > { %p6315_p7 = pnand %p5684_p2, %p6288_p11  ;;  %s376_s2 = scalar_lea.sflag [#allocation4], %s375_s23 }
  0x31   : > { %s6023_s5 = sshra.s32 %s386_s28, 4  ;;  %s6030_s30 = scalar_lea.hbm %s8101_s0, 512  ;;  %s6024_s5 = int_to_ptr.hbm [resolvable:$true] %s6023_s5 }
  0x32   : > { %s6025_s7 = scalar_lea.hbm %s6024_s5, 256  ;;  %p6027_p9 = pneg %p6315_p7 }
  0x33   : > { %p6026_p8 = scmp.ne.s32.totalorder %s6024_s5, %s6025_s7  ;;  %p6031_p11 = scmp.lt.s32.totalorder %s6024_s5, %s8101_s0 }
  0x34   : > { %p6032_p0 = scmp.lt.s32.totalorder %s6030_s30, %s6025_s7 }
  0x35   : > { %p6028_p10 = pnand %p6027_p9, %p6026_p8 }
  0x36   : > { %p6033_p2 = por %p6032_p0, %p6031_p11 }
  0x37   : > { %p6029_p13 = pneg %p6028_p10 }
  0x39   : > { %p6034_p5 = pnand %p6033_p2, %p6029_p13 }
  0x3b   : > { %6037 = shalt.err (!%p6034_p5)
}
  0x3c   : > { %s6144_s23 = smov 128   ;;  %s6145_s22 = smov 8  }
  0x3d   : > { %5673 = dma.hbm_to_vmem [thread:$0]  (!%p6315_p7), %s386_s28, 4096, %s388_s25, %s376_s2, %s6144_s23, %s6144_s23, %s6145_s22  }
  0x3e   : > { %399 = sbr.rel (%p6233_p3) target bundleno = 1253 (0x4e5), region = 60 }
  0x43   : > { %s6332_s17 = sand.u32 1, %s6126_s14  }
  0x44   : > { %s4954_s5 = sshll.u32 %s6332_s17, 8  ;;  %s402_s7 = scalar_lea.sflag [#allocation4], %s6332_s17 }
  0x45   : > { %s6338_s11 = scalar_lea.vmem [#allocation3], %s4954_s5 }
  0x46   : > { %6098 = dma.done.wait (%p6294_p12), %s402_s7, 4096  }
  0x47   : > { %6100 = vsyncadd (%p6294_p12), %s402_s7, 4294963200 }
  0x48   : > { %6102 = dma.done.wait (%p50_p1), [#allocation7], 10240  }
  0x49   : > { %6104 = vsyncadd (%p50_p1), [#allocation7], 4294957056 }
  0x4a   : > { %6106 = dma.done.wait (%p50_p1), [#allocation10], 1040  }
  0x4b   : > { %6108 = vsyncadd (%p50_p1), [#allocation10], 4294966256 }
  0x4c   : > { %6110 = dma.done.wait (%p50_p1), [#allocation13], 32  }
  0x4d   : > { %6112 = vsyncadd (%p50_p1), [#allocation13], 4294967264  ;;  %v5327_v0 = vld [vmem:[#allocation6 + $0x38] sm:$0xff]  ;;  %v5326_v1 = vld [vmem:[#allocation6 + $0x30] sm:$0xff]  ;;  %vm787_vm0 = vcmask 1040384   ;;  %vm1242_vm5 = vcmask 1043456  }
  0x4e   : > { %586 = vmatpush.bf16.msra.mxu0 %v5327_v0  ;;  %5599 = vmatpush.bf16.msra.mxu3 %v5327_v0  ;;  %v5325_v2 = vld [vmem:[#allocation6 + $0x28] sm:$0xff]  ;;  %v5324_v3 = vld [vmem:[#allocation6 + $0x20] sm:$0xff]  ;;  %v5323_v4 = vld [vmem:[#allocation6 + $0x18] sm:$0xff]  ;;  %vm788_vm1 = vsmask.f32 256  ;;  %vm1821_vm10 = vcmask 1046528  }
  0x4f   : > { %v5322_v5 = vld [vmem:[#allocation6 + $0x10] sm:$0xff]  ;;  %v5321_v6 = vld [vmem:[#allocation6 + $0x8] sm:$0xff]  ;;  %v5320_v7 = vld [vmem:[#allocation6] sm:$0xff]  ;;  %vm838_vm3 = vsmask.f32 7938  ;;  %s7898_s12 = scalar_lea.vmem [#allocation15], %s4954_s5 }
  0x50   : > { %v474_v8 = vld [vmem:[%s6338_s11] sm:$0xff]  ;;  %v475_v9 = vld [vmem:[%s6338_s11 + $0x8] sm:$0xff]  ;;  %v476_v14 = vld [vmem:[%s6338_s11 + $0x10] sm:$0xff]  ;;  %vm920_vm7 = vsmask.f32 4368  ;;  %s5408_s19 = sshll.u32 %s6228_s20, 8 }
  0x51   : > { %v498_v10 = vld [vmem:[%s6338_s11 + $0xc0] sm:$0xff]  ;;  %v499_v11 = vld [vmem:[%s6338_s11 + $0xc8] sm:$0xff]  ;;  %v506_v12 = vpack.c.bf16 %v475_v9, %v474_v8  ;;  %v477_v15 = vld [vmem:[%s6338_s11 + $0x18] sm:$0xff]  ;;  %vm1564_vm9 = vsmask.f32 7424  ;;  %s4807_s5 = scalar_lea.hbm %s8111_s10, %s5408_s19  ;;  %s4808_s7 = sshll.u32 %s7898_s12, 4  ;;  %s4809_s7 = int_to_ptr.vmem [resolvable:$true] %s4808_s7 }
  0x52   : > { %587 = vmatpush.bf16.msra.mxu0 %v5326_v1  ;;  %5600 = vmatpush.bf16.msra.mxu3 %v5326_v1  ;;  %v518_v13 = vpack.c.bf16 %v499_v11, %v498_v10  ;;  %v500_v16 = vld [vmem:[%s6338_s11 + $0xd0] sm:$0xff]  ;;  %v501_v17 = vld [vmem:[%s6338_s11 + $0xd8] sm:$0xff]  ;;  %v507_v18 = vpack.c.bf16 %v477_v15, %v476_v14  ;;  %v478_v20 = vld [vmem:[%s6338_s11 + $0x20] sm:$0xff]  ;;  %s4810_s2 = sshll.u32 %s4807_s5, 4  ;;  %s4796_s20 = scalar_lea.sflag [#allocation5], %s6332_s17  ;;  %s4811_s2 = int_to_ptr.hbm [resolvable:$true] %s4810_s2 }
  0x53   : > { %v519_v19 = vpack.c.bf16 %v501_v17, %v500_v16  ;;  %v479_v21 = vld [vmem:[%s6338_s11 + $0x28] sm:$0xff]  ;;  %v502_v22 = vld [vmem:[%s6338_s11 + $0xe0] sm:$0xff]  ;;  %v480_v26 = vld [vmem:[%s6338_s11 + $0x30] sm:$0xff]  ;;  %s6067_s21 = sshra.s32 %s4811_s2, 4  ;;  %s6073_s18 = scalar_lea.hbm %s8111_s10, 512  ;;  %s6068_s21 = int_to_ptr.hbm [resolvable:$true] %s6067_s21 }
  0x54   : > { %v503_v23 = vld [vmem:[%s6338_s11 + $0xe8] sm:$0xff]  ;;  %v508_v24 = vpack.c.bf16 %v479_v21, %v478_v20  ;;  %v481_v27 = vld [vmem:[%s6338_s11 + $0x38] sm:$0xff]  ;;  %v504_v28 = vld [vmem:[%s6338_s11 + $0xf0] sm:$0xff]  ;;  %s6069_s27 = scalar_lea.hbm %s6068_s21, 256  ;;  %p6074_p12 = scmp.lt.s32.totalorder %s6068_s21, %s8111_s10 }
  0x55   : > { %v520_v25 = vpack.c.bf16 %v503_v23, %v502_v22  ;;  %v505_v29 = vld [vmem:[%s6338_s11 + $0xf8] sm:$0xff]  ;;  %v509_v30 = vpack.c.bf16 %v481_v27, %v480_v26  ;;  %v482_v32 = vld [vmem:[%s6338_s11 + $0x40] sm:$0xff]  ;;  %v483_v33 = vld [vmem:[%s6338_s11 + $0x48] sm:$0xff]  ;;  %p6070_p1 = scmp.ne.s32.totalorder %s6068_s21, %s6069_s27  ;;  %p6075_p7 = scmp.lt.s32.totalorder %s6073_s18, %s6069_s27 }
  0x56   : > { %588 = vmatpush.bf16.msra.mxu0 %v5325_v2  ;;  %5601 = vmatpush.bf16.msra.mxu3 %v5325_v2  ;;  %v521_v31 = vpack.c.bf16 %v505_v29, %v504_v28  ;;  %v510_v34 = vpack.c.bf16 %v483_v33, %v482_v32  ;;  %v484_v35 = vld [vmem:[%s6338_s11 + $0x50] sm:$0xff]  ;;  %v485_v36 = vld [vmem:[%s6338_s11 + $0x58] sm:$0xff]  ;;  %v486_v38 = vld [vmem:[%s6338_s11 + $0x60] sm:$0xff] }
  0x57   : > { %v511_v37 = vpack.c.bf16 %v485_v36, %v484_v35  ;;  %v487_v39 = vld [vmem:[%s6338_s11 + $0x68] sm:$0xff]  ;;  %v5359_v41 = vld [vmem:[#allocation8 + $0xf8] sm:$0xff]  ;;  %vm6379_vm2 = vmand %vm787_vm0, %vm788_vm1  ;;  %p6071_p3 = pnand %p6070_p1, %p6301_p4  ;;  %p6076_p8 = por %p6075_p7, %p6074_p12 }
  0x58   : > { %v512_v40 = vpack.c.bf16 %v487_v39, %v486_v38  ;;  %v790_v43 = vld [vmem:[#allocation2 + $0xc] sm:$0x1]  ;;  %2655 = vmatpush.bf16.msra.mxu1 %v5359_v41  ;;  %vm6386_vm4 = vmand %vm787_vm0, %vm838_vm3  ;;  %v5367_v47 = vld [vmem:[#allocation8 + $0x138] sm:$0xff] }
  0x59   : > { %v791_v44 = vsel %vm6379_vm2, 0, %v790_v43  ;;  %v5358_v45 = vld [vmem:[#allocation8 + $0xf0] sm:$0xff]  ;;  %v489_v49 = vld [vmem:[%s6338_s11 + $0x78] sm:$0xff]  ;;  %v5357_v50 = vld [vmem:[#allocation8 + $0xe8] sm:$0xff]  ;;  %2744 = vmatpush.bf16.msra.mxu2 %v5367_v47  ;;  %p6072_p5 = pneg %p6071_p3 }
  0x5a   : > { %589 = vmatpush.bf16.msra.mxu0 %v5324_v3  ;;  %5602 = vmatpush.bf16.msra.mxu3 %v5324_v3  ;;  %792 = vst [vmem:[#allocation2 + $0xc] sm:$0x1] %v791_v44  ;;  %v488_v48 = vld [vmem:[%s6338_s11 + $0x70] sm:$0xff]  ;;  %v840_v51 = vld [vmem:[#allocation2 + $0x14] sm:$0x1]  ;;  %v5356_v56 = vld [vmem:[#allocation8 + $0xe0] sm:$0xff] }
  0x5b   : > { %v841_v52 = vsel %vm6386_vm4, 0, %v840_v51  ;;  %v513_v53 = vpack.c.bf16 %v489_v49, %v488_v48  ;;  %v5366_v54 = vld [vmem:[#allocation8 + $0x130] sm:$0xff]  ;;  %v826_v55 = vld [vmem:[#allocation2 + $0x9c] sm:$0x1]  ;;  %v6396_v58 = vld [vmem:[#allocation8 + $0x128] sm:$0xff]  ;;  %p6077_p9 = pnand %p6076_p8, %p6072_p5 }
  0x5c   : > { %2656 = vmatpush.bf16.msra.mxu1 %v5358_v45  ;;  %842 = vst [vmem:[#allocation2 + $0x14] sm:$0x1] %v841_v52  ;;  %v827_v57 = vsel %vm6379_vm2, 0, %v826_v55  ;;  %v5355_v59 = vld [vmem:[#allocation8 + $0xd8] sm:$0xff]  ;;  %v793_v60 = vld [vmem:[#allocation2 + $0x18] sm:$0x1]  ;;  %vm6446_vm6 = vmand %vm1242_vm5, %vm838_vm3 }
  0x5d   : > { %2745 = vmatpush.bf16.msra.mxu2 %v5366_v54  ;;  %828 = vst [vmem:[#allocation2 + $0x9c] sm:$0x1] %v827_v57  ;;  %v794_v61 = vsel %vm6379_vm2, 0, %v793_v60  ;;  %v6401_v62 = vld [vmem:[#allocation8 + $0x120] sm:$0xff]  ;;  %v5354_v63 = vld [vmem:[#allocation8 + $0xd0] sm:$0xff]  ;;  %v6406_v2 = vld [vmem:[#allocation8 + $0x118] sm:$0xff] }
  0x5e   : > { %590 = vmatpush.bf16.msra.mxu0 %v5323_v4  ;;  %5603 = vmatpush.bf16.msra.mxu3 %v5323_v4  ;;  %795 = vst [vmem:[#allocation2 + $0x18] sm:$0x1] %v794_v61  ;;  %v876_v0 = vld [vmem:[#allocation2 + $0xa4] sm:$0x1]  ;;  %v490_v3 = vld [vmem:[%s6338_s11 + $0x80] sm:$0xff]  ;;  %v6420_v11 = vld [vmem:[#allocation8 + $0x110] sm:$0xff] }
  0x5f   : > { %v877_v1 = vsel %vm6386_vm4, 0, %v876_v0  ;;  %v491_v4 = vld [vmem:[%s6338_s11 + $0x88] sm:$0xff]  ;;  %v6416_v8 = vld [vmem:[#allocation11] ss:$0 sm:$0xff]  ;;  %v829_v15 = vld [vmem:[#allocation2 + $0xa8] sm:$0x1] }
  0x60   : > { %2657 = vmatpush.bf16.msra.mxu1 %v5357_v50  ;;  %878 = vst [vmem:[#allocation2 + $0xa4] sm:$0x1] %v877_v1  ;;  %v514_v9 = vpack.c.bf16 %v491_v4, %v490_v3  ;;  %v830_v16 = vsel %vm6379_vm2, 0, %v829_v15  ;;  %v796_v22 = vld [vmem:[#allocation2 + $0x24] sm:$0x1]  ;;  %v6433_v26 = vld [vmem:[#allocation8 + $0x100] sm:$0xff]  ;;  %vm6466_vm8 = vmor %vm788_vm1, %vm920_vm7 }
  0x61   : > { %2746 = vmatpush.bf16.msra.mxu2 %v6396_v58  ;;  %831 = vst [vmem:[#allocation2 + $0xa8] sm:$0x1] %v830_v16  ;;  %v5334_v27 = vld [vmem:[#allocation8 + $0x30] sm:$0xff]  ;;  %v879_v32 = vld [vmem:[#allocation2 + $0xb0] sm:$0x1]  ;;  %v5333_v57 = vld [vmem:[#allocation8 + $0x28] sm:$0xff] }
  0x62   : > { %591 = vmatpush.bf16.msra.mxu0 %v5322_v5  ;;  %5604 = vmatpush.bf16.msra.mxu3 %v5322_v5  ;;  %v5353_v5 = vld [vmem:[#allocation8 + $0xc8] sm:$0xff]  ;;  %v492_v33 = vld [vmem:[%s6338_s11 + $0x90] sm:$0xff]  ;;  %v493_v39 = vld [vmem:[%s6338_s11 + $0x98] sm:$0xff] }
  0x63   : > { %v515_v48 = vpack.c.bf16 %v493_v39, %v492_v33  ;;  %v846_v49 = vld [vmem:[#allocation2 + $0x2c] sm:$0x1]  ;;  %v5343_v61 = vld [vmem:[#allocation8 + $0x78] sm:$0xff]  ;;  %v882_v39 = vld [vmem:[#allocation2 + $0xbc] sm:$0x1] }
  0x64   : > { %2658 = vmatpush.bf16.msra.mxu1 %v5356_v56  ;;  %v1328_v0 = vld [vmem:[#allocation2 + $0x9c] sm:$0xf] }
  0x65   : > { %2747 = vmatpush.bf16.msra.mxu2 %v6401_v62 }
  0x66   : > { %592 = vmatpush.bf16.msra.mxu0 %v5321_v6  ;;  %5605 = vmatpush.bf16.msra.mxu3 %v5321_v6  ;;  %v6413_v6 = vld [vmem:[%s8105_s4] ss:$0 sm:$0xff] }
  0x68   : > { %2659 = vmatpush.bf16.msra.mxu1 %v5355_v59 }
  0x69   : > { %2748 = vmatpush.bf16.msra.mxu2 %v6406_v2 }
  0x6a   : > { %593 = vmatpush.bf16.msra.mxu0 %v5320_v7  ;;  %5606 = vmatpush.bf16.msra.mxu3 %v5320_v7  ;;  %v843_v7 = vld [vmem:[#allocation2 + $0x20] sm:$0x1] }
  0x6b   : > { %v844_v10 = vsel %vm6386_vm4, 0, %v843_v7 }
  0x6c   : > { %2660 = vmatpush.bf16.msra.mxu1 %v5354_v63  ;;  %845 = vst [vmem:[#allocation2 + $0x20] sm:$0x1] %v844_v10 }
  0x6d   : > { %594 = vmatmul.bf16.vlgmr.msra.gmra.mxu0 %v506_v12  ;;  %654 = vmatmul.bf16.vlgmr.msra.gmra.mxu3 %v518_v13  ;;  %v5352_v13 = vld [vmem:[#allocation8 + $0xc0] sm:$0xff] }
  0x6e   : > { %5607 = vmatpush.bf16.msrb.mxu3 %v5359_v41  ;;  %2749 = vmatpush.bf16.msra.mxu2 %v6420_v11  ;;  %v1244_v41 = vld [vmem:[#allocation2 + $0xc] sm:$0xf] }
  0x70   : > { %2661 = vmatpush.bf16.msra.mxu1 %v5353_v5 }
  0x72   : > { %5608 = vmatpush.bf16.msrb.mxu3 %v5358_v45 }
  0x74   : > { %2662 = vmatpush.bf16.msra.mxu1 %v5352_v13 }
  0x76   : > { %5609 = vmatpush.bf16.msrb.mxu3 %v5357_v50 }
  0x78   : > { %3155 = vmatpush.bf16.msrb.mxu1 %v5343_v61 }
  0x7a   : > { %5610 = vmatpush.bf16.msrb.mxu3 %v5356_v56  ;;  %v847_v56 = vsel %vm6386_vm4, 0, %v846_v49 }
  0x7b   : > { %848 = vst [vmem:[#allocation2 + $0x2c] sm:$0x1] %v847_v56 }
  0x7d   : > { %599 = vmatmul.bf16.gmra.mxu0 %v507_v18  ;;  %659 = vmatmul.bf16.gmra.mxu3 %v519_v19  ;;  %v5335_v18 = vld [vmem:[#allocation8 + $0x38] sm:$0xff]  ;;  %v6427_v19 = vld [vmem:[#allocation8 + $0x108] sm:$0xff] }
  0x7e   : > { %5611 = vmatpush.bf16.msrb.mxu3 %v5355_v59  ;;  %3066 = vmatpush.bf16.msrb.mxu0 %v5335_v18 }
  0x7f   : > { %2750 = vmatpush.bf16.msra.mxu2 %v6427_v19 }
  0x82   : > { %5612 = vmatpush.bf16.msrb.mxu3 %v5354_v63  ;;  %3067 = vmatpush.bf16.msrb.mxu0 %v5334_v27  ;;  %v832_v63 = vld [vmem:[#allocation2 + $0xb4] sm:$0x1] }
  0x83   : > { %2751 = vmatpush.bf16.msra.mxu2 %v6433_v26 }
  0x86   : > { %5613 = vmatpush.bf16.msrb.mxu3 %v5353_v5  ;;  %3068 = vmatpush.bf16.msrb.mxu0 %v5333_v57 }
  0x8a   : > { %5614 = vmatpush.bf16.msrb.mxu3 %v5352_v13 }
  0x8d   : > { %604 = vmatmul.bf16.gmra.mxu0 %v508_v24  ;;  %664 = vmatmul.bf16.gmra.mxu3 %v520_v25  ;;  %v797_v25 = vsel %vm6379_vm2, 0, %v796_v22 }
  0x8e   : > { %5615 = vmatpush.bf16.msra.mxu3 %v5367_v47  ;;  %798 = vst [vmem:[#allocation2 + $0x24] sm:$0x1] %v797_v25 }
  0x92   : > { %5616 = vmatpush.bf16.msra.mxu3 %v5366_v54 }
  0x96   : > { %5617 = vmatpush.bf16.msra.mxu3 %v6396_v58 }
  0x9a   : > { %5618 = vmatpush.bf16.msra.mxu3 %v6401_v62  ;;  %v833_v62 = vsel %vm6379_vm2, 0, %v832_v63 }
  0x9b   : > { %834 = vst [vmem:[#allocation2 + $0xb4] sm:$0x1] %v833_v62 }
  0x9d   : > { %609 = vmatmul.bf16.gmra.mxu0 %v509_v30  ;;  %669 = vmatmul.bf16.gmra.mxu3 %v521_v31 }
  0x9e   : > { %5619 = vmatpush.bf16.msra.mxu3 %v6406_v2 }
  0xa2   : > { %5620 = vmatpush.bf16.msra.mxu3 %v6420_v11 }
  0xa6   : > { %5621 = vmatpush.bf16.msra.mxu3 %v6427_v19 }
  0xaa   : > { %5622 = vmatpush.bf16.msra.mxu3 %v6433_v26 }
  0xad   : > { %614 = vmatmul.bf16.gmra.mxu0 %v510_v34  ;;  %v880_v34 = vsel %vm6386_vm4, 0, %v879_v32 }
  0xae   : > { %881 = vst [vmem:[#allocation2 + $0xb0] sm:$0x1] %v880_v34 }
  0xbd   : > { %619 = vmatmul.bf16.gmra.mxu0 %v511_v37 }
  0xcd   : > { %624 = vmatmul.bf16.gmra.mxu0 %v512_v40 }
  0xdd   : > { %629 = vmatmul.bf16.gmra.mxu0 %v513_v53 }
  0xea   : > { %v595_v12 = vpop.f32.mrf.mxu0 }
  0xeb   : > { %v679_v14 = vmul.f32 %v6413_v6, %v595_v12  ;;  %v1248_v12 = vld [vmem:[#allocation2 + $0x14] sm:$0x1] }
  0xed   : > { %v715_v17 = vadd.f32 %v6416_v8, %v679_v14  ;;  %634 = vmatmul.bf16.gmra.mxu0 %v514_v9  ;;  %v5332_v14 = vld [vmem:[#allocation8 + $0x20] sm:$0xff] }
  0xee   : > { %3069 = vmatpush.bf16.msrb.mxu0 %v5332_v14 }
  0xef   : > { %v747_v20 = vmax.f32 %v715_v17, 0.0 }
  0xf0   : > { %v655_v21 = vpop.f32.mrf.mxu3 }
  0xf1   : > { %v888_v23 = vpack.c.bf16 %v747_v20, %v747_v20  ;;  %v703_v24 = vmul.f32 %v6413_v6, %v655_v21 }
  0xf2   : > { %v597_v28 = vpop.f32.mrf.mxu0 }
  0xf3   : > { %v923_v29 = vshrl.u32 %v888_v23, 16  ;;  %v739_v30 = vadd.f32 %v6416_v8, %v703_v24  ;;  %v680_v31 = vmul.f32 %v6413_v6, %v597_v28  ;;  %v926_v36 = vshll.u32 %v888_v23, 16 }
  0xf5   : > { %v925_v35 = vrot.slane %v923_v29, 7  ;;  %v771_v37 = vmax.f32 %v739_v30, 0.0  ;;  %v716_v38 = vadd.f32 %v6416_v8, %v680_v31  ;;  %v5331_v29 = vld [vmem:[#allocation8 + $0x18] sm:$0xff]  ;;  %v1332_v30 = vld [vmem:[#allocation2 + $0xa4] sm:$0x1] }
  0xf6   : > { %3070 = vmatpush.bf16.msrb.mxu0 %v5331_v29 }
  0xf7   : > { %v928_v43 = vor.u32 %v926_v36, %v925_v35  ;;  %v912_v44 = vpack.c.bf16 %v771_v37, %v771_v37  ;;  %v748_v45 = vmax.f32 %v716_v38, 0.0  ;;  %v929_v9 = vrot.slane %v925_v35, 4  ;;  %v1251_v37 = vld [vmem:[#allocation2 + $0x18] sm:$0xf] }
  0xf8   : > { %v657_v47 = vpop.f32.mrf.mxu3  ;;  %v494_v38 = vld [vmem:[%s6338_s11 + $0xa0] sm:$0xff] }
  0xf9   : > { %v1245_v50 = vsel %vm6446_vm6, %v928_v43, %v1244_v41  ;;  %v1127_v51 = vshrl.u32 %v912_v44, 16  ;;  %v1130_v52 = vshll.u32 %v912_v44, 16  ;;  %v889_v53 = vpack.c.bf16 %v748_v45, %v748_v45  ;;  %v495_v44 = vld [vmem:[%s6338_s11 + $0xa8] sm:$0xff] }
  0xfa   : > { %1246 = vst [vmem:[#allocation2 + $0xc] sm:$0xf] %v1245_v50  ;;  %v704_v54 = vmul.f32 %v6413_v6, %v657_v47  ;;  %v600_v55 = vpop.f32.mrf.mxu0  ;;  %v883_v45 = vsel %vm6386_vm4, 0, %v882_v39  ;;  %v799_v47 = vld [vmem:[#allocation2 + $0x30] sm:$0x1] }
  0xfb   : > { %v6456_v58 = vrot.slane %v1127_v51, 7  ;;  %v931_v59 = vshrl.u32 %v889_v53, 16  ;;  %v681_v60 = vmul.f32 %v6413_v6, %v600_v55  ;;  %v934_v5 = vshll.u32 %v889_v53, 16  ;;  %884 = vst [vmem:[#allocation2 + $0xbc] sm:$0x1] %v883_v45  ;;  %v5330_v51 = vld [vmem:[#allocation8 + $0x10] sm:$0xff] }
  0xfc   : > { %v740_v1 = vadd.f32 %v6416_v8, %v704_v54  ;;  %v800_v50 = vsel %vm6379_vm2, 0, %v799_v47  ;;  %3071 = vmatpush.bf16.msrb.mxu0 %v5330_v51 }
  0xfd   : > { %v1132_v3 = vor.u32 %v1130_v52, %v6456_v58  ;;  %v933_v4 = vrot.slane %v931_v59, 7  ;;  %v717_v7 = vadd.f32 %v6416_v8, %v681_v60  ;;  %639 = vmatmul.bf16.gmra.mxu0 %v515_v48  ;;  %v1133_v34 = vrot.slane %v6456_v58, 4  ;;  %801 = vst [vmem:[#allocation2 + $0x30] sm:$0x1] %v800_v50 }
  0xfe   : > { %v772_v13 = vmax.f32 %v740_v1, 0.0  ;;  %v516_v58 = vpack.c.bf16 %v495_v44, %v494_v38  ;;  %v1339_v44 = vld [vmem:[#allocation2 + $0xb0] sm:$0x1] }
  0xff   : > { %v1329_v15 = vsel %vm6446_vm6, %v1132_v3, %v1328_v0  ;;  %v936_v16 = vor.u32 %v934_v5, %v933_v4  ;;  %v938_v17 = vrot.slane %v933_v4, 4  ;;  %v749_v18 = vmax.f32 %v717_v7, 0.0  ;;  %v5329_v4 = vld [vmem:[#allocation8 + $0x8] sm:$0xff] }
 0x100   : > { %1330 = vst [vmem:[#allocation2 + $0x9c] sm:$0xf] %v1329_v15  ;;  %v913_v20 = vpack.c.bf16 %v772_v13, %v772_v13  ;;  %v660_v21 = vpop.f32.mrf.mxu3  ;;  %3072 = vmatpush.bf16.msrb.mxu0 %v5329_v4  ;;  %v6146_v15 = vmov 0  }
 0x101   : > { %v937_v22 = vsel %vm6466_vm8, %v929_v9, %v936_v16  ;;  %v1249_v23 = vsel %vm6379_vm2, %v938_v17, %v1248_v12  ;;  %v890_v24 = vpack.c.bf16 %v749_v18, %v749_v18  ;;  %v705_v25 = vmul.f32 %v6413_v6, %v660_v21  ;;  %v1335_v12 = vld [vmem:[#allocation2 + $0xa8] sm:$0xf]  ;;  %779 = vst [vmem:[#allocation2] sm:$0xf] %v6146_v15  ;;  %v1255_v21 = vld [vmem:[#allocation2 + $0x20] sm:$0x1] }
 0x102   : > { %1247 = vst [vmem:[#allocation2 + $0x10] sm:$0xf] %v937_v22  ;;  %v1135_v2 = vshrl.u32 %v913_v20, 16  ;;  %v1138_v27 = vshll.u32 %v913_v20, 16  ;;  %v602_v28 = vpop.f32.mrf.mxu0 }
 0x103   : > { %1250 = vst [vmem:[#allocation2 + $0x14] sm:$0x1] %v1249_v23  ;;  %v940_v31 = vshrl.u32 %v890_v24, 16  ;;  %v741_v32 = vadd.f32 %v6416_v8, %v705_v25  ;;  %v682_v33 = vmul.f32 %v6413_v6, %v602_v28  ;;  %v943_v36 = vshll.u32 %v890_v24, 16  ;;  %v5328_v24 = vld [vmem:[#allocation8] sm:$0xff] }
 0x104   : > { %v1137_v35 = vrot.slane %v1135_v2, 7  ;;  %780 = vst [vmem:[#allocation2 + $0x4] sm:$0xf] %v6146_v15  ;;  %3073 = vmatpush.bf16.msrb.mxu0 %v5328_v24 }
 0x105   : > { %v6483_v41 = vrot.slane %v940_v31, 7  ;;  %v773_v43 = vmax.f32 %v741_v32, 0.0  ;;  %v718_v11 = vadd.f32 %v6416_v8, %v682_v33  ;;  %781 = vst [vmem:[#allocation2 + $0x8] sm:$0x1] %v6146_v15 }
 0x106   : > { %v1140_v48 = vor.u32 %v1138_v27, %v1137_v35  ;;  %v1142_v49 = vrot.slane %v1137_v35, 4  ;;  %783 = vst [vmem:[#allocation2 + $0xcc] sm:$0xf] %v6146_v15 }
 0x107   : > { %v945_v52 = vor.u32 %v943_v36, %v6483_v41  ;;  %v914_v53 = vpack.c.bf16 %v773_v43, %v773_v43  ;;  %v750_v54 = vmax.f32 %v718_v11, 0.0  ;;  %v946_v20 = vrot.slane %v6483_v41, 4  ;;  %v849_v11 = vld [vmem:[#allocation2 + $0x38] sm:$0x1]  ;;  %784 = vst [vmem:[#allocation2 + $0xd0] sm:$0xf] %v6146_v15 }
 0x108   : > { %v1141_v55 = vsel %vm6466_vm8, %v1133_v34, %v1140_v48  ;;  %v1333_v56 = vsel %vm6379_vm2, %v1142_v49, %v1332_v30  ;;  %v662_v57 = vpop.f32.mrf.mxu3  ;;  %785 = vst [vmem:[#allocation2 + $0xd4] sm:$0x1] %v6146_v15 }
 0x109   : > { %1331 = vst [vmem:[#allocation2 + $0xa0] sm:$0xf] %v1141_v55  ;;  %v1252_v59 = vsel %vm6446_vm6, %v945_v52, %v1251_v37  ;;  %v1144_v60 = vshrl.u32 %v914_v53, 16  ;;  %v1147_v19 = vshll.u32 %v914_v53, 16  ;;  %v891_v61 = vpack.c.bf16 %v750_v54, %v750_v54  ;;  %v6499_v63 = vld [vmem:[#allocation2 + $0xc] sm:$0xff]  }
 0x10a   : > { %v6501_v0 = vld [vmem:[#allocation2 + $0xc] sm:$0xf0]  ;;  %1334 = vst [vmem:[#allocation2 + $0xa4] sm:$0x1] %v1333_v56  ;;  %v706_v1 = vmul.f32 %v6413_v6, %v662_v57  ;;  %v605_v62 = vpop.f32.mrf.mxu0  ;;  %v1966_v3 = vld [vmem:[#allocation2 + $0x14] sm:$0x1]  ;;  %2663 = vmatmul.bf16.vlgmr.msra.gmra.mxu1 %v6499_v63 }
 0x10b   : > { %1253 = vst [vmem:[#allocation2 + $0x18] sm:$0xf] %v1252_v59  ;;  %v6505_v5 = vrot.slane %v1144_v60, 7  ;;  %v948_v7 = vshrl.u32 %v891_v61, 16  ;;  %v683_v9 = vmul.f32 %v6413_v6, %v605_v62  ;;  %v2110_v14 = vunpack.c.l.b16 %v1966_v3  ;;  %v496_v53 = vld [vmem:[%s6338_s11 + $0xb0] sm:$0xff]  ;;  %v497_v54 = vld [vmem:[%s6338_s11 + $0xb8] sm:$0xff] }
 0x10c   : > { %v742_v13 = vadd.f32 %v6416_v8, %v706_v1  ;;  %v951_v18 = vshll.u32 %v891_v61, 16  ;;  %v2145_v34 = vshll.u32 %v6499_v63, 16  ;;  %v5342_v55 = vld [vmem:[#allocation8 + $0x70] sm:$0xff]  ;;  %v850_v59 = vsel %vm6386_vm4, 0, %v849_v11  ;;  %v1258_v61 = vld [vmem:[#allocation2 + $0x24] sm:$0xf] }
 0x10d   : > { %v1149_v16 = vor.u32 %v1147_v19, %v6505_v5  ;;  %v950_v17 = vrot.slane %v948_v7, 7  ;;  %v719_v26 = vadd.f32 %v6416_v8, %v683_v9  ;;  %644 = vmatmul.bf16.gmra.mxu0 %v516_v58  ;;  %v6515_v23 = vpack.c.b16 %v2110_v14, %v2110_v14  ;;  %851 = vst [vmem:[#allocation2 + $0x38] sm:$0x1] %v850_v59 }
 0x10e   : > { %v774_v22 = vmax.f32 %v742_v13, 0.0  ;;  %v1150_v29 = vrot.slane %v6505_v5, 4  ;;  %v2147_v52 = vrot.slane %v2145_v34, 1  ;;  %v2143_v1 = vshrl.u32 %v6499_v63, 16  ;;  %3156 = vmatpush.bf16.msrb.mxu1 %v5342_v55 }
 0x10f   : > { %v1336_v25 = vsel %vm6446_vm6, %v1149_v16, %v1335_v12  ;;  %v953_v2 = vor.u32 %v951_v18, %v950_v17  ;;  %v955_v27 = vrot.slane %v950_v17, 4  ;;  %v751_v28 = vmax.f32 %v719_v26, 0.0  ;;  %v835_v26 = vld [vmem:[#allocation2 + $0xc0] sm:$0x1] }
 0x110   : > { %1337 = vst [vmem:[#allocation2 + $0xa8] sm:$0xf] %v1336_v25  ;;  %v915_v30 = vpack.c.bf16 %v774_v22, %v774_v22  ;;  %v665_v31 = vpop.f32.mrf.mxu3  ;;  %v6521_v32 = vld [vmem:[#allocation2 + $0x9c] sm:$0xff]   ;;  %v2150_v49 = vshll.u32 %v6515_v23, 16  ;;  %v517_v5 = vpack.c.bf16 %v497_v54, %v496_v53  ;;  %v2148_v12 = vor.u32 %v2147_v52, %v2143_v1 }
 0x111   : > { %v6523_v33 = vld [vmem:[#allocation2 + $0x9c] sm:$0xf0]  ;;  %v954_v35 = vsel %vm6466_vm8, %v946_v20, %v953_v2  ;;  %v1256_v36 = vsel %vm6379_vm2, %v955_v27, %v1255_v21  ;;  %v892_v37 = vpack.c.bf16 %v751_v28, %v751_v28  ;;  %v707_v38 = vmul.f32 %v6413_v6, %v665_v31  ;;  %2723 = vmatmul.bf16.vlgmr.msrb.gmra.mxu3 %v6521_v32  ;;  %v802_v27 = vld [vmem:[#allocation2 + $0x3c] sm:$0x1]  ;;  %v1342_v28 = vld [vmem:[#allocation2 + $0xb4] sm:$0xf] }
 0x112   : > { %1254 = vst [vmem:[#allocation2 + $0x1c] sm:$0xf] %v954_v35  ;;  %v1152_v39 = vshrl.u32 %v915_v30, 16  ;;  %v1155_v41 = vshll.u32 %v915_v30, 16  ;;  %v607_v43 = vpop.f32.mrf.mxu0  ;;  %v2152_v13 = vrot.slane %v2150_v49, 1  ;;  %v836_v31 = vsel %vm6379_vm2, 0, %v835_v26 }
 0x113   : > { %1257 = vst [vmem:[#allocation2 + $0x20] sm:$0x1] %v1256_v36  ;;  %v957_v45 = vshrl.u32 %v892_v37, 16  ;;  %v743_v47 = vadd.f32 %v6416_v8, %v707_v38  ;;  %v684_v48 = vmul.f32 %v6413_v6, %v607_v43  ;;  %v960_v51 = vshll.u32 %v892_v37, 16  ;;  %v1262_v43 = vld [vmem:[#allocation2 + $0x2c] sm:$0x1] }
 0x114   : > { %v1154_v50 = vrot.slane %v1152_v39, 7  ;;  %v2153_v15 = vsel %vm1564_vm9, %v2148_v12, %v2152_v13  ;;  %837 = vst [vmem:[#allocation2 + $0xc0] sm:$0x1] %v836_v31  ;;  %v885_v39 = vld [vmem:[#allocation2 + $0xc8] sm:$0x1] }
 0x115   : > { %v6537_v56 = vrot.slane %v957_v45, 7  ;;  %v775_v57 = vmax.f32 %v743_v47, 0.0  ;;  %v720_v58 = vadd.f32 %v6416_v8, %v684_v48  ;;  %2752 = vmatmul.bf16.vlgmr.msra.gmra.mxu2 %v2153_v15  ;;  %v803_v45 = vsel %vm6379_vm2, 0, %v802_v27 }
 0x116   : > { %v1157_v60 = vor.u32 %v1155_v41, %v1154_v50  ;;  %v1159_v19 = vrot.slane %v1154_v50, 4  ;;  %804 = vst [vmem:[#allocation2 + $0x3c] sm:$0x1] %v803_v45  ;;  %v886_v55 = vsel %vm6386_vm4, 0, %v885_v39 }
 0x117   : > { %v962_v62 = vor.u32 %v960_v51, %v6537_v56  ;;  %v916_v3 = vpack.c.bf16 %v775_v57, %v775_v57  ;;  %v752_v4 = vmax.f32 %v720_v58, 0.0  ;;  %v963_v41 = vrot.slane %v6537_v56, 4  ;;  %v6573_v51 = vld [vmem:[#allocation2 + $0xc] sm:$0xe]  ;;  %887 = vst [vmem:[#allocation2 + $0xc8] sm:$0x1] %v886_v55 }
 0x118   : > { %v1158_v7 = vsel %vm6466_vm8, %v1150_v29, %v1157_v60  ;;  %v1340_v9 = vsel %vm6379_vm2, %v1159_v19, %v1339_v44  ;;  %v667_v14 = vpop.f32.mrf.mxu3  ;;  %v852_v60 = vld [vmem:[#allocation2 + $0x44] sm:$0x1] }
 0x119   : > { %1338 = vst [vmem:[#allocation2 + $0xac] sm:$0xf] %v1158_v7  ;;  %v1259_v63 = vsel %vm6446_vm6, %v962_v62, %v1258_v61  ;;  %v1161_v16 = vshrl.u32 %v916_v3, 16  ;;  %v1164_v17 = vshll.u32 %v916_v3, 16  ;;  %v893_v18 = vpack.c.bf16 %v752_v4, %v752_v4  ;;  %v6559_v30 = vld [vmem:[#allocation2 + $0x18] sm:$0xff]  }
 0x11a   : > { %1341 = vst [vmem:[#allocation2 + $0xb0] sm:$0x1] %v1340_v9  ;;  %v708_v20 = vmul.f32 %v6413_v6, %v667_v14  ;;  %v610_v21 = vpop.f32.mrf.mxu0  ;;  %v1967_v22 = vld [vmem:[#allocation2 + $0x20] sm:$0x1]  ;;  %2668 = vmatmul.bf16.gmra.mxu1 %v6559_v30  ;;  %v2157_v53 = vshll.u32 %v6559_v30, 16  ;;  %v853_v15 = vsel %vm6386_vm4, 0, %v852_v60 }
 0x11b   : > { %1260 = vst [vmem:[#allocation2 + $0x24] sm:$0xf] %v1259_v63  ;;  %v6555_v24 = vrot.slane %v1161_v16, 7  ;;  %v965_v25 = vshrl.u32 %v893_v18, 16  ;;  %v685_v2 = vmul.f32 %v6413_v6, %v610_v21  ;;  %v2111_v34 = vunpack.c.l.b16 %v1967_v22  ;;  %v1346_v3 = vld [vmem:[#allocation2 + $0xbc] sm:$0x1] }
 0x11c   : > { %v744_v29 = vadd.f32 %v6416_v8, %v708_v20  ;;  %v968_v37 = vshll.u32 %v893_v18, 16  ;;  %v1265_v63 = vld [vmem:[#allocation2 + $0x30] sm:$0xf]  ;;  %v2159_v16 = vrot.slane %v2157_v53, 1  ;;  %v805_v20 = vld [vmem:[#allocation2 + $0x48] sm:$0x1] }
 0x11d   : > { %v1166_v35 = vor.u32 %v1164_v17, %v6555_v24  ;;  %v967_v36 = vrot.slane %v965_v25, 7  ;;  %v721_v38 = vadd.f32 %v6416_v8, %v685_v2  ;;  %649 = vmatmul.bf16.gmra.mxu0 %v517_v5  ;;  %v6567_v44 = vpack.c.b16 %v2111_v34, %v2111_v34  ;;  %854 = vst [vmem:[#allocation2 + $0x44] sm:$0x1] %v853_v15 }
 0x11e   : > { %v776_v11 = vmax.f32 %v744_v29, 0.0  ;;  %v1167_v12 = vrot.slane %v6555_v24, 4  ;;  %v2155_v25 = vshrl.u32 %v6559_v30, 16  ;;  %v5782_v2 = vor.u32 %v6573_v51, %v6501_v0  ;;  %v5341_v51 = vld [vmem:[#allocation8 + $0x68] sm:$0xff] }
 0x11f   : > { %v1343_v47 = vsel %vm6446_vm6, %v1166_v35, %v1342_v28  ;;  %v970_v48 = vor.u32 %v968_v37, %v967_v36  ;;  %v972_v49 = vrot.slane %v967_v36, 4  ;;  %v753_v50 = vmax.f32 %v721_v38, 0.0  ;;  %3157 = vmatpush.bf16.msrb.mxu1 %v5341_v51 }
 0x120   : > { %1344 = vst [vmem:[#allocation2 + $0xb4] sm:$0xf] %v1343_v47  ;;  %v917_v52 = vpack.c.bf16 %v776_v11, %v776_v11  ;;  %v670_v54 = vpop.f32.mrf.mxu3  ;;  %v2162_v62 = vshll.u32 %v6567_v44, 16  ;;  %v6586_v9 = vld [vmem:[#allocation2 + $0xa8] sm:$0xff]   ;;  %v6603_v35 = vor.u32 %v2159_v16, %v2155_v25  ;;  %v806_v37 = vsel %vm6379_vm2, 0, %v805_v20 }
 0x121   : > { %v971_v56 = vsel %vm6466_vm8, %v963_v41, %v970_v48  ;;  %v1263_v57 = vsel %vm6379_vm2, %v972_v49, %v1262_v43  ;;  %v894_v58 = vpack.c.bf16 %v753_v50, %v753_v50  ;;  %v709_v59 = vmul.f32 %v6413_v6, %v670_v54  ;;  %2728 = vmatmul.bf16.gmra.mxu3 %v6586_v9  ;;  %v5410_v49 = vld [vmem:[#allocation2] sm:$0xff]   ;;  %v6629_v16 = vld [vmem:[#allocation2 + $0xc] sm:$0xf0] }
 0x122   : > { %1261 = vst [vmem:[#allocation2 + $0x28] sm:$0xf] %v971_v56  ;;  %v1169_v19 = vshrl.u32 %v917_v52, 16  ;;  %v1172_v61 = vshll.u32 %v917_v52, 16  ;;  %v612_v1 = vpop.f32.mrf.mxu0  ;;  %v2164_v24 = vrot.slane %v2162_v62, 1  ;;  %v6617_v55 = vrot.slane %v5782_v2, 1 }
 0x123   : > { %1264 = vst [vmem:[#allocation2 + $0x2c] sm:$0x1] %v1263_v57  ;;  %v974_v4 = vshrl.u32 %v894_v58, 16  ;;  %v686_v5 = vmul.f32 %v6413_v6, %v612_v1  ;;  %v745_v7 = vadd.f32 %v6416_v8, %v709_v59  ;;  %v977_v14 = vshll.u32 %v894_v58, 16  ;;  %v1349_v56 = vld [vmem:[#allocation2 + $0xc0] sm:$0xf] }
 0x124   : > { %v1171_v13 = vrot.slane %v1169_v19, 7  ;;  %v2165_v45 = vsel %vm1564_vm9, %v6603_v35, %v2164_v24  ;;  %807 = vst [vmem:[#allocation2 + $0x48] sm:$0x1] %v806_v37  ;;  %v1269_v62 = vld [vmem:[#allocation2 + $0x38] sm:$0x1] }
 0x125   : > { %v6589_v17 = vrot.slane %v974_v4, 7  ;;  %v722_v18 = vadd.f32 %v6416_v8, %v686_v5  ;;  %v777_v26 = vmax.f32 %v745_v7, 0.0  ;;  %2757 = vmatmul.bf16.gmra.mxu2 %v2165_v45  ;;  %v855_v2 = vld [vmem:[#allocation2 + $0x50] sm:$0x1] }
 0x126   : > { %v1174_v21 = vor.u32 %v1172_v61, %v1171_v13  ;;  %v1176_v22 = vrot.slane %v1171_v13, 4 }
 0x127   : > { %v979_v27 = vor.u32 %v977_v14, %v6589_v17  ;;  %v754_v28 = vmax.f32 %v722_v18, 0.0  ;;  %v918_v29 = vpack.c.bf16 %v777_v26, %v777_v26  ;;  %v980_v1 = vrot.slane %v6589_v17, 4 }
 0x128   : > { %v1175_v31 = vsel %vm6466_vm8, %v1167_v12, %v1174_v21  ;;  %v1347_v34 = vsel %vm6379_vm2, %v1176_v22, %v1346_v3  ;;  %v672_v36 = vpop.f32.mrf.mxu3  ;;  %v2399_v18 = vrot.slane %v6515_v23, 1 }
 0x129   : > { %1345 = vst [vmem:[#allocation2 + $0xb8] sm:$0xf] %v1175_v31  ;;  %v1266_v0 = vsel %vm6446_vm6, %v979_v27, %v1265_v63  ;;  %v895_v38 = vpack.c.bf16 %v754_v28, %v754_v28  ;;  %v1178_v39 = vshrl.u32 %v918_v29, 16  ;;  %v1181_v41 = vshll.u32 %v918_v29, 16  ;;  %v1938_v43 = vld [vmem:[#allocation2 + $0x24] sm:$0xff]   ;;  %v6627_v63 = vld [vmem:[#allocation2 + $0xc] sm:$0xff]  }
 0x12a   : > { %v6609_v11 = vld [vmem:[#allocation2 + $0x24] sm:$0xf0]  ;;  %1348 = vst [vmem:[#allocation2 + $0xbc] sm:$0x1] %v1347_v34  ;;  %v615_v47 = vpop.f32.mrf.mxu0  ;;  %v710_v48 = vmul.f32 %v6413_v6, %v672_v36  ;;  %v1968_v50 = vld [vmem:[#allocation2 + $0x2c] sm:$0x1]  ;;  %2673 = vmatmul.bf16.gmra.mxu1 %v1938_v43 }
 0x12b   : > { %1267 = vst [vmem:[#allocation2 + $0x30] sm:$0xf] %v1266_v0  ;;  %v982_v52 = vshrl.u32 %v895_v38, 16  ;;  %v6614_v53 = vrot.slane %v1178_v39, 7  ;;  %v687_v54 = vmul.f32 %v6413_v6, %v615_v47  ;;  %v2112_v58 = vunpack.c.l.b16 %v1968_v50  ;;  %v1353_v0 = vld [vmem:[#allocation2 + $0xc8] sm:$0x1] }
 0x12c   : > { %v746_v57 = vadd.f32 %v6416_v8, %v710_v48  ;;  %v985_v60 = vshll.u32 %v895_v38, 16  ;;  %v2169_v5 = vshll.u32 %v1938_v43, 16  ;;  %v2167_v20 = vshrl.u32 %v1938_v43, 16  ;;  %v808_v47 = vld [vmem:[#allocation2 + $0x54] sm:$0x1] }
 0x12d   : > { %v984_v59 = vrot.slane %v982_v52, 7  ;;  %v1183_v19 = vor.u32 %v1181_v41, %v6614_v53  ;;  %v723_v61 = vadd.f32 %v6416_v8, %v687_v54  ;;  %3074 = vmatmul.bf16.vlgmr.msrb.gmra.mxu0 %v5410_v49  ;;  %v6623_v4 = vpack.c.b16 %v2112_v58, %v2112_v58  ;;  %v1272_v48 = vld [vmem:[#allocation2 + $0x3c] sm:$0xf] }
 0x12e   : > { %v778_v3 = vmax.f32 %v746_v57, 0.0  ;;  %v2171_v21 = vrot.slane %v2169_v5, 1  ;;  %v1184_v31 = vrot.slane %v6614_v53, 4  ;;  %v856_v39 = vsel %vm6386_vm4, 0, %v855_v2 }
 0x12f   : > { %v987_v7 = vor.u32 %v985_v60, %v984_v59  ;;  %v989_v12 = vrot.slane %v984_v59, 4  ;;  %v1350_v13 = vsel %vm6446_vm6, %v1183_v19, %v1349_v56  ;;  %v755_v14 = vmax.f32 %v723_v61, 0.0  ;;  %857 = vst [vmem:[#allocation2 + $0x50] sm:$0x1] %v856_v39  ;;  %v5784_v60 = vld [vmem:[#allocation2 + $0x24] sm:$0xe] }
 0x130   : > { %1351 = vst [vmem:[#allocation2 + $0xc0] sm:$0xf] %v1350_v13  ;;  %v919_v17 = vpack.c.bf16 %v778_v3, %v778_v3  ;;  %v6632_v26 = vld [vmem:[#allocation2 + $0xb4] sm:$0xff]   ;;  %v2174_v29 = vshll.u32 %v6623_v4, 16  ;;  %v2172_v38 = vor.u32 %v2171_v21, %v2167_v20  ;;  %v809_v52 = vsel %vm6379_vm2, 0, %v808_v47 }
 0x131   : > { %v6634_v15 = vld [vmem:[#allocation2 + $0xb4] sm:$0xf0]  ;;  %v988_v22 = vsel %vm6466_vm8, %v980_v1, %v987_v7  ;;  %v1270_v25 = vsel %vm6379_vm2, %v989_v12, %v1269_v62  ;;  %v896_v24 = vpack.c.bf16 %v755_v14, %v755_v14  ;;  %2733 = vmatmul.bf16.gmra.mxu3 %v6632_v26  ;;  %810 = vst [vmem:[#allocation2 + $0x54] sm:$0x1] %v809_v52  ;;  %v858_v12 = vld [vmem:[#allocation2 + $0x5c] sm:$0x1] }
 0x132   : > { %8157 = vst [vmem:[#allocation21_spill] sm:$0xff] %v6634_v15  ;;  %v1186_v27 = vshrl.u32 %v919_v17, 16  ;;  %v1189_v28 = vshll.u32 %v919_v17, 16  ;;  %v617_v23 = vpop.f32.mrf.mxu0  ;;  %v2176_v51 = vrot.slane %v2174_v29, 1  ;;  %v6656_v59 = vsel %vm1821_vm10, %v6617_v55, %v2399_v18  ;;  %v1276_v21 = vld [vmem:[#allocation2 + $0x44] sm:$0x1] }
 0x133   : > { %1268 = vst [vmem:[#allocation2 + $0x34] sm:$0xf] %v988_v22  ;;  %v991_v34 = vshrl.u32 %v896_v24, 16  ;;  %v688_v36 = vmul.f32 %v6413_v6, %v617_v23  ;;  %v994_v43 = vshll.u32 %v896_v24, 16  ;;  %v859_v55 = vsel %vm6386_vm4, 0, %v858_v12 }
 0x134   : > { %1271 = vst [vmem:[#allocation2 + $0x38] sm:$0x1] %v1270_v25  ;;  %v1188_v37 = vrot.slane %v1186_v27, 7  ;;  %v2177_v58 = vsel %vm1564_vm9, %v2172_v38, %v2176_v51  ;;  %v5785_v20 = vor.u32 %v5784_v60, %v6609_v11  ;;  %v2405_v25 = vrot.slane %v6623_v4, 1 }
 0x135   : > { %v993_v41 = vrot.slane %v991_v34, 7  ;;  %v724_v45 = vadd.f32 %v6416_v8, %v688_v36  ;;  %2762 = vmatmul.bf16.gmra.mxu2 %v2177_v58  ;;  %860 = vst [vmem:[#allocation2 + $0x5c] sm:$0x1] %v859_v55  ;;  %v1978_v36 = vld [vmem:[#allocation2 + $0xa4] sm:$0x1]  ;;  %v2289_v60 = vshll.u32 %v6521_v32, 16 }
 0x136   : > { %v1191_v49 = vor.u32 %v1189_v28, %v1188_v37  ;;  %v1193_v50 = vrot.slane %v1188_v37, 4  ;;  %v2404_v29 = vrot.slane %v5785_v20, 1  ;;  %v2122_v47 = vunpack.c.l.b16 %v1978_v36 }
 0x137   : > { %v996_v53 = vor.u32 %v994_v43, %v993_v41  ;;  %v756_v54 = vmax.f32 %v724_v45, 0.0  ;;  %v997_v24 = vrot.slane %v993_v41, 4  ;;  %v5340_v43 = vld [vmem:[#allocation8 + $0x60] sm:$0xff] }
 0x138   : > { %v1192_v56 = vsel %vm6466_vm8, %v1184_v31, %v1191_v49  ;;  %v1354_v57 = vsel %vm6379_vm2, %v1193_v50, %v1353_v0  ;;  %v6679_v4 = vsel %vm1821_vm10, %v2404_v29, %v2405_v25  ;;  %3158 = vmatpush.bf16.msrb.mxu1 %v5340_v43  ;;  %v2291_v25 = vrot.slane %v2289_v60, 1  ;;  %v1283_v29 = vld [vmem:[#allocation2 + $0x50] sm:$0x1] }
 0x139   : > { %v1273_v19 = vsel %vm6446_vm6, %v996_v53, %v1272_v48  ;;  %1352 = vst [vmem:[#allocation2 + $0xc4] sm:$0xf] %v1192_v56  ;;  %v897_v61 = vpack.c.bf16 %v756_v54, %v756_v54  ;;  %v811_v48 = vld [vmem:[#allocation2 + $0x60] sm:$0x1]  ;;  %v1279_v53 = vld [vmem:[#allocation2 + $0x48] sm:$0xf] }
 0x13a   : > { %1274 = vst [vmem:[#allocation2 + $0x3c] sm:$0xf] %v1273_v19  ;;  %v620_v1 = vpop.f32.mrf.mxu0  ;;  %v6665_v17 = vld [vmem:[#allocation2 + $0x30] sm:$0xff]   ;;  %v812_v52 = vsel %vm6379_vm2, 0, %v811_v48 }
 0x13b   : > { %v1969_v62 = vld [vmem:[#allocation2 + $0x38] sm:$0x1]  ;;  %1355 = vst [vmem:[#allocation2 + $0xc8] sm:$0x1] %v1354_v57  ;;  %v999_v3 = vshrl.u32 %v897_v61, 16  ;;  %v689_v5 = vmul.f32 %v6413_v6, %v620_v1  ;;  %v1002_v14 = vshll.u32 %v897_v61, 16  ;;  %2678 = vmatmul.bf16.gmra.mxu1 %v6665_v17 }
 0x13c   : > { %v2113_v7 = vunpack.c.l.b16 %v1969_v62  ;;  %v2181_v23 = vshll.u32 %v6665_v17, 16  ;;  %v2179_v54 = vshrl.u32 %v6665_v17, 16  ;;  %813 = vst [vmem:[#allocation2 + $0x60] sm:$0x1] %v812_v52 }
 0x13d   : > { %v1001_v13 = vrot.slane %v999_v3, 7  ;;  %v725_v18 = vadd.f32 %v6416_v8, %v689_v5  ;;  %3079 = vmatmul.bf16.gmra.mxu0 %v6627_v63  ;;  %v6694_v5 = vpack.c.b16 %v2122_v47, %v2122_v47 }
 0x13e   : > { %v6669_v22 = vpack.c.b16 %v2113_v7, %v2113_v7  ;;  %v2183_v45 = vrot.slane %v2181_v23, 1 }
 0x13f   : > { %v1004_v2 = vor.u32 %v1002_v14, %v1001_v13  ;;  %v1006_v27 = vrot.slane %v1001_v13, 4  ;;  %v757_v28 = vmax.f32 %v725_v18, 0.0  ;;  %v861_v13 = vld [vmem:[#allocation2 + $0x68] sm:$0x1]  ;;  %v2294_v23 = vshll.u32 %v6694_v5, 16 }
 0x140   : > { %v2186_v0 = vshll.u32 %v6669_v22, 16  ;;  %v6682_v41 = vld [vmem:[#allocation2 + $0xc0] sm:$0xff]   ;;  %v6690_v19 = vor.u32 %v2183_v45, %v2179_v54  ;;  %v1979_v45 = vld [vmem:[#allocation2 + $0xb0] sm:$0x1] }
 0x141   : > { %v1005_v31 = vsel %vm6466_vm8, %v997_v24, %v1004_v2  ;;  %v1277_v11 = vsel %vm6379_vm2, %v1006_v27, %v1276_v21  ;;  %v898_v34 = vpack.c.bf16 %v757_v28, %v757_v28  ;;  %2738 = vmatmul.bf16.gmra.mxu3 %v6682_v41  ;;  %v2287_v21 = vshrl.u32 %v6521_v32, 16 }
 0x142   : > { %1275 = vst [vmem:[#allocation2 + $0x40] sm:$0xf] %v1005_v31  ;;  %v622_v37 = vpop.f32.mrf.mxu0  ;;  %v2188_v56 = vrot.slane %v2186_v0, 1  ;;  %v862_v24 = vsel %vm6386_vm4, 0, %v861_v13  ;;  %v2296_v43 = vrot.slane %v2294_v23, 1 }
 0x143   : > { %1278 = vst [vmem:[#allocation2 + $0x44] sm:$0x1] %v1277_v11  ;;  %v1008_v38 = vshrl.u32 %v898_v34, 16  ;;  %v690_v39 = vmul.f32 %v6413_v6, %v622_v37  ;;  %v1011_v50 = vshll.u32 %v898_v34, 16  ;;  %v5787_v37 = vld [vmem:[#allocation2 + $0x3c] sm:$0xe]  ;;  %v2292_v0 = vor.u32 %v2291_v25, %v2287_v21 }
 0x144   : > { %v2189_v7 = vsel %vm1564_vm9, %v6690_v19, %v2188_v56  ;;  %863 = vst [vmem:[#allocation2 + $0x68] sm:$0x1] %v862_v24  ;;  %v6715_v56 = vld [vmem:[#allocation2 + $0x24] sm:$0xff]   ;;  %v1286_v13 = vld [vmem:[#allocation2 + $0x54] sm:$0xf]  ;;  %v2301_v24 = vshll.u32 %v6586_v9, 16 }
 0x145   : > { %v1010_v49 = vrot.slane %v1008_v38, 7  ;;  %v726_v51 = vadd.f32 %v6416_v8, %v690_v39  ;;  %2767 = vmatmul.bf16.gmra.mxu2 %v2189_v7  ;;  %v6721_v7 = vld [vmem:[#allocation11] ss:$0 sm:$0xff] }
 0x147   : > { %v1013_v57 = vor.u32 %v1011_v50, %v1010_v49  ;;  %v758_v58 = vmax.f32 %v726_v51, 0.0  ;;  %v1014_v11 = vrot.slane %v1010_v49, 4  ;;  %v6712_v51 = vld [vmem:[%s8105_s4] ss:$0 sm:$0xff] }
 0x149   : > { %v1280_v61 = vsel %vm6446_vm6, %v1013_v57, %v1279_v53  ;;  %v899_v1 = vpack.c.bf16 %v758_v58, %v758_v58  ;;  %v1942_v62 = vld [vmem:[#allocation2 + $0x3c] sm:$0xff]   ;;  %v814_v53 = vld [vmem:[#allocation2 + $0x6c] sm:$0x1]  ;;  %v6717_v57 = vld [vmem:[#allocation2 + $0x24] sm:$0xf0]  ;;  %v2123_v58 = vunpack.c.l.b16 %v1979_v45 }
 0x14a   : > { %v5786_v3 = vld [vmem:[#allocation2 + $0x3c] sm:$0xf0]  ;;  %1281 = vst [vmem:[#allocation2 + $0x48] sm:$0xf] %v1280_v61  ;;  %v625_v12 = vpop.f32.mrf.mxu0  ;;  %v1970_v55 = vld [vmem:[#allocation2 + $0x44] sm:$0x1] }
 0x14b   : > { %v1016_v14 = vshrl.u32 %v899_v1, 16  ;;  %v691_v18 = vmul.f32 %v6413_v6, %v625_v12  ;;  %v2114_v20 = vunpack.c.l.b16 %v1970_v55  ;;  %v1019_v27 = vshll.u32 %v899_v1, 16  ;;  %2683 = vmatmul.bf16.gmra.mxu1 %v1942_v62 }
 0x14c   : > { %v2193_v6 = vshll.u32 %v1942_v62, 16  ;;  %v2191_v48 = vshrl.u32 %v1942_v62, 16  ;;  %v815_v60 = vsel %vm6379_vm2, 0, %v814_v53  ;;  %v5788_v61 = vor.u32 %v5787_v37, %v5786_v3 }
 0x14d   : > { %v1018_v2 = vrot.slane %v1016_v14, 7  ;;  %v727_v28 = vadd.f32 %v6416_v8, %v691_v18  ;;  %3084 = vmatmul.bf16.gmra.mxu0 %v6559_v30  ;;  %v2130_v31 = vpack.c.b16 %v2114_v20, %v2114_v20  ;;  %v2297_v55 = vsel %vm1564_vm9, %v2292_v0, %v2296_v43  ;;  %816 = vst [vmem:[#allocation2 + $0x6c] sm:$0x1] %v815_v60 }
 0x14e   : > { %v2195_v38 = vrot.slane %v2193_v6, 1  ;;  %v2410_v18 = vrot.slane %v5788_v61, 1  ;;  %v2299_v37 = vshrl.u32 %v6586_v9, 16  ;;  %v2303_v0 = vrot.slane %v2301_v24, 1  ;;  %v817_v24 = vld [vmem:[#allocation2 + $0x78] sm:$0x1] }
 0x14f   : > { %v1021_v34 = vor.u32 %v1019_v27, %v1018_v2  ;;  %v1023_v32 = vrot.slane %v1018_v2, 4  ;;  %v759_v36 = vmax.f32 %v727_v28, 0.0  ;;  %v2198_v50 = vshll.u32 %v2130_v31, 16 }
 0x150   : > { %v2196_v54 = vor.u32 %v2195_v38, %v2191_v48  ;;  %v2411_v20 = vrot.slane %v2130_v31, 1  ;;  %v6727_v2 = vpack.c.b16 %v2123_v58, %v2123_v58 }
 0x151   : > { %v1022_v39 = vsel %vm6466_vm8, %v1014_v11, %v1021_v34  ;;  %v1284_v8 = vsel %vm6379_vm2, %v1023_v32, %v1283_v29  ;;  %v900_v30 = vpack.c.bf16 %v759_v36, %v759_v36  ;;  %2812 = vmatmul.bf16.vlgmr.msra.gmra.mxu3 %v2297_v55  ;;  %v2200_v14 = vrot.slane %v2198_v50, 1  ;;  %v5339_v32 = vld [vmem:[#allocation8 + $0x58] sm:$0xff] }
 0x152   : > { %1282 = vst [vmem:[#allocation2 + $0x4c] sm:$0xf] %v1022_v39  ;;  %v627_v47 = vpop.f32.mrf.mxu0  ;;  %v6730_v27 = vsel %vm1821_vm10, %v2410_v18, %v2411_v20  ;;  %v864_v36 = vld [vmem:[#allocation2 + $0x74] sm:$0x1]  ;;  %v2306_v38 = vshll.u32 %v6727_v2, 16  ;;  %3159 = vmatpush.bf16.msrb.mxu1 %v5339_v32 }
 0x153   : > { %1285 = vst [vmem:[#allocation2 + $0x50] sm:$0x1] %v1284_v8  ;;  %v1025_v49 = vshrl.u32 %v900_v30, 16  ;;  %v692_v52 = vmul.f32 %v6712_v51, %v627_v47  ;;  %v1028_v62 = vshll.u32 %v900_v30, 16  ;;  %v2201_v3 = vsel %vm1564_vm9, %v2196_v54, %v2200_v14  ;;  %v1290_v47 = vld [vmem:[#allocation2 + $0x5c] sm:$0x1] }
 0x154   : > { %8158 = vst [vmem:[#allocation22_spill] sm:$0xff] %v6727_v2  ;;  %v865_v39 = vsel %vm6386_vm4, 0, %v864_v36  ;;  %v2304_v54 = vor.u32 %v2303_v0, %v2299_v37  ;;  %v2308_v58 = vrot.slane %v2306_v38, 1  ;;  %v5375_v18 = vld [vmem:[#allocation8 + $0x178] sm:$0xff]  ;;  %v2313_v38 = vshll.u32 %v6632_v26, 16 }
 0x155   : > { %v1027_v1 = vrot.slane %v1025_v49, 7  ;;  %v728_v12 = vadd.f32 %v6721_v7, %v692_v52  ;;  %2772 = vmatmul.bf16.gmra.mxu2 %v2201_v3  ;;  %866 = vst [vmem:[#allocation2 + $0x74] sm:$0x1] %v865_v39  ;;  %2833 = vmatpush.bf16.msrb.mxu3 %v5375_v18  ;;  %v1297_v18 = vld [vmem:[#allocation2 + $0x68] sm:$0x1] }
 0x157   : > { %v1030_v21 = vor.u32 %v1028_v62, %v1027_v1  ;;  %v760_v25 = vmax.f32 %v728_v12, 0.0  ;;  %v1031_v48 = vrot.slane %v1027_v1, 4  ;;  %v1980_v12 = vld [vmem:[#allocation2 + $0xbc] sm:$0x1] }
 0x159   : > { %v1287_v28 = vsel %vm6446_vm6, %v1030_v21, %v1286_v13  ;;  %v901_v23 = vpack.c.bf16 %v760_v25, %v760_v25  ;;  %v6741_v45 = vld [vmem:[#allocation2 + $0x48] sm:$0xff]   ;;  %v2309_v21 = vsel %vm1564_vm9, %v2304_v54, %v2308_v58  ;;  %v2124_v25 = vunpack.c.l.b16 %v1980_v12 }
 0x15a   : > { %1288 = vst [vmem:[#allocation2 + $0x54] sm:$0xf] %v1287_v28  ;;  %v630_v29 = vpop.f32.mrf.mxu0  ;;  %v1971_v6 = vld [vmem:[#allocation2 + $0x50] sm:$0x1]  ;;  %v2205_v53 = vshll.u32 %v6741_v45, 16  ;;  %v2311_v54 = vshrl.u32 %v6632_v26, 16 }
 0x15b   : > { %v1033_v11 = vshrl.u32 %v901_v23, 16  ;;  %v693_v31 = vmul.f32 %v6712_v51, %v630_v29  ;;  %v2115_v34 = vunpack.c.l.b16 %v1971_v6  ;;  %v1036_v30 = vshll.u32 %v901_v23, 16  ;;  %2688 = vmatmul.bf16.gmra.mxu1 %v6741_v45  ;;  %v5374_v29 = vld [vmem:[#allocation8 + $0x170] sm:$0xff] }
 0x15c   : > { %v2207_v20 = vrot.slane %v2205_v53, 1  ;;  %v818_v6 = vsel %vm6379_vm2, 0, %v817_v24  ;;  %v6760_v0 = vpack.c.b16 %v2124_v25, %v2124_v25  ;;  %2834 = vmatpush.bf16.msrb.mxu3 %v5374_v29 }
 0x15d   : > { %v1035_v8 = vrot.slane %v1033_v11, 7  ;;  %v729_v43 = vadd.f32 %v6721_v7, %v693_v31  ;;  %3089 = vmatmul.bf16.gmra.mxu0 %v6715_v56  ;;  %v6744_v9 = vpack.c.b16 %v2115_v34, %v2115_v34  ;;  %v1293_v11 = vld [vmem:[#allocation2 + $0x60] sm:$0xf]  ;;  %v2203_v31 = vshrl.u32 %v6741_v45, 16  ;;  %819 = vst [vmem:[#allocation2 + $0x78] sm:$0x1] %v818_v6 }
 0x15e   : > { %8159 = vst [vmem:[#allocation23_spill] sm:$0xff] %v6760_v0 }
 0x15f   : > { %v1038_v50 = vor.u32 %v1036_v30, %v1035_v8  ;;  %v1040_v49 = vrot.slane %v1035_v8, 4  ;;  %v761_v52 = vmax.f32 %v729_v43, 0.0  ;;  %v2210_v13 = vshll.u32 %v6744_v9, 16 }
 0x160   : > { %v6758_v37 = vor.u32 %v2207_v20, %v2203_v31 }
 0x161   : > { %v1039_v60 = vsel %vm6466_vm8, %v1031_v48, %v1038_v50  ;;  %v1291_v61 = vsel %vm6379_vm2, %v1040_v49, %v1290_v47  ;;  %v902_v62 = vpack.c.bf16 %v761_v52, %v761_v52  ;;  %2817 = vmatmul.bf16.gmra.mxu3 %v2309_v21  ;;  %v2212_v34 = vrot.slane %v2210_v13, 1  ;;  %v5373_v49 = vld [vmem:[#allocation8 + $0x168] sm:$0xff] }
 0x162   : > { %1289 = vst [vmem:[#allocation2 + $0x58] sm:$0xf] %v1039_v60  ;;  %v632_v55 = vpop.f32.mrf.mxu0  ;;  %v867_v60 = vld [vmem:[#allocation2 + $0x80] sm:$0x1]  ;;  %2835 = vmatpush.bf16.msrb.mxu3 %v5373_v49 }
 0x163   : > { %1292 = vst [vmem:[#allocation2 + $0x5c] sm:$0x1] %v1291_v61  ;;  %v1042_v1 = vshrl.u32 %v902_v62, 16  ;;  %v694_v14 = vmul.f32 %v6712_v51, %v632_v55  ;;  %v1045_v28 = vshll.u32 %v902_v62, 16  ;;  %v2213_v47 = vsel %vm1564_vm9, %v6758_v37, %v2212_v34  ;;  %v1981_v34 = vld [vmem:[#allocation2 + $0xc8] sm:$0x1] }
 0x164   : > { %v2315_v61 = vrot.slane %v2313_v38, 1  ;;  %v2318_v62 = vshll.u32 %v6760_v0, 16  ;;  %v868_v12 = vsel %vm6386_vm4, 0, %v867_v60  ;;  %v6785_v49 = vld [vmem:[#allocation2 + $0x3c] sm:$0xff]  }
 0x165   : > { %v1044_v3 = vrot.slane %v1042_v1, 7  ;;  %v730_v23 = vadd.f32 %v6721_v7, %v694_v14  ;;  %2777 = vmatmul.bf16.gmra.mxu2 %v2213_v47  ;;  %v5372_v14 = vld [vmem:[#allocation8 + $0x160] sm:$0xff]  ;;  %869 = vst [vmem:[#allocation2 + $0x80] sm:$0x1] %v868_v12  ;;  %v5338_v47 = vld [vmem:[#allocation8 + $0x50] sm:$0xff] }
 0x166   : > { %v2320_v29 = vrot.slane %v2318_v62, 1  ;;  %2836 = vmatpush.bf16.msrb.mxu3 %v5372_v14  ;;  %3160 = vmatpush.bf16.msrb.mxu1 %v5338_v47  ;;  %v1300_v12 = vld [vmem:[#allocation2 + $0x6c] sm:$0xf]  ;;  %v2325_v14 = vshll.u32 %v6682_v41, 16  ;;  %v5368_v47 = vld [vmem:[#allocation8 + $0x140] sm:$0xff] }
 0x167   : > { %v1047_v32 = vor.u32 %v1045_v28, %v1044_v3  ;;  %v762_v36 = vmax.f32 %v730_v23, 0.0  ;;  %v1048_v21 = vrot.slane %v1044_v3, 4  ;;  %v2316_v23 = vor.u32 %v2315_v61, %v2311_v54  ;;  %v820_v54 = vld [vmem:[#allocation2 + $0x84] sm:$0x1]  ;;  %v5370_v61 = vld [vmem:[#allocation8 + $0x150] sm:$0xff] }
 0x168   : > { %v821_v62 = vsel %vm6379_vm2, 0, %v820_v54 }
 0x169   : > { %v1294_v39 = vsel %vm6446_vm6, %v1047_v32, %v1293_v11  ;;  %v903_v8 = vpack.c.bf16 %v762_v36, %v762_v36  ;;  %v1946_v30 = vld [vmem:[#allocation2 + $0x54] sm:$0xff]   ;;  %822 = vst [vmem:[#allocation2 + $0x84] sm:$0x1] %v821_v62 }
 0x16a   : > { %v6765_v43 = vld [vmem:[#allocation2 + $0x54] sm:$0xf0]  ;;  %1295 = vst [vmem:[#allocation2 + $0x60] sm:$0xf] %v1294_v39  ;;  %v635_v48 = vpop.f32.mrf.mxu0  ;;  %v1972_v50 = vld [vmem:[#allocation2 + $0x5c] sm:$0x1] }
 0x16b   : > { %v1050_v52 = vshrl.u32 %v903_v8, 16  ;;  %v695_v53 = vmul.f32 %v6712_v51, %v635_v48  ;;  %v2116_v58 = vunpack.c.l.b16 %v1972_v50  ;;  %v1053_v13 = vshll.u32 %v903_v8, 16  ;;  %2693 = vmatmul.bf16.gmra.mxu1 %v1946_v30  ;;  %v5371_v8 = vld [vmem:[#allocation8 + $0x158] sm:$0xff] }
 0x16c   : > { %v2217_v20 = vshll.u32 %v1946_v30, 16  ;;  %v2215_v36 = vshrl.u32 %v1946_v30, 16  ;;  %v2321_v48 = vsel %vm1564_vm9, %v2316_v23, %v2320_v29  ;;  %2837 = vmatpush.bf16.msrb.mxu3 %v5371_v8 }
 0x16d   : > { %v1052_v55 = vrot.slane %v1050_v52, 7  ;;  %v731_v1 = vadd.f32 %v6721_v7, %v695_v53  ;;  %3094 = vmatmul.bf16.gmra.mxu0 %v6665_v17  ;;  %v6776_v26 = vpack.c.b16 %v2116_v58, %v2116_v58  ;;  %v6787_v52 = vld [vmem:[#allocation2 + $0x3c] sm:$0xf0]  ;;  %v2125_v53 = vunpack.c.l.b16 %v1981_v34 }
 0x16e   : > { %v2219_v6 = vrot.slane %v2217_v20, 1  ;;  %v2327_v34 = vrot.slane %v2325_v14, 1 }
 0x16f   : > { %v1055_v25 = vor.u32 %v1053_v13, %v1052_v55  ;;  %v1057_v24 = vrot.slane %v1052_v55, 4  ;;  %v763_v28 = vmax.f32 %v731_v1, 0.0  ;;  %v2222_v3 = vshll.u32 %v6776_v26, 16 }
 0x170   : > { %v2220_v50 = vor.u32 %v2219_v6, %v2215_v36  ;;  %v6794_v20 = vpack.c.b16 %v2125_v53, %v2125_v53  ;;  %2838 = vmatpush.bf16.msrb.mxu3 %v5370_v61 }
 0x171   : > { %v1056_v11 = vsel %vm6466_vm8, %v1048_v21, %v1055_v25  ;;  %v1298_v17 = vsel %vm6379_vm2, %v1057_v24, %v1297_v18  ;;  %v904_v31 = vpack.c.bf16 %v763_v28, %v763_v28  ;;  %2822 = vmatmul.bf16.gmra.mxu3 %v2321_v48  ;;  %v2224_v55 = vrot.slane %v2222_v3, 1  ;;  %v1304_v48 = vld [vmem:[#allocation2 + $0x74] sm:$0x1] }
 0x172   : > { %1296 = vst [vmem:[#allocation2 + $0x64] sm:$0xf] %v1056_v11  ;;  %v637_v32 = vpop.f32.mrf.mxu0  ;;  %v5369_v11 = vld [vmem:[#allocation8 + $0x148] sm:$0xff] }
 0x173   : > { %1299 = vst [vmem:[#allocation2 + $0x68] sm:$0x1] %v1298_v17  ;;  %v1059_v38 = vshrl.u32 %v904_v31, 16  ;;  %v696_v39 = vmul.f32 %v6712_v51, %v637_v32  ;;  %v1062_v60 = vshll.u32 %v904_v31, 16  ;;  %v2225_v18 = vsel %vm1564_vm9, %v2220_v50, %v2224_v55  ;;  %v870_v17 = vld [vmem:[#allocation2 + $0x8c] sm:$0x1] }
 0x174   : > { %8160 = vst [vmem:[#allocation24_spill] sm:$0xff] %v6794_v20  ;;  %v2323_v31 = vshrl.u32 %v6682_v41, 16  ;;  %v2330_v32 = vshll.u32 %v6794_v20, 16  ;;  %v871_v36 = vsel %vm6386_vm4, 0, %v870_v17  ;;  %2839 = vmatpush.bf16.msrb.mxu3 %v5369_v11  ;;  %v1307_v11 = vld [vmem:[#allocation2 + $0x78] sm:$0xf] }
 0x175   : > { %v1061_v58 = vrot.slane %v1059_v38, 7  ;;  %v732_v30 = vadd.f32 %v6721_v7, %v696_v39  ;;  %2782 = vmatmul.bf16.gmra.mxu2 %v2225_v18  ;;  %872 = vst [vmem:[#allocation2 + $0x8c] sm:$0x1] %v871_v36 }
 0x176   : > { %v2328_v61 = vor.u32 %v2327_v34, %v2323_v31 }
 0x177   : > { %v1064_v13 = vor.u32 %v1062_v60, %v1061_v58  ;;  %v764_v1 = vmax.f32 %v732_v30, 0.0  ;;  %v1065_v50 = vrot.slane %v1061_v58, 4 }
 0x178   : > { %2840 = vmatpush.bf16.msrb.mxu3 %v5368_v47 }
 0x179   : > { %v1301_v21 = vsel %vm6446_vm6, %v1064_v13, %v1300_v12  ;;  %v905_v25 = vpack.c.bf16 %v764_v1, %v764_v1  ;;  %v6805_v8 = vld [vmem:[#allocation2 + $0x60] sm:$0xff]   ;;  %v2332_v13 = vrot.slane %v2330_v32, 1 }
 0x17a   : > { %1302 = vst [vmem:[#allocation2 + $0x6c] sm:$0xf] %v1301_v21  ;;  %v640_v24 = vpop.f32.mrf.mxu0  ;;  %v1973_v28 = vld [vmem:[#allocation2 + $0x68] sm:$0x1]  ;;  %v2229_v30 = vshll.u32 %v6805_v8, 16  ;;  %v2227_v17 = vshrl.u32 %v6805_v8, 16 }
 0x17b   : > { %v1067_v23 = vshrl.u32 %v905_v25, 16  ;;  %v697_v29 = vmul.f32 %v6712_v51, %v640_v24  ;;  %v2117_v6 = vunpack.c.l.b16 %v1973_v28  ;;  %v1070_v38 = vshll.u32 %v905_v25, 16  ;;  %2698 = vmatmul.bf16.gmra.mxu1 %v6805_v8  ;;  %v823_v21 = vld [vmem:[#allocation2 + $0x90] sm:$0x1] }
 0x17c   : > { %v2231_v25 = vrot.slane %v2229_v30, 1  ;;  %v824_v24 = vsel %vm6379_vm2, 0, %v823_v21  ;;  %v1311_v21 = vld [vmem:[#allocation2 + $0x80] sm:$0x1] }
 0x17d   : > { %v1069_v3 = vrot.slane %v1067_v23, 7  ;;  %v733_v39 = vadd.f32 %v6721_v7, %v697_v29  ;;  %3099 = vmatmul.bf16.gmra.mxu0 %v6785_v49  ;;  %v6808_v41 = vpack.c.b16 %v2117_v6, %v2117_v6  ;;  %v2333_v6 = vsel %vm1564_vm9, %v2328_v61, %v2332_v13  ;;  %825 = vst [vmem:[#allocation2 + $0x90] sm:$0x1] %v824_v24 }
 0x17e   : > { %v6822_v36 = vor.u32 %v2231_v25, %v2227_v17 }
 0x17f   : > { %v1072_v53 = vor.u32 %v1070_v38, %v1069_v3  ;;  %v1074_v54 = vrot.slane %v1069_v3, 4  ;;  %v765_v60 = vmax.f32 %v733_v39, 0.0  ;;  %v2234_v14 = vshll.u32 %v6808_v41, 16 }
 0x181   : > { %v1073_v62 = vsel %vm6466_vm8, %v1065_v50, %v1072_v53  ;;  %v1305_v12 = vsel %vm6379_vm2, %v1074_v54, %v1304_v48  ;;  %v906_v55 = vpack.c.bf16 %v765_v60, %v765_v60  ;;  %2827 = vmatmul.bf16.gmra.mxu3 %v2333_v6  ;;  %v2236_v31 = vrot.slane %v2234_v14, 1  ;;  %v5337_v54 = vld [vmem:[#allocation8 + $0x48] sm:$0xff]  ;;  %v5351_v60 = vld [vmem:[#allocation8 + $0xb8] sm:$0xff] }
 0x182   : > { %1303 = vst [vmem:[#allocation2 + $0x70] sm:$0xf] %v1073_v62  ;;  %v642_v1 = vpop.f32.mrf.mxu0  ;;  %3161 = vmatpush.bf16.msrb.mxu1 %v5337_v54  ;;  %3244 = vmatpush.bf16.msrb.mxu2 %v5351_v60  ;;  %v6848_v54 = vld [vmem:[#allocation2 + $0x54] sm:$0xff]  }
 0x183   : > { %1306 = vst [vmem:[#allocation2 + $0x74] sm:$0x1] %v1305_v12  ;;  %v1076_v58 = vshrl.u32 %v906_v55, 16  ;;  %v698_v18 = vmul.f32 %v6712_v51, %v642_v1  ;;  %v1079_v23 = vshll.u32 %v906_v55, 16  ;;  %v2237_v48 = vsel %vm1564_vm9, %v6822_v36, %v2236_v31  ;;  %v873_v55 = vld [vmem:[#allocation2 + $0x98] sm:$0x1] }
 0x184   : > { %v874_v13 = vsel %vm6386_vm4, 0, %v873_v55  ;;  %v6850_v60 = vld [vmem:[#allocation2 + $0x54] sm:$0xf0] }
 0x185   : > { %v1078_v28 = vrot.slane %v1076_v58, 7  ;;  %v734_v29 = vadd.f32 %v6721_v7, %v698_v18  ;;  %2787 = vmatmul.bf16.gmra.mxu2 %v2237_v48  ;;  %875 = vst [vmem:[#allocation2 + $0x98] sm:$0x1] %v874_v13  ;;  %v5790_v18 = vld [vmem:[#allocation2 + $0x54] sm:$0xe] }
 0x186   : > { %v1314_v13 = vld [vmem:[#allocation2 + $0x84] sm:$0xf] }
 0x187   : > { %v1081_v34 = vor.u32 %v1079_v23, %v1078_v28  ;;  %v766_v32 = vmax.f32 %v734_v29, 0.0  ;;  %v6831_v62 = vpop.f32.mrf.mxu1  ;;  %v1082_v23 = vrot.slane %v1078_v28, 4 }
 0x189   : > { %v1308_v3 = vsel %vm6446_vm6, %v1081_v34, %v1307_v11  ;;  %v907_v38 = vpack.c.bf16 %v766_v32, %v766_v32  ;;  %v1950_v39 = vld [vmem:[#allocation2 + $0x6c] sm:$0xff]  }
 0x18a   : > { %v6826_v47 = vld [vmem:[#allocation2 + $0x6c] sm:$0xf0]  ;;  %1309 = vst [vmem:[#allocation2 + $0x78] sm:$0xf] %v1308_v3  ;;  %v645_v50 = vpop.f32.mrf.mxu0  ;;  %v1974_v53 = vld [vmem:[#allocation2 + $0x74] sm:$0x1] }
 0x18b   : > { %v1084_v30 = vshrl.u32 %v907_v38, 16  ;;  %v699_v61 = vmul.f32 %v6712_v51, %v645_v50  ;;  %v2118_v12 = vunpack.c.l.b16 %v1974_v53  ;;  %v1087_v14 = vshll.u32 %v907_v38, 16  ;;  %2703 = vmatmul.bf16.gmra.mxu1 %v1950_v39  ;;  %v6926_v42 = vld [vmem:[#allocation2 + $0x6c] sm:$0xf0] }
 0x18c   : > { %v2241_v24 = vshll.u32 %v1950_v39, 16  ;;  %v2239_v32 = vshrl.u32 %v1950_v39, 16  ;;  %v5791_v38 = vor.u32 %v5790_v18, %v6765_v43  ;;  %8163 = vst [vmem:[#allocation27_spill] sm:$0xff] %v6926_v42 }
 0x18d   : > { %v1086_v1 = vrot.slane %v1084_v30, 7  ;;  %v735_v58 = vadd.f32 %v6721_v7, %v699_v61  ;;  %3104 = vmatmul.bf16.gmra.mxu0 %v6741_v45  ;;  %v6837_v25 = vpack.c.b16 %v2118_v12, %v2118_v12  ;;  %v2417_v61 = vrot.slane %v6776_v26, 1 }
 0x18e   : > { %v2243_v17 = vrot.slane %v2241_v24, 1  ;;  %v2416_v30 = vrot.slane %v5791_v38, 1  ;;  %v5545_v38 = vld [vmem:[#allocation2 + $0x18] sm:$0xe] }
 0x18f   : > { %v1089_v29 = vor.u32 %v1087_v14, %v1086_v1  ;;  %v1091_v6 = vrot.slane %v1086_v1, 4  ;;  %v767_v11 = vmax.f32 %v735_v58, 0.0  ;;  %v2246_v3 = vshll.u32 %v6837_v25, 16  ;;  %v6846_v50 = vpop.f32.mrf.mxu1 }
 0x190   : > { %v2244_v53 = vor.u32 %v2243_v17, %v2239_v32  ;;  %v6856_v1 = vsel %vm1821_vm10, %v2416_v30, %v2417_v61  ;;  %v5544_v17 = vld [vmem:[#allocation2 + $0x18] sm:$0xf0] }
 0x191   : > { %v1090_v46 = vsel %vm6466_vm8, %v1082_v23, %v1089_v29  ;;  %v1312_v31 = vsel %vm6379_vm2, %v1091_v6, %v1311_v21  ;;  %v908_v34 = vpack.c.bf16 %v767_v11, %v767_v11  ;;  %2841 = vmatmul.bf16.vlgmr.msrb.gmra.mxu3 %v6656_v59  ;;  %v2248_v43 = vrot.slane %v2246_v3, 1 }
 0x192   : > { %1310 = vst [vmem:[#allocation2 + $0x7c] sm:$0xf] %v1090_v46  ;;  %v647_v45 = vpop.f32.mrf.mxu0  ;;  %v5546_v30 = vor.u32 %v5545_v38, %v5544_v17 }
 0x193   : > { %1313 = vst [vmem:[#allocation2 + $0x80] sm:$0x1] %v1312_v31  ;;  %v1093_v28 = vshrl.u32 %v908_v34, 16  ;;  %v700_v48 = vmul.f32 %v6712_v51, %v647_v45  ;;  %v1096_v39 = vshll.u32 %v908_v34, 16  ;;  %v2249_v18 = vsel %vm1564_vm9, %v2244_v53, %v2248_v43  ;;  %v5336_v31 = vld [vmem:[#allocation8 + $0x40] sm:$0xff] }
 0x194   : > { %v6861_v26 = vpop.f32.mrf.mxu3  ;;  %3162 = vmatpush.bf16.msrb.mxu1 %v5336_v31 }
 0x195   : > { %v1095_v12 = vrot.slane %v1093_v28, 7  ;;  %v736_v55 = vadd.f32 %v6721_v7, %v700_v48  ;;  %2792 = vmatmul.bf16.gmra.mxu2 %v2249_v18  ;;  %v1318_v48 = vld [vmem:[#allocation2 + $0x8c] sm:$0x1] }
 0x197   : > { %v1098_v14 = vor.u32 %v1096_v39, %v1095_v12  ;;  %v768_v58 = vmax.f32 %v736_v55, 0.0  ;;  %v6864_v11 = vpop.f32.mrf.mxu1  ;;  %v1099_v28 = vrot.slane %v1095_v12, 4 }
 0x198   : > { %v2753_v53 = vpop.f32.mrf.mxu2 }
 0x199   : > { %v1315_v21 = vsel %vm6446_vm6, %v1098_v14, %v1314_v13  ;;  %v909_v24 = vpack.c.bf16 %v768_v58, %v768_v58  ;;  %v6868_v3 = vld [vmem:[#allocation2 + $0x78] sm:$0xff]   ;;  %v6874_v13 = vadd.f32 %v2753_v53, %v6831_v62  ;;  %v5350_v14 = vld [vmem:[#allocation8 + $0xb0] sm:$0xff] }
 0x19a   : > { %1316 = vst [vmem:[#allocation2 + $0x84] sm:$0xf] %v1315_v21  ;;  %v650_v23 = vpop.f32.mrf.mxu0  ;;  %v1975_v29 = vld [vmem:[#allocation2 + $0x80] sm:$0x1]  ;;  %v2253_v58 = vshll.u32 %v6868_v3, 16  ;;  %3245 = vmatpush.bf16.msrb.mxu2 %v5350_v14  ;;  %v5348_v14 = vld [vmem:[#allocation8 + $0xa0] sm:$0xff] }
 0x19b   : > { %v1101_v6 = vshrl.u32 %v909_v24, 16  ;;  %v701_v59 = vmul.f32 %v6712_v51, %v650_v23  ;;  %v2119_v46 = vunpack.c.l.b16 %v1975_v29  ;;  %v1104_v45 = vshll.u32 %v909_v24, 16  ;;  %2708 = vmatmul.bf16.gmra.mxu1 %v6868_v3  ;;  %v5349_v29 = vld [vmem:[#allocation8 + $0xa8] sm:$0xff] }
 0x19c   : > { %v6881_v24 = vpop.f32.mrf.mxu3  ;;  %v2402_v23 = vrot.slane %v6567_v44, 1 }
 0x19d   : > { %v1103_v34 = vrot.slane %v1101_v6, 7  ;;  %v737_v32 = vadd.f32 %v6721_v7, %v701_v59  ;;  %3109 = vmatmul.bf16.gmra.mxu0 %v6848_v54  ;;  %v6871_v61 = vpack.c.b16 %v2119_v46, %v2119_v46 }
 0x19e   : > { %3246 = vmatpush.bf16.msrb.mxu2 %v5349_v29 }
 0x19f   : > { %v1106_v39 = vor.u32 %v1104_v45, %v1103_v34  ;;  %v1108_v55 = vrot.slane %v1103_v34, 4  ;;  %v769_v43 = vmax.f32 %v737_v32, 0.0  ;;  %v2258_v6 = vshll.u32 %v6871_v61, 16  ;;  %v6886_v31 = vpop.f32.mrf.mxu1 }
 0x1a0   : > { %v2401_v34 = vrot.slane %v5546_v30, 1  ;;  %v2255_v45 = vrot.slane %v2253_v58, 1  ;;  %v2755_v53 = vpop.f32.mrf.mxu2 }
 0x1a1   : > { %v1107_v18 = vsel %vm6466_vm8, %v1099_v28, %v1106_v39  ;;  %v1319_v12 = vsel %vm6379_vm2, %v1108_v55, %v1318_v48  ;;  %v910_v21 = vpack.c.bf16 %v769_v43, %v769_v43  ;;  %v1321_v28 = vld [vmem:[#allocation2 + $0x90] sm:$0xf]  ;;  %v2251_v48 = vshrl.u32 %v6868_v3, 16 }
 0x1a2   : > { %1317 = vst [vmem:[#allocation2 + $0x88] sm:$0xf] %v1107_v18  ;;  %v652_v62 = vpop.f32.mrf.mxu0  ;;  %v2403_v44 = vsel %vm1821_vm10, %v2401_v34, %v2402_v23  ;;  %v2260_v39 = vrot.slane %v2258_v6, 1  ;;  %v6892_v43 = vadd.f32 %v2755_v53, %v6846_v50  ;;  %3247 = vmatpush.bf16.msrb.mxu2 %v5348_v14  ;;  %v5346_v14 = vld [vmem:[#allocation8 + $0x90] sm:$0xff] }
 0x1a3   : > { %1320 = vst [vmem:[#allocation2 + $0x8c] sm:$0x1] %v1319_v12  ;;  %v1110_v59 = vshrl.u32 %v910_v21, 16  ;;  %v1113_v17 = vshll.u32 %v910_v21, 16  ;;  %v702_v46 = vmul.f32 %v6712_v51, %v652_v62  ;;  %2846 = vmatmul.bf16.gmra.mxu3 %v2403_v44  ;;  %v6894_v30 = vor.u32 %v2255_v45, %v2251_v48  ;;  %v1325_v45 = vld [vmem:[#allocation2 + $0x98] sm:$0x1] }
 0x1a4   : > { %v6898_v18 = vpop.f32.mrf.mxu3  ;;  %v5793_v48 = vld [vmem:[#allocation2 + $0x6c] sm:$0xe] }
 0x1a5   : > { %v1112_v32 = vrot.slane %v1110_v59, 7  ;;  %v738_v38 = vadd.f32 %v6721_v7, %v702_v46  ;;  %8161 = vst [vmem:[#allocation25_spill] sm:$0xff] %v6894_v30  ;;  %v2261_v23 = vsel %vm1564_vm9, %v6894_v30, %v2260_v39  ;;  %v5347_v59 = vld [vmem:[#allocation8 + $0x98] sm:$0xff]  ;;  %v5794_v10 = vor.u32 %v5793_v48, %v6826_v47  ;;  %v1388_v48 = vld [vmem:[#allocation2 + $0x8] sm:$0x1] }
 0x1a6   : > { %2797 = vmatmul.bf16.gmra.mxu2 %v2261_v23  ;;  %v5399_v23 = vld [vmem:[#allocation8 + $0x238] sm:$0xff] }
 0x1a7   : > { %v1115_v55 = vor.u32 %v1113_v17, %v1112_v32  ;;  %v770_v51 = vmax.f32 %v738_v38, 0.0  ;;  %v6906_v6 = vpop.f32.mrf.mxu1  ;;  %v5383_v17 = vld [vmem:[#allocation8 + $0x1b8] sm:$0xff]  ;;  %3248 = vmatpush.bf16.msrb.mxu2 %v5347_v59  ;;  %v1116_v53 = vrot.slane %v1112_v32, 4  ;;  %v5345_v32 = vld [vmem:[#allocation8 + $0x88] sm:$0xff]  ;;  %4233 = vmatpush.bf16.msra.mxu1 %v5399_v23  ;;  %v1532_v23 = vunpack.c.l.b16 %v1388_v48 }
 0x1a8   : > { %v2758_v38 = vpop.f32.mrf.mxu2  ;;  %4055 = vmatpush.bf16.msra.mxu3 %v5383_v17 }
 0x1a9   : > { %v1322_v7 = vsel %vm6446_vm6, %v1115_v55, %v1321_v28  ;;  %v911_v58 = vpack.c.bf16 %v770_v51, %v770_v51  ;;  %v1954_v12 = vld [vmem:[#allocation2 + $0x84] sm:$0xff]   ;;  %v6912_v51 = vadd.f32 %v2758_v38, %v6864_v11  ;;  %v2422_v38 = vrot.slane %v5794_v10, 1 }
 0x1aa   : > { %v6900_v21 = vld [vmem:[#allocation2 + $0x84] sm:$0xf0]  ;;  %1323 = vst [vmem:[#allocation2 + $0x90] sm:$0xf] %v1322_v7  ;;  %v6904_v50 = vpop.f32.mrf.mxu0  ;;  %v1976_v29 = vld [vmem:[#allocation2 + $0x8c] sm:$0x1] }
 0x1ab   : > { %v1118_v62 = vshrl.u32 %v911_v58, 16  ;;  %v2120_v40 = vunpack.c.l.b16 %v1976_v29  ;;  %v1121_v34 = vshll.u32 %v911_v58, 16  ;;  %2713 = vmatmul.bf16.gmra.mxu1 %v1954_v12  ;;  %v2265_v28 = vshll.u32 %v1954_v12, 16  ;;  %v5391_v7 = vld [vmem:[#allocation8 + $0x1f8] sm:$0xff]  ;;  %3249 = vmatpush.bf16.msrb.mxu2 %v5346_v14 }
 0x1ac   : > { %4144 = vmatpush.bf16.msra.mxu0 %v5391_v7  ;;  %v2263_v11 = vshrl.u32 %v1954_v12, 16 }
 0x1ad   : > { %v1120_v46 = vrot.slane %v1118_v62, 7  ;;  %3114 = vmatmul.bf16.gmra.mxu0 %v6805_v8  ;;  %v6909_v44 = vpack.c.b16 %v2120_v40, %v2120_v40  ;;  %v2267_v58 = vrot.slane %v2265_v28, 1  ;;  %v6918_v62 = vpop.f32.mrf.mxu3 }
 0x1af   : > { %v1123_v39 = vor.u32 %v1121_v34, %v1120_v46  ;;  %v1125_v55 = vrot.slane %v1120_v46, 4  ;;  %v2270_v59 = vshll.u32 %v6909_v44, 16  ;;  %v2676_v17 = vpop.f32.mrf.mxu1  ;;  %v2268_v46 = vor.u32 %v2267_v58, %v2263_v11  ;;  %v6924_v34 = vld [vmem:[#allocation2 + $0x6c] sm:$0xff]   ;;  %3250 = vmatpush.bf16.msrb.mxu2 %v5345_v32 }
 0x1b0   : > { %v2760_v28 = vpop.f32.mrf.mxu2  ;;  %v5548_v32 = vld [vmem:[#allocation2 + $0x30] sm:$0xe] }
 0x1b1   : > { %v1124_v8 = vsel %vm6466_vm8, %v1116_v53, %v1123_v39  ;;  %v1326_v29 = vsel %vm6379_vm2, %v1125_v55, %v1325_v45  ;;  %v2423_v45 = vrot.slane %v6837_v25, 1  ;;  %v2272_v12 = vrot.slane %v2270_v59, 1  ;;  %v5344_v39 = vld [vmem:[#allocation8 + $0x80] sm:$0xff]  ;;  %v5745_v59 = vld [vmem:[#allocation2] sm:$0xff]  }
 0x1b2   : > { %1324 = vst [vmem:[#allocation2 + $0x94] sm:$0xf] %v1124_v8  ;;  %v6920_v40 = vpop.f32.mrf.mxu0  ;;  %v6931_v53 = vadd.f32 %v2760_v28, %v6886_v31  ;;  %v5547_v8 = vld [vmem:[#allocation2 + $0x30] sm:$0xf0]  ;;  %v1568_v10 = vshll.u32 %v5745_v59, 16 }
 0x1b3   : > { %8162 = vst [vmem:[#allocation26_spill] sm:$0xff] %v6920_v40  ;;  %2851 = vmatmul.bf16.gmra.mxu3 %v6679_v4  ;;  %v6934_v55 = vsel %vm1821_vm10, %v2422_v38, %v2423_v45  ;;  %v2273_v47 = vsel %vm1564_vm9, %v2268_v46, %v2272_v12  ;;  %3251 = vmatpush.bf16.msrb.mxu2 %v5344_v39  ;;  %v2408_v39 = vrot.slane %v6669_v22, 1 }
 0x1b4   : > { %1327 = vst [vmem:[#allocation2 + $0x98] sm:$0x1] %v1326_v29  ;;  %v5549_v45 = vor.u32 %v5548_v32, %v5547_v8  ;;  %v6950_v38 = vpack.c.b16 %v1532_v23, %v1532_v23 }
 0x1b5   : > { %v6937_v14 = vpop.f32.mrf.mxu3 }
 0x1b6   : > { %2802 = vmatmul.bf16.gmra.mxu2 %v2273_v47  ;;  %v2407_v0 = vrot.slane %v5549_v45, 1 }
 0x1b8   : > { %v2679_v58 = vpop.f32.mrf.mxu1  ;;  %v2763_v29 = vpop.f32.mrf.mxu2  ;;  %v2409_v23 = vsel %vm1821_vm10, %v2407_v0, %v2408_v39  ;;  %v5382_v39 = vld [vmem:[#allocation8 + $0x1b0] sm:$0xff] }
 0x1b9   : > { %v6942_v31 = vld [vmem:[#allocation2 + $0x90] sm:$0xff]   ;;  %v6948_v46 = vadd.f32 %v2763_v29, %v6906_v6  ;;  %v1573_v6 = vshll.u32 %v6950_v38, 16  ;;  %4056 = vmatpush.bf16.msra.mxu3 %v5382_v39 }
 0x1ba   : > { %v6939_v25 = vpop.f32.mrf.mxu0  ;;  %v2277_v28 = vshll.u32 %v6942_v31, 16  ;;  %v2275_v8 = vshrl.u32 %v6942_v31, 16 }
 0x1bb   : > { %8164 = vst [vmem:[#allocation28_spill] sm:$0xff] %v6939_v25  ;;  %v1977_v7 = vld [vmem:[#allocation2 + $0x98] sm:$0x1]  ;;  %2718 = vmatmul.bf16.gmra.mxu1 %v6942_v31  ;;  %v1575_v42 = vrot.slane %v1573_v6, 1  ;;  %v1390_v25 = vld [vmem:[#allocation2 + $0x20] sm:$0x1] }
 0x1bc   : > { %v2121_v4 = vunpack.c.l.b16 %v1977_v7  ;;  %v1566_v7 = vshrl.u32 %v5745_v59, 16  ;;  %v2279_v29 = vrot.slane %v2277_v28, 1 }
 0x1bd   : > { %3119 = vmatmul.bf16.gmra.mxu0 %v6924_v34  ;;  %v6953_v12 = vpop.f32.mrf.mxu3 }
 0x1be   : > { %v6945_v11 = vpack.c.b16 %v2121_v4, %v2121_v4  ;;  %v1570_v4 = vrot.slane %v1568_v10, 1 }
 0x1c0   : > { %v2282_v48 = vshll.u32 %v6945_v11, 16  ;;  %v2681_v20 = vpop.f32.mrf.mxu1  ;;  %v2765_v32 = vpop.f32.mrf.mxu2  ;;  %v1571_v30 = vor.u32 %v1570_v4, %v1566_v7 }
 0x1c1   : > { %v6962_v22 = vadd.f32 %v2765_v32, %v2676_v17  ;;  %v5512_v17 = vld [vmem:[#allocation2] sm:$0xf0]  ;;  %v1580_v32 = vshll.u32 %v6627_v63, 16 }
 0x1c2   : > { %v6956_v47 = vpop.f32.mrf.mxu0  ;;  %v2284_v15 = vrot.slane %v2282_v48, 1  ;;  %v1576_v28 = vsel %vm1564_vm9, %v1571_v30, %v1575_v42  ;;  %v5513_v48 = vld [vmem:[#allocation2] sm:$0xe]  ;;  %v3377_v30 = vld [vmem:[#allocation2 + $0xa4] sm:$0x1] }
 0x1c3   : > { %8165 = vst [vmem:[#allocation29_spill] sm:$0xff] %v6956_v47  ;;  %2856 = vmatmul.bf16.gmra.mxu3 %v2409_v23  ;;  %v6964_v47 = vor.u32 %v2279_v29, %v2275_v8  ;;  %v1389_v23 = vld [vmem:[#allocation2 + $0x14] sm:$0x1]  ;;  %v5390_v29 = vld [vmem:[#allocation8 + $0x1f0] sm:$0xff]  ;;  %v5514_v8 = vor.u32 %v5513_v48, %v5512_v17  ;;  %v3521_v17 = vunpack.c.l.b16 %v3377_v30  ;;  %v1582_v48 = vrot.slane %v1580_v32, 1 }
 0x1c4   : > { %v1533_v6 = vunpack.c.l.b16 %v1389_v23  ;;  %4145 = vmatpush.bf16.msra.mxu0 %v5390_v29  ;;  %v6986_v23 = vld [vmem:[#allocation2 + $0x84] sm:$0xf0]  ;;  %v1578_v29 = vshrl.u32 %v6627_v63, 16 }
 0x1c5   : > { %8166 = vst [vmem:[#allocation30_spill] sm:$0xff] %v6964_v47  ;;  %v6966_v59 = vpop.f32.mrf.mxu3  ;;  %v2285_v10 = vsel %vm1564_vm9, %v6964_v47, %v2284_v15  ;;  %v5398_v15 = vld [vmem:[#allocation8 + $0x230] sm:$0xff]  ;;  %v1822_v39 = vrot.slane %v5514_v8, 1  ;;  %v6996_v8 = vpack.c.b16 %v3521_v17, %v3521_v17 }
 0x1c6   : > { %2807 = vmatmul.bf16.gmra.mxu2 %v2285_v10  ;;  %4234 = vmatpush.bf16.msra.mxu1 %v5398_v15  ;;  %v6981_v47 = vpack.c.b16 %v1533_v6, %v1533_v6  ;;  %8169 = vst [vmem:[#allocation33_spill] sm:$0xff] %v6986_v23  ;;  %v6990_v15 = vld [vmem:[#allocation2 + $0x9c] sm:$0xff]   ;;  %v1583_v23 = vor.u32 %v1582_v48, %v1578_v29  ;;  %v1534_v48 = vunpack.c.l.b16 %v1390_v25  ;;  %v5551_v29 = vld [vmem:[#allocation2 + $0x48] sm:$0xe] }
 0x1c7   : > { %8170 = vst [vmem:[#allocation34_spill] sm:$0xff] %v6990_v15  ;;  %v8117_v32 = vunpack.c.h.b16 %v6990_v15 }
 0x1c8   : > { %v2684_v0 = vpop.f32.mrf.mxu1  ;;  %v2768_v7 = vpop.f32.mrf.mxu2  ;;  %v1585_v6 = vshll.u32 %v6981_v47, 16  ;;  %8171 = vst [vmem:[#allocation35_spill] sm:$0xff] %v6996_v8 }
 0x1c9   : > { %v6974_v4 = vadd.f32 %v2768_v7, %v2679_v58  ;;  %v1823_v58 = vrot.slane %v6950_v38, 1 }
 0x1ca   : > { %v6970_v45 = vpop.f32.mrf.mxu0 }
 0x1cb   : > { %8167 = vst [vmem:[#allocation31_spill] sm:$0xff] %v6970_v45  ;;  %3163 = vmatmul.bf16.vlgmr.msrb.gmra.mxu1 %v1576_v28  ;;  %v6984_v28 = vld [vmem:[#allocation2 + $0x84] sm:$0xff]   ;;  %v1824_v38 = vsel %vm1821_vm10, %v1822_v39, %v1823_v58  ;;  %v5550_v39 = vld [vmem:[#allocation2 + $0x48] sm:$0xf0]  ;;  %v3832_v58 = vrot.slane %v6996_v8, 1  ;;  %v7015_v8 = vpack.c.b16 %v1534_v48, %v1534_v48  ;;  %v1826_v48 = vrot.slane %v6981_v47, 1 }
 0x1cd   : > { %3124 = vmatmul.bf16.gmra.mxu0 %v6868_v3  ;;  %v6977_v10 = vpop.f32.mrf.mxu3 }
 0x1d0   : > { %v2686_v3 = vpop.f32.mrf.mxu1  ;;  %v2770_v7 = vpop.f32.mrf.mxu2 }
 0x1d1   : > { %v6992_v45 = vadd.f32 %v2770_v7, %v2681_v20  ;;  %v1587_v7 = vrot.slane %v1585_v6, 1 }
 0x1d2   : > { %v6979_v42 = vpop.f32.mrf.mxu0 }
 0x1d3   : > { %8168 = vst [vmem:[#allocation32_spill] sm:$0xff] %v6979_v42  ;;  %2861 = vmatmul.bf16.gmra.mxu3 %v6730_v27  ;;  %v3393_v42 = vld [vmem:[#allocation2 + $0x9c] sm:$0xe]  ;;  %v1588_v17 = vsel %vm1564_vm9, %v1583_v23, %v1587_v7 }
 0x1d4   : > { %v3777_v30 = vunpack.c.l.b16 %v3393_v42  ;;  %v5796_v42 = vld [vmem:[#allocation2 + $0xc] sm:$0xe] }
 0x1d5   : > { %v2813_v2 = vpop.f32.mrf.mxu3 }
 0x1d6   : > { %v7000_v27 = vadd.f32 %v2813_v2, %v6861_v26  ;;  %3252 = vmatmul.bf16.vlgmr.msrb.gmra.mxu2 %v1824_v38  ;;  %v3793_v40 = vpack.c.b16 %v8117_v32, %v3777_v30  ;;  %v5552_v38 = vor.u32 %v5551_v29, %v5550_v39  ;;  %v2414_v32 = vrot.slane %v6744_v9, 1 }
 0x1d8   : > { %8172 = vst [vmem:[#allocation36_spill] sm:$0xff] %v7000_v27  ;;  %v2689_v20 = vpop.f32.mrf.mxu1  ;;  %v3831_v2 = vrot.slane %v3793_v40, 1  ;;  %v2773_v26 = vpop.f32.mrf.mxu2  ;;  %v5797_v40 = vor.u32 %v5796_v42, %v6629_v16  ;;  %v2413_v7 = vrot.slane %v5552_v38, 1 }
 0x1d9   : > { %v7009_v27 = vadd.f32 %v2773_v26, %v2684_v0  ;;  %v7023_v0 = vld [vmem:[#allocation2 + $0xb4] sm:$0xff]  }
 0x1da   : > { %v7002_v63 = vpop.f32.mrf.mxu0  ;;  %v7012_v6 = vsel %vm1821_vm10, %v3831_v2, %v3832_v58  ;;  %8175 = vst [vmem:[#allocation39_spill] sm:$0xff] %v7023_v0  ;;  %v2415_v39 = vsel %vm1821_vm10, %v2413_v7, %v2414_v32  ;;  %v1597_v58 = vshll.u32 %v7015_v8, 16  ;;  %v1825_v9 = vrot.slane %v5797_v40, 1  ;;  %v3379_v2 = vld [vmem:[#allocation2 + $0xbc] sm:$0x1] }
 0x1db   : > { %3168 = vmatmul.bf16.gmra.mxu1 %v1588_v17  ;;  %8173 = vst [vmem:[#allocation37_spill] sm:$0xff] %v7012_v6  ;;  %v8120_v29 = vunpack.c.h.b16 %v7023_v0  ;;  %v3523_v16 = vunpack.c.l.b16 %v3379_v2 }
 0x1dc   : > { %v1827_v7 = vsel %vm1821_vm10, %v1825_v9, %v1826_v48 }
 0x1dd   : > { %3129 = vmatmul.bf16.gmra.mxu0 %v6984_v28  ;;  %v2815_v30 = vpop.f32.mrf.mxu3  ;;  %v7031_v6 = vpack.c.b16 %v3523_v16, %v3523_v16 }
 0x1de   : > { %v7018_v15 = vadd.f32 %v2815_v30, %v6881_v24  ;;  %v3395_v24 = vld [vmem:[#allocation2 + $0xb4] sm:$0xe]  ;;  %v1599_v30 = vrot.slane %v1597_v58, 1 }
 0x1df   : > { %v3779_v42 = vunpack.c.l.b16 %v3395_v24  ;;  %8176 = vst [vmem:[#allocation40_spill] sm:$0xff] %v7031_v6  ;;  %v3838_v24 = vrot.slane %v7031_v6, 1 }
 0x1e0   : > { %8174 = vst [vmem:[#allocation38_spill] sm:$0xff] %v7018_v15  ;;  %v2691_v25 = vpop.f32.mrf.mxu1  ;;  %v2775_v17 = vpop.f32.mrf.mxu2  ;;  %v1600_v58 = vsel %vm1564_vm9, %v6603_v35, %v1599_v30  ;;  %v5516_v30 = vld [vmem:[#allocation2 + $0x18] sm:$0xe]  ;;  %v5556_v15 = vld [vmem:[#allocation2 + $0x78] sm:$0xf0] }
 0x1e1   : > { %v7028_v26 = vadd.f32 %v2775_v17, %v2686_v3  ;;  %v3795_v32 = vpack.c.b16 %v8120_v29, %v3779_v42  ;;  %v1391_v17 = vld [vmem:[#allocation2 + $0x2c] sm:$0x1]  ;;  %v5389_v42 = vld [vmem:[#allocation8 + $0x1e8] sm:$0xff]  ;;  %v5515_v29 = vld [vmem:[#allocation2 + $0x18] sm:$0xf0] }
 0x1e2   : > { %v7020_v23 = vpop.f32.mrf.mxu0  ;;  %v1535_v48 = vunpack.c.l.b16 %v1391_v17  ;;  %4146 = vmatpush.bf16.msra.mxu0 %v5389_v42  ;;  %v1829_v42 = vrot.slane %v7015_v8, 1  ;;  %v5799_v8 = vld [vmem:[#allocation2 + $0x24] sm:$0xe] }
 0x1e3   : > { %2866 = vmatmul.bf16.gmra.mxu3 %v2415_v39  ;;  %v5381_v39 = vld [vmem:[#allocation8 + $0x1a8] sm:$0xff]  ;;  %v3837_v2 = vrot.slane %v3795_v32, 1  ;;  %v1604_v32 = vshll.u32 %v6715_v56, 16 }
 0x1e4   : > { %4057 = vmatpush.bf16.msra.mxu3 %v5381_v39  ;;  %v1551_v39 = vpack.c.b16 %v1535_v48, %v1535_v48 }
 0x1e5   : > { %v2818_v38 = vpop.f32.mrf.mxu3 }
 0x1e6   : > { %v7037_v40 = vadd.f32 %v2818_v38, %v6898_v18  ;;  %3257 = vmatmul.bf16.gmra.mxu2 %v1827_v7  ;;  %v7046_v18 = vsel %vm1821_vm10, %v3837_v2, %v3838_v24  ;;  %v5397_v38 = vld [vmem:[#allocation8 + $0x228] sm:$0xff]  ;;  %v1606_v24 = vrot.slane %v1604_v32, 1 }
 0x1e7   : > { %8178 = vst [vmem:[#allocation42_spill] sm:$0xff] %v7046_v18  ;;  %4235 = vmatpush.bf16.msra.mxu1 %v5397_v38  ;;  %v7054_v2 = vld [vmem:[#allocation2 + $0x9c] sm:$0xff]   ;;  %v1602_v38 = vshrl.u32 %v6715_v56, 16 }
 0x1e8   : > { %8177 = vst [vmem:[#allocation41_spill] sm:$0xff] %v7037_v40  ;;  %v2694_v3 = vpop.f32.mrf.mxu1  ;;  %v2778_v16 = vpop.f32.mrf.mxu2 }
 0x1e9   : > { %v7048_v9 = vadd.f32 %v2778_v16, %v2689_v20  ;;  %v7056_v20 = vld [vmem:[#allocation2 + $0x9c] sm:$0xf0] }
 0x1ea   : > { %v7039_v47 = vpop.f32.mrf.mxu0 }
 0x1eb   : > { %3173 = vmatmul.bf16.gmra.mxu1 %v1600_v58  ;;  %v5517_v58 = vor.u32 %v5516_v30, %v5515_v29  ;;  %v1607_v29 = vor.u32 %v1606_v24, %v1602_v38 }
 0x1ed   : > { %3134 = vmatmul.bf16.gmra.mxu0 %v6942_v31  ;;  %v2820_v7 = vpop.f32.mrf.mxu3  ;;  %v1828_v18 = vrot.slane %v5517_v58, 1  ;;  %v5554_v58 = vld [vmem:[#allocation2 + $0x60] sm:$0xe] }
 0x1ee   : > { %v7052_v31 = vadd.f32 %v2820_v7, %v6918_v62  ;;  %v1609_v7 = vshll.u32 %v1551_v39, 16 }
 0x1ef   : > { %v1830_v30 = vsel %vm1821_vm10, %v1828_v18, %v1829_v42  ;;  %v5388_v42 = vld [vmem:[#allocation8 + $0x1e0] sm:$0xff] }
 0x1f0   : > { %8179 = vst [vmem:[#allocation43_spill] sm:$0xff] %v7052_v31  ;;  %v2696_v35 = vpop.f32.mrf.mxu1  ;;  %v2780_v16 = vpop.f32.mrf.mxu2  ;;  %v1392_v31 = vld [vmem:[#allocation2 + $0x38] sm:$0x1]  ;;  %v1611_v0 = vrot.slane %v1609_v7, 1  ;;  %4147 = vmatpush.bf16.msra.mxu0 %v5388_v42  ;;  %v5386_v42 = vld [vmem:[#allocation8 + $0x1d0] sm:$0xff] }
 0x1f1   : > { %v7063_v62 = vadd.f32 %v2780_v16, %v2691_v25  ;;  %v1536_v25 = vunpack.c.l.b16 %v1392_v31  ;;  %v5800_v31 = vor.u32 %v5799_v8, %v6717_v57 }
 0x1f2   : > { %v7058_v17 = vpop.f32.mrf.mxu0  ;;  %v1612_v56 = vsel %vm1564_vm9, %v1607_v29, %v1611_v0 }
 0x1f3   : > { %2871 = vmatmul.bf16.gmra.mxu3 %v6856_v1  ;;  %v5553_v1 = vld [vmem:[#allocation2 + $0x60] sm:$0xf0]  ;;  %v7076_v7 = vpack.c.b16 %v1536_v25, %v1536_v25 }
 0x1f5   : > { %v2823_v48 = vpop.f32.mrf.mxu3 }
 0x1f6   : > { %v7067_v6 = vadd.f32 %v2823_v48, %v6937_v14  ;;  %3262 = vmatmul.bf16.gmra.mxu2 %v1830_v30  ;;  %v5555_v14 = vor.u32 %v5554_v58, %v5553_v1  ;;  %v2420_v48 = vrot.slane %v6808_v41, 1  ;;  %v5387_v30 = vld [vmem:[#allocation8 + $0x1d8] sm:$0xff]  ;;  %v1831_v58 = vrot.slane %v5800_v31, 1 }
 0x1f7   : > { %4148 = vmatpush.bf16.msra.mxu0 %v5387_v30  ;;  %v1832_v41 = vrot.slane %v1551_v39, 1  ;;  %v5385_v30 = vld [vmem:[#allocation8 + $0x1c8] sm:$0xff] }
 0x1f8   : > { %8180 = vst [vmem:[#allocation44_spill] sm:$0xff] %v7067_v6  ;;  %v2699_v32 = vpop.f32.mrf.mxu1  ;;  %v2783_v16 = vpop.f32.mrf.mxu2  ;;  %v1393_v39 = vld [vmem:[#allocation2 + $0x44] sm:$0x1] }
 0x1f9   : > { %v7071_v24 = vadd.f32 %v2783_v16, %v2694_v3  ;;  %v1621_v16 = vshll.u32 %v7076_v7, 16  ;;  %v1833_v57 = vsel %vm1821_vm10, %v1831_v58, %v1832_v41  ;;  %v1628_v58 = vshll.u32 %v6785_v49, 16 }
 0x1fa   : > { %v7073_v18 = vpop.f32.mrf.mxu0 }
 0x1fb   : > { %3178 = vmatmul.bf16.gmra.mxu1 %v1612_v56  ;;  %v2419_v56 = vrot.slane %v5555_v14, 1  ;;  %4149 = vmatpush.bf16.msra.mxu0 %v5386_v42  ;;  %v5518_v42 = vld [vmem:[#allocation2 + $0x30] sm:$0xf0] }
 0x1fd   : > { %3139 = vmatmul.bf16.gmra.mxu0 %v7054_v2  ;;  %v2825_v38 = vpop.f32.mrf.mxu3  ;;  %v2421_v3 = vsel %vm1821_vm10, %v2419_v56, %v2420_v48  ;;  %v5380_v48 = vld [vmem:[#allocation8 + $0x1a0] sm:$0xff]  ;;  %v7092_v56 = vld [vmem:[#allocation2 + $0xa8] sm:$0xff]  }
 0x1fe   : > { %v7079_v0 = vadd.f32 %v2825_v38, %v6953_v12  ;;  %v1623_v38 = vrot.slane %v1621_v16, 1  ;;  %4058 = vmatpush.bf16.msra.mxu3 %v5380_v48  ;;  %v5384_v16 = vld [vmem:[#allocation8 + $0x1c0] sm:$0xff] }
 0x1ff   : > { %4150 = vmatpush.bf16.msra.mxu0 %v5385_v30 }
 0x200   : > { %8181 = vst [vmem:[#allocation45_spill] sm:$0xff] %v7079_v0  ;;  %v2701_v29 = vpop.f32.mrf.mxu1  ;;  %v2785_v1 = vpop.f32.mrf.mxu2 }
 0x201   : > { %v7084_v25 = vadd.f32 %v2785_v1, %v2696_v35  ;;  %v1624_v35 = vsel %vm1564_vm9, %v6690_v19, %v1623_v38  ;;  %v5396_v1 = vld [vmem:[#allocation8 + $0x220] sm:$0xff]  ;;  %v5519_v38 = vld [vmem:[#allocation2 + $0x30] sm:$0xe] }
 0x202   : > { %v7086_v6 = vpop.f32.mrf.mxu0  ;;  %4236 = vmatpush.bf16.msra.mxu1 %v5396_v1  ;;  %v5520_v30 = vor.u32 %v5519_v38, %v5518_v42  ;;  %v1835_v1 = vrot.slane %v7076_v7, 1 }
 0x203   : > { %2876 = vmatmul.bf16.gmra.mxu3 %v2421_v3  ;;  %4151 = vmatpush.bf16.msra.mxu0 %v5384_v16 }
 0x205   : > { %v2828_v12 = vpop.f32.mrf.mxu3 }
 0x206   : > { %v7090_v8 = vadd.f32 %v2828_v12, %v6966_v59  ;;  %3267 = vmatmul.bf16.gmra.mxu2 %v1833_v57  ;;  %v1537_v59 = vunpack.c.l.b16 %v1393_v39  ;;  %v7107_v39 = vld [vmem:[#allocation2 + $0xb4] sm:$0xf0] }
 0x207   : > { %8186 = vst [vmem:[#allocation50_spill] sm:$0xff] %v7107_v39 }
 0x208   : > { %8182 = vst [vmem:[#allocation46_spill] sm:$0xff] %v7090_v8  ;;  %v2704_v14 = vpop.f32.mrf.mxu1  ;;  %v2788_v31 = vpop.f32.mrf.mxu2  ;;  %v1553_v48 = vpack.c.b16 %v1537_v59, %v1537_v59  ;;  %v3366_v59 = vld [vmem:[#allocation2 + $0x20] sm:$0x1] }
 0x209   : > { %v7097_v3 = vadd.f32 %v2788_v31, %v2699_v32  ;;  %v7105_v32 = vld [vmem:[#allocation2 + $0xb4] sm:$0xff]   ;;  %v3510_v7 = vunpack.c.l.b16 %v3366_v59 }
 0x20a   : > { %v7103_v57 = vpop.f32.mrf.mxu0  ;;  %8185 = vst [vmem:[#allocation49_spill] sm:$0xff] %v7105_v32  ;;  %v1633_v16 = vshll.u32 %v1553_v48, 16 }
 0x20b   : > { %3183 = vmatmul.bf16.gmra.mxu1 %v1624_v35  ;;  %8184 = vst [vmem:[#allocation48_spill] sm:$0xff] %v7103_v57  ;;  %v1630_v35 = vrot.slane %v1628_v58, 1  ;;  %v1394_v58 = vld [vmem:[#allocation2 + $0x50] sm:$0x1] }
 0x20d   : > { %3144 = vmatmul.bf16.gmra.mxu0 %v7092_v56  ;;  %v2830_v41 = vpop.f32.mrf.mxu3 }
 0x20e   : > { %v7101_v12 = vadd.f32 %v2830_v41, %v6977_v10  ;;  %v1626_v10 = vshrl.u32 %v6785_v49, 16 }
 0x210   : > { %8183 = vst [vmem:[#allocation47_spill] sm:$0xff] %v7101_v12  ;;  %v2706_v19 = vpop.f32.mrf.mxu1  ;;  %v2790_v31 = vpop.f32.mrf.mxu2  ;;  %v1834_v12 = vrot.slane %v5520_v30, 1  ;;  %v1631_v0 = vor.u32 %v1630_v35, %v1626_v10  ;;  %v1538_v30 = vunpack.c.l.b16 %v1394_v58 }
 0x211   : > { %v7112_v41 = vadd.f32 %v2790_v31, %v2701_v29  ;;  %v5802_v29 = vld [vmem:[#allocation2 + $0x3c] sm:$0xe] }
 0x212   : > { %v1836_v42 = vsel %vm1821_vm10, %v1834_v12, %v1835_v1  ;;  %v7118_v39 = vpop.f32.mrf.mxu0  ;;  %v5557_v12 = vld [vmem:[#allocation2 + $0x78] sm:$0xe]  ;;  %v7126_v1 = vpack.c.b16 %v3510_v7, %v3510_v7  ;;  %v7129_v59 = vpack.c.b16 %v1538_v30, %v1538_v30 }
 0x213   : > { %2881 = vmatmul.bf16.gmra.mxu3 %v6934_v55  ;;  %v1635_v55 = vrot.slane %v1633_v16, 1  ;;  %8187 = vst [vmem:[#allocation51_spill] sm:$0xff] %v7118_v39  ;;  %v2426_v16 = vrot.slane %v6871_v61, 1  ;;  %v7143_v61 = vld [vmem:[#allocation2 + $0x24] sm:$0xf0] }
 0x214   : > { %8188 = vst [vmem:[#allocation52_spill] sm:$0xff] %v7126_v1  ;;  %v5805_v39 = vld [vmem:[#allocation2 + $0x84] sm:$0xe] }
 0x215   : > { %v2842_v8 = vpop.f32.mrf.mxu3  ;;  %v1636_v49 = vsel %vm1564_vm9, %v1631_v0, %v1635_v55  ;;  %v5803_v0 = vor.u32 %v5802_v29, %v6787_v52  ;;  %8190 = vst [vmem:[#allocation54_spill] sm:$0xff] %v7143_v61 }
 0x216   : > { %v7116_v38 = vadd.f32 %v2842_v8, %v6874_v13  ;;  %3272 = vmatmul.bf16.gmra.mxu2 %v1836_v42  ;;  %v5558_v13 = vor.u32 %v5557_v12, %v5556_v15  ;;  %v7124_v8 = vld [vmem:[#allocation2 + $0x18] sm:$0xff]   ;;  %v3550_v15 = vshll.u32 %v7126_v1, 16  ;;  %v1838_v12 = vrot.slane %v1553_v48, 1  ;;  %v3367_v48 = vld [vmem:[#allocation2 + $0x2c] sm:$0x1] }
 0x217   : > { %v3545_v58 = vshll.u32 %v7124_v8, 16 }
 0x218   : > { %v2709_v40 = vpop.f32.mrf.mxu1  ;;  %v2793_v35 = vpop.f32.mrf.mxu2  ;;  %v3552_v1 = vrot.slane %v3550_v15, 1 }
 0x219   : > { %v7122_v31 = vadd.f32 %v2793_v35, %v2704_v14  ;;  %v2425_v14 = vrot.slane %v5558_v13, 1  ;;  %v7141_v35 = vld [vmem:[#allocation2 + $0x24] sm:$0xff]   ;;  %v3547_v52 = vrot.slane %v3545_v58, 1  ;;  %v3543_v13 = vshrl.u32 %v7124_v8, 16  ;;  %v5379_v58 = vld [vmem:[#allocation8 + $0x198] sm:$0xff] }
 0x21a   : > { %8189 = vst [vmem:[#allocation53_spill] sm:$0xff] %v7141_v35  ;;  %v7145_v29 = vpop.f32.mrf.mxu0  ;;  %4059 = vmatpush.bf16.msra.mxu3 %v5379_v58  ;;  %v5522_v58 = vld [vmem:[#allocation2 + $0x48] sm:$0xe] }
 0x21b   : > { %3188 = vmatmul.bf16.gmra.mxu1 %v1636_v49  ;;  %v2427_v7 = vsel %vm1821_vm10, %v2425_v14, %v2426_v16  ;;  %v1645_v49 = vshll.u32 %v7129_v59, 16  ;;  %8191 = vst [vmem:[#allocation55_spill] sm:$0xff] %v7145_v29  ;;  %v3548_v61 = vor.u32 %v3547_v52, %v3543_v13  ;;  %v3557_v52 = vshll.u32 %v7141_v35, 16 }
 0x21c   : > { %v1652_v13 = vshll.u32 %v6848_v54, 16 }
 0x21d   : > { %3149 = vmatmul.bf16.gmra.mxu0 %v7105_v32  ;;  %v2844_v10 = vpop.f32.mrf.mxu3  ;;  %v1647_v14 = vrot.slane %v1645_v49, 1  ;;  %v5806_v49 = vor.u32 %v5805_v39, %v6900_v21 }
 0x21e   : > { %v7132_v42 = vadd.f32 %v2844_v10, %v6892_v43  ;;  %v1837_v43 = vrot.slane %v5803_v0, 1 }
 0x21f   : > { %v1648_v15 = vsel %vm1564_vm9, %v6758_v37, %v1647_v14  ;;  %v2429_v37 = vrot.slane %v6909_v44, 1  ;;  %v5521_v14 = vld [vmem:[#allocation2 + $0x48] sm:$0xf0] }
 0x220   : > { %v7136_v55 = vpop.f32.mrf.mxu1  ;;  %v2795_v30 = vpop.f32.mrf.mxu2  ;;  %v1839_v32 = vsel %vm1821_vm10, %v1837_v43, %v1838_v12  ;;  %v5395_v12 = vld [vmem:[#allocation8 + $0x218] sm:$0xff] }
 0x221   : > { %v7147_v10 = vadd.f32 %v2795_v30, %v2706_v19  ;;  %v3553_v19 = vsel %vm1564_vm9, %v3548_v61, %v3552_v1  ;;  %4237 = vmatpush.bf16.msra.mxu1 %v5395_v12 }
 0x222   : > { %v7164_v1 = vpop.f32.mrf.mxu0 }
 0x223   : > { %2886 = vmatmul.bf16.gmra.mxu3 %v2427_v7  ;;  %v1395_v7 = vld [vmem:[#allocation2 + $0x5c] sm:$0x1]  ;;  %8193 = vst [vmem:[#allocation57_spill] sm:$0xff] %v7164_v1  ;;  %v1654_v1 = vrot.slane %v1652_v13, 1 }
 0x226   : > { %v2847_v16 = vpop.f32.mrf.mxu3  ;;  %3277 = vmatmul.bf16.gmra.mxu2 %v1839_v32  ;;  %v1539_v32 = vunpack.c.l.b16 %v1395_v7  ;;  %v5523_v7 = vor.u32 %v5522_v58, %v5521_v14 }
 0x227   : > { %v7152_v57 = vadd.f32 %v2847_v16, %v6912_v51  ;;  %v3511_v51 = vunpack.c.l.b16 %v3367_v48  ;;  %v2428_v16 = vrot.slane %v5806_v49, 1  ;;  %v6117_v49 = vld [vmem:[#allocation2 + $0x84] sm:$0xf0] }
 0x228   : > { %v7154_v0 = vpop.f32.mrf.mxu1  ;;  %v1840_v58 = vrot.slane %v5523_v7, 1 }
 0x229   : > { %v2798_v30 = vpop.f32.mrf.mxu2  ;;  %v7170_v39 = vpack.c.b16 %v3511_v51, %v3511_v51  ;;  %v2430_v44 = vsel %vm1821_vm10, %v2428_v16, %v2429_v37  ;;  %v3555_v51 = vshrl.u32 %v7141_v35, 16  ;;  %v1396_v35 = vld [vmem:[#allocation2 + $0x68] sm:$0x1] }
 0x22a   : > { %v7160_v43 = vadd.f32 %v2798_v30, %v2709_v40  ;;  %v3375_v40 = vld [vmem:[#allocation2 + $0x8c] sm:$0x1]  ;;  %v7176_v30 = vld [vmem:[#allocation2 + $0x84] sm:$0xff]  }
 0x22b   : > { %3193 = vmatmul.bf16.gmra.mxu1 %v1648_v15  ;;  %8194 = vst [vmem:[#allocation58_spill] sm:$0xff] %v7170_v39  ;;  %v3559_v15 = vrot.slane %v3557_v52, 1  ;;  %v3519_v12 = vunpack.c.l.b16 %v3375_v40  ;;  %v1650_v52 = vshrl.u32 %v6848_v54, 16  ;;  %v3368_v40 = vld [vmem:[#allocation2 + $0x38] sm:$0x1] }
 0x22c   : > { %8192 = vst [vmem:[#allocation56_spill] sm:$0xff] %v7160_v43  ;;  %v6118_v43 = vld [vmem:[#allocation2 + $0x84] sm:$0xe] }
 0x22d   : > { %4152 = vmatmul.bf16.vlgmr.msra.gmra.mxu0 %v3553_v19  ;;  %v7174_v19 = vpack.c.b16 %v1539_v32, %v1539_v32  ;;  %8195 = vst [vmem:[#allocation59_spill] sm:$0xff] %v7176_v30  ;;  %v3560_v16 = vor.u32 %v3559_v15, %v3555_v51  ;;  %v1655_v37 = vor.u32 %v1654_v1, %v1650_v52  ;;  %v5559_v1 = vld [vmem:[#allocation2 + $0x90] sm:$0xf0]  ;;  %v3512_v51 = vunpack.c.l.b16 %v3368_v40 }
 0x22e   : > { %v2849_v61 = vpop.f32.mrf.mxu3  ;;  %v6119_v7 = vor.u32 %v6118_v43, %v6117_v49  ;;  %v1540_v52 = vunpack.c.l.b16 %v1396_v35  ;;  %v7203_v43 = vld [vmem:[#allocation2 + $0x30] sm:$0xff]   ;;  %v2432_v35 = vrot.slane %v6945_v11, 1 }
 0x22f   : > { %v7168_v21 = vadd.f32 %v2849_v61, %v6931_v53  ;;  %v1841_v53 = vrot.slane %v7129_v59, 1  ;;  %v3562_v61 = vshll.u32 %v7170_v39, 16  ;;  %v1657_v14 = vshll.u32 %v7174_v19, 16 }
 0x230   : > { %v7172_v48 = vpop.f32.mrf.mxu1  ;;  %v7208_v49 = vpack.c.b16 %v3512_v51, %v3512_v51 }
 0x231   : > { %v2800_v29 = vpop.f32.mrf.mxu2  ;;  %v1842_v59 = vsel %vm1821_vm10, %v1840_v58, %v1841_v53  ;;  %v3564_v39 = vrot.slane %v3562_v61, 1  ;;  %v5808_v53 = vld [vmem:[#allocation2 + $0x54] sm:$0xe] }
 0x232   : > { %v7183_v32 = vadd.f32 %v2800_v29, %v7136_v55  ;;  %v7193_v55 = vpop.f32.mrf.mxu0  ;;  %v1659_v29 = vrot.slane %v1657_v14, 1  ;;  %8197 = vst [vmem:[#allocation61_spill] sm:$0xff] %v7208_v49 }
 0x233   : > { %2891 = vmatmul.bf16.gmra.mxu3 %v2430_v44  ;;  %v7187_v44 = vpack.c.b16 %v3519_v12, %v3519_v12  ;;  %v3565_v15 = vsel %vm1564_vm9, %v3560_v16, %v3564_v39 }
 0x234   : > { %v1660_v12 = vsel %vm1564_vm9, %v1655_v37, %v1659_v29  ;;  %v7211_v37 = vpack.c.b16 %v1540_v52, %v1540_v52  ;;  %v5809_v29 = vor.u32 %v5808_v53, %v6850_v60  ;;  %v7225_v52 = vld [vmem:[#allocation2 + $0x3c] sm:$0xff]   ;;  %v1844_v53 = vrot.slane %v7174_v19, 1 }
 0x235   : > { %v3826_v61 = vrot.slane %v7187_v44, 1  ;;  %v3076_v19 = vadd.f32 %v6904_v50, %v7116_v38 }
 0x236   : > { %v2852_v13 = vpop.f32.mrf.mxu3  ;;  %3282 = vmatmul.bf16.gmra.mxu2 %v1842_v59  ;;  %v1669_v11 = vshll.u32 %v7211_v37, 16  ;;  %v1843_v60 = vrot.slane %v5809_v29, 1 }
 0x237   : > { %v7191_v30 = vadd.f32 %v2852_v13, %v6948_v46  ;;  %v3825_v46 = vrot.slane %v6119_v7, 1  ;;  %v5560_v13 = vld [vmem:[#allocation2 + $0x90] sm:$0xe] }
 0x238   : > { %v7195_v54 = vpop.f32.mrf.mxu1  ;;  %v5561_v14 = vor.u32 %v5560_v13, %v5559_v1  ;;  %v3574_v1 = vshll.u32 %v7208_v49, 16  ;;  %v1845_v49 = vsel %vm1821_vm10, %v1843_v60, %v1844_v53 }
 0x239   : > { %v2803_v58 = vpop.f32.mrf.mxu2  ;;  %v7206_v39 = vsel %vm1821_vm10, %v3825_v46, %v3826_v61  ;;  %v7227_v46 = vld [vmem:[#allocation2 + $0x3c] sm:$0xf0] }
 0x23a   : > { %v7201_v59 = vadd.f32 %v2803_v58, %v7154_v0  ;;  %8196 = vst [vmem:[#allocation60_spill] sm:$0xff] %v7206_v39  ;;  %v3569_v0 = vshll.u32 %v7203_v43, 16  ;;  %v5811_v58 = vld [vmem:[#allocation2 + $0x9c] sm:$0xe]  ;;  %v1671_v39 = vrot.slane %v1669_v11, 1 }
 0x23b   : > { %3198 = vmatmul.bf16.gmra.mxu1 %v1660_v12  ;;  %v7221_v12 = vpop.f32.mrf.mxu0  ;;  %8199 = vst [vmem:[#allocation63_spill] sm:$0xff] %v7227_v46 }
 0x23c   : > { %8198 = vst [vmem:[#allocation62_spill] sm:$0xff] %v7221_v12  ;;  %v3571_v61 = vrot.slane %v3569_v0, 1  ;;  %v1397_v12 = vld [vmem:[#allocation2 + $0x74] sm:$0x1]  ;;  %v1672_v11 = vsel %vm1564_vm9, %v6822_v36, %v1671_v39  ;;  %v2435_v36 = vrot.slane %v6694_v5, 1 }
 0x23d   : > { %4157 = vmatmul.bf16.gmra.mxu0 %v3565_v15  ;;  %v2431_v15 = vrot.slane %v5561_v14, 1  ;;  %v5407_v14 = vld [vmem:[#allocation9 + $0x38] sm:$0xff]  ;;  %v1541_v53 = vunpack.c.l.b16 %v1397_v12 }
 0x23e   : > { %v2854_v16 = vpop.f32.mrf.mxu3  ;;  %4538 = vmatpush.bf16.msra.mxu2 %v5407_v14  ;;  %v3581_v14 = vshll.u32 %v7225_v52, 16 }
 0x23f   : > { %v7214_v40 = vadd.f32 %v2854_v16, %v6962_v22  ;;  %v2433_v51 = vsel %vm1821_vm10, %v2431_v15, %v2432_v35  ;;  %v3567_v16 = vshrl.u32 %v7203_v43, 16  ;;  %v3576_v35 = vrot.slane %v3574_v1, 1 }
 0x240   : > { %v7218_v7 = vpop.f32.mrf.mxu1 }
 0x241   : > { %v2805_v22 = vpop.f32.mrf.mxu2  ;;  %v3572_v29 = vor.u32 %v3571_v61, %v3567_v16  ;;  %v5394_v61 = vld [vmem:[#allocation8 + $0x210] sm:$0xff]  ;;  %v1676_v16 = vshll.u32 %v6924_v34, 16 }
 0x242   : > { %v7231_v13 = vadd.f32 %v2805_v22, %v7172_v48  ;;  %v3369_v48 = vld [vmem:[#allocation2 + $0x44] sm:$0x1]  ;;  %4238 = vmatpush.bf16.msra.mxu1 %v5394_v61 }
 0x243   : > { %2896 = vmatmul.bf16.gmra.mxu3 %v2433_v51  ;;  %v5378_v51 = vld [vmem:[#allocation8 + $0x190] sm:$0xff]  ;;  %v3577_v1 = vsel %vm1564_vm9, %v3572_v29, %v3576_v35  ;;  %v3513_v50 = vunpack.c.l.b16 %v3369_v48  ;;  %v7246_v38 = vpop.f32.mrf.mxu0  ;;  %v5525_v29 = vld [vmem:[#allocation2 + $0x60] sm:$0xe] }
 0x244   : > { %4060 = vmatpush.bf16.msra.mxu3 %v5378_v51 }
 0x246   : > { %v2857_v15 = vpop.f32.mrf.mxu3  ;;  %3287 = vmatmul.bf16.gmra.mxu2 %v1845_v49 }
 0x247   : > { %v7236_v46 = vadd.f32 %v2857_v15, %v6974_v4  ;;  %v5812_v4 = vor.u32 %v5811_v58, %v6523_v33  ;;  %v5524_v33 = vld [vmem:[#allocation2 + $0x60] sm:$0xf0] }
 0x248   : > { %v3164_v0 = vpop.f32.mrf.mxu1  ;;  %v8200_v58 = vld [vmem:[#allocation26_spill] sm:$0xff]  ;;  %v5526_v51 = vor.u32 %v5525_v29, %v5524_v33 }
 0x249   : > { %v7240_v22 = vadd.f32 %v3164_v0, %v3076_v19  ;;  %v2808_v60 = vpop.f32.mrf.mxu2  ;;  %v2434_v15 = vrot.slane %v5812_v4, 1  ;;  %v3078_v19 = vadd.f32 %v8200_v58, %v7132_v42  ;;  %v7261_v0 = vpack.c.b16 %v1541_v53, %v1541_v53  ;;  %v3370_v58 = vld [vmem:[#allocation2 + $0x50] sm:$0x1] }
 0x24a   : > { %v7249_v49 = vadd.f32 %v2808_v60, %v7195_v54  ;;  %v7259_v54 = vpack.c.b16 %v3513_v50, %v3513_v50  ;;  %v3579_v60 = vshrl.u32 %v7225_v52, 16  ;;  %v1674_v53 = vshrl.u32 %v6924_v34, 16  ;;  %v5563_v34 = vld [vmem:[#allocation2 + $0xa8] sm:$0xe] }
 0x24b   : > { %3203 = vmatmul.bf16.gmra.mxu1 %v1672_v11  ;;  %v2436_v5 = vsel %vm1821_vm10, %v2434_v15, %v2435_v36  ;;  %v1678_v11 = vrot.slane %v1676_v16, 1  ;;  %v1681_v61 = vshll.u32 %v7261_v0, 16  ;;  %v7274_v33 = vpop.f32.mrf.mxu0  ;;  %v5562_v36 = vld [vmem:[#allocation2 + $0xa8] sm:$0xf0] }
 0x24c   : > { %8201 = vst [vmem:[#allocation26_spill] sm:$0xff] %v7259_v54  ;;  %v3586_v42 = vshll.u32 %v7259_v54, 16  ;;  %v5527_v54 = vld [vmem:[#allocation2 + $0x78] sm:$0xf0] }
 0x24d   : > { %4162 = vmatmul.bf16.gmra.mxu0 %v3577_v1  ;;  %v3583_v1 = vrot.slane %v3581_v14, 1  ;;  %v1679_v15 = vor.u32 %v1678_v11, %v1674_v53  ;;  %v3514_v11 = vunpack.c.l.b16 %v3370_v58 }
 0x24e   : > { %v2859_v35 = vpop.f32.mrf.mxu3  ;;  %v3588_v29 = vrot.slane %v3586_v42, 1  ;;  %v7287_v42 = vld [vmem:[#allocation2 + $0x48] sm:$0xff]  }
 0x24f   : > { %v7255_v39 = vadd.f32 %v2859_v35, %v6992_v45  ;;  %v1847_v45 = vrot.slane %v7211_v37, 1  ;;  %v1846_v35 = vrot.slane %v5526_v51, 1  ;;  %v3584_v14 = vor.u32 %v3583_v1, %v3579_v60 }
 0x250   : > { %v3166_v12 = vpop.f32.mrf.mxu1  ;;  %v1683_v1 = vrot.slane %v1681_v61, 1 }
 0x251   : > { %v7263_v48 = vadd.f32 %v3166_v12, %v3078_v19  ;;  %v2810_v4 = vpop.f32.mrf.mxu2  ;;  %v1848_v37 = vsel %vm1821_vm10, %v1846_v35, %v1847_v45  ;;  %v3589_v60 = vsel %vm1564_vm9, %v3584_v14, %v3588_v29  ;;  %v5564_v45 = vor.u32 %v5563_v34, %v5562_v36  ;;  %v5814_v35 = vld [vmem:[#allocation2 + $0x6c] sm:$0xe]  ;;  %v8206_v36 = vld [vmem:[#allocation29_spill] sm:$0xff] }
 0x252   : > { %v7270_v50 = vadd.f32 %v2810_v4, %v7218_v7  ;;  %v8202_v7 = vld [vmem:[#allocation28_spill] sm:$0xff]  ;;  %v1684_v53 = vsel %vm1564_vm9, %v1679_v15, %v1683_v1  ;;  %v3083_v29 = vadd.f32 %v8206_v36, %v7168_v21  ;;  %v8207_v34 = vld [vmem:[#allocation27_spill] sm:$0xff] }
 0x253   : > { %2901 = vmatmul.bf16.gmra.mxu3 %v2436_v5  ;;  %v3081_v12 = vadd.f32 %v8202_v7, %v7152_v57  ;;  %v1398_v5 = vld [vmem:[#allocation2 + $0x80] sm:$0x1]  ;;  %v2437_v7 = vrot.slane %v5564_v45, 1 }
 0x256   : > { %v2862_v16 = vpop.f32.mrf.mxu3  ;;  %3292 = vmatmul.bf16.gmra.mxu2 %v1848_v37  ;;  %v7289_v37 = vpack.c.b16 %v3514_v11, %v3514_v11 }
 0x257   : > { %v7278_v19 = vadd.f32 %v2862_v16, %v7009_v27  ;;  %v1542_v27 = vunpack.c.l.b16 %v1398_v5  ;;  %v5815_v5 = vor.u32 %v5814_v35, %v8207_v34  ;;  %v3591_v34 = vshrl.u32 %v7287_v42, 16 }
 0x258   : > { %v3169_v51 = vpop.f32.mrf.mxu1  ;;  %8204 = vst [vmem:[#allocation64_spill] sm:$0xff] %v7289_v37  ;;  %v3598_v11 = vshll.u32 %v7289_v37, 16  ;;  %v1399_v37 = vld [vmem:[#allocation2 + $0x8c] sm:$0x1] }
 0x259   : > { %v3170_v4 = vadd.f32 %v3169_v51, %v3081_v12  ;;  %v3253_v16 = vpop.f32.mrf.mxu2  ;;  %v8205_v12 = vld [vmem:[#allocation22_spill] sm:$0xff]  ;;  %v7292_v58 = vpack.c.b16 %v1542_v27, %v1542_v27  ;;  %v7301_v51 = vpop.f32.mrf.mxu0  ;;  %v7310_v27 = vld [vmem:[#allocation2 + $0x54] sm:$0xf0]  ;;  %v1849_v35 = vrot.slane %v5815_v5, 1  ;;  %v8210_v5 = vld [vmem:[#allocation31_spill] sm:$0xff] }
 0x25a   : > { %v7285_v57 = vadd.f32 %v3253_v16, %v7240_v22  ;;  %v2438_v14 = vrot.slane %v8205_v12, 1  ;;  %v3593_v22 = vshll.u32 %v7287_v42, 16  ;;  %8208 = vst [vmem:[#allocation22_spill] sm:$0xff] %v7310_v27  ;;  %v1850_v16 = vrot.slane %v7261_v0, 1  ;;  %v5817_v12 = vld [vmem:[#allocation2 + $0xb4] sm:$0xe] }
 0x25b   : > { %3208 = vmatmul.bf16.gmra.mxu1 %v1684_v53  ;;  %v1693_v45 = vshll.u32 %v7292_v58, 16  ;;  %v3086_v0 = vadd.f32 %v8210_v5, %v7191_v30 }
 0x25c   : > { %8203 = vst [vmem:[#allocation28_spill] sm:$0xff] %v7285_v57  ;;  %v2439_v53 = vsel %vm1821_vm10, %v2437_v7, %v2438_v14  ;;  %v3600_v7 = vrot.slane %v3598_v11, 1  ;;  %v1851_v57 = vsel %vm1821_vm10, %v1849_v35, %v1850_v16  ;;  %v8211_v35 = vld [vmem:[#allocation25_spill] sm:$0xff] }
 0x25d   : > { %4167 = vmatmul.bf16.gmra.mxu0 %v3589_v60  ;;  %v8212_v16 = vld [vmem:[#allocation21_spill] sm:$0xff] }
 0x25e   : > { %v2864_v61 = vpop.f32.mrf.mxu3 }
 0x25f   : > { %v7295_v15 = vadd.f32 %v2864_v61, %v7028_v26  ;;  %v7308_v26 = vld [vmem:[#allocation2 + $0x54] sm:$0xff]   ;;  %v3595_v61 = vrot.slane %v3593_v22, 1 }
 0x260   : > { %v3171_v1 = vpop.f32.mrf.mxu1  ;;  %v3605_v5 = vshll.u32 %v7308_v26, 16 }
 0x261   : > { %v7303_v60 = vadd.f32 %v3171_v1, %v3083_v29  ;;  %v3255_v21 = vpop.f32.mrf.mxu2  ;;  %v5406_v29 = vld [vmem:[#allocation9 + $0x30] sm:$0xff]  ;;  %v1695_v1 = vrot.slane %v1693_v45, 1  ;;  %v3596_v22 = vor.u32 %v3595_v61, %v3591_v34  ;;  %v7326_v45 = vpop.f32.mrf.mxu0  ;;  %v1543_v34 = vunpack.c.l.b16 %v1399_v37 }
 0x262   : > { %v7314_v36 = vadd.f32 %v3255_v21, %v7263_v48  ;;  %4539 = vmatpush.bf16.msra.mxu2 %v5406_v29  ;;  %v3371_v48 = vld [vmem:[#allocation2 + $0x5c] sm:$0x1]  ;;  %v5377_v21 = vld [vmem:[#allocation8 + $0x188] sm:$0xff]  ;;  %v5818_v29 = vor.u32 %v5817_v12, %v8212_v16 }
 0x263   : > { %2906 = vmatmul.bf16.gmra.mxu3 %v2439_v53  ;;  %v3601_v11 = vsel %vm1564_vm9, %v3596_v22, %v3600_v7  ;;  %v1700_v7 = vshll.u32 %v6984_v28, 16 }
 0x264   : > { %8209 = vst [vmem:[#allocation29_spill] sm:$0xff] %v7314_v36  ;;  %4061 = vmatpush.bf16.msra.mxu3 %v5377_v21  ;;  %v2440_v22 = vrot.slane %v5818_v29, 1  ;;  %v5528_v21 = vld [vmem:[#allocation2 + $0x78] sm:$0xe]  ;;  %v3607_v29 = vrot.slane %v3605_v5, 1 }
 0x265   : > { %v5529_v16 = vor.u32 %v5528_v21, %v5527_v54  ;;  %v5376_v5 = vld [vmem:[#allocation8 + $0x180] sm:$0xff] }
 0x266   : > { %v2867_v14 = vpop.f32.mrf.mxu3  ;;  %3297 = vmatmul.bf16.gmra.mxu2 %v1851_v57  ;;  %v3515_v57 = vunpack.c.l.b16 %v3371_v48 }
 0x267   : > { %v7319_v27 = vadd.f32 %v2867_v14, %v7048_v9  ;;  %v1696_v9 = vsel %vm1564_vm9, %v8211_v35, %v1695_v1  ;;  %v5393_v14 = vld [vmem:[#allocation8 + $0x208] sm:$0xff]  ;;  %v8215_v1 = vld [vmem:[#allocation32_spill] sm:$0xff]  ;;  %v7343_v35 = vpack.c.b16 %v1543_v34, %v1543_v34 }
 0x268   : > { %v3174_v53 = vpop.f32.mrf.mxu1  ;;  %4239 = vmatpush.bf16.msra.mxu1 %v5393_v14  ;;  %v3088_v48 = vadd.f32 %v8215_v1, %v7214_v40  ;;  %v1698_v1 = vshrl.u32 %v6984_v28, 16  ;;  %4062 = vmatpush.bf16.msra.mxu3 %v5376_v5  ;;  %v5566_v28 = vld [vmem:[#allocation2 + $0xc0] sm:$0xe]  ;;  %v5820_v5 = vld [vmem:[#allocation2 + $0x84] sm:$0xe] }
 0x269   : > { %v7323_v36 = vadd.f32 %v3174_v53, %v3086_v0  ;;  %v3258_v30 = vpop.f32.mrf.mxu2  ;;  %v8214_v53 = vld [vmem:[#allocation23_spill] sm:$0xff]  ;;  %v1705_v54 = vshll.u32 %v7343_v35, 16 }
 0x26a   : > { %v7331_v61 = vadd.f32 %v3258_v30, %v3170_v4  ;;  %v7341_v4 = vpack.c.b16 %v3515_v57, %v3515_v57  ;;  %v7351_v57 = vpop.f32.mrf.mxu0 }
 0x26b   : > { %3213 = vmatmul.bf16.gmra.mxu1 %v1696_v9 }
 0x26c   : > { %8213 = vst [vmem:[#allocation27_spill] sm:$0xff] %v7331_v61  ;;  %v3610_v40 = vshll.u32 %v7341_v4, 16 }
 0x26d   : > { %4172 = vmatmul.bf16.gmra.mxu0 %v3601_v11  ;;  %v2441_v11 = vrot.slane %v8214_v53, 1  ;;  %v1702_v53 = vrot.slane %v1700_v7, 1 }
 0x26e   : > { %v2869_v0 = vpop.f32.mrf.mxu3 }
 0x26f   : > { %v7337_v12 = vadd.f32 %v2869_v0, %v7063_v62  ;;  %v2442_v30 = vsel %vm1821_vm10, %v2440_v22, %v2441_v11  ;;  %v1853_v62 = vrot.slane %v7292_v58, 1  ;;  %v3603_v0 = vshrl.u32 %v7308_v26, 16  ;;  %v3372_v58 = vld [vmem:[#allocation2 + $0x68] sm:$0x1] }
 0x270   : > { %v3176_v37 = vpop.f32.mrf.mxu1  ;;  %v1852_v22 = vrot.slane %v5529_v16, 1  ;;  %v1707_v16 = vrot.slane %v1705_v54, 1 }
 0x271   : > { %v7345_v9 = vadd.f32 %v3176_v37, %v3088_v48  ;;  %v3260_v14 = vpop.f32.mrf.mxu2  ;;  %v3608_v7 = vor.u32 %v3607_v29, %v3603_v0  ;;  %v1703_v48 = vor.u32 %v1702_v53, %v1698_v1  ;;  %v5565_v37 = vld [vmem:[#allocation2 + $0xc0] sm:$0xf0]  ;;  %v3516_v0 = vunpack.c.l.b16 %v3372_v58 }
 0x272   : > { %v7354_v34 = vadd.f32 %v3260_v14, %v7303_v60  ;;  %v1854_v21 = vsel %vm1821_vm10, %v1852_v22, %v1853_v62  ;;  %v3091_v60 = vadd.f32 %v7002_v63, %v7236_v46  ;;  %v3612_v14 = vrot.slane %v3610_v40, 1  ;;  %v7369_v46 = vld [vmem:[#allocation2 + $0x60] sm:$0xff]   ;;  %v7373_v54 = vpop.f32.mrf.mxu0 }
 0x273   : > { %2911 = vmatmul.bf16.gmra.mxu3 %v2442_v30  ;;  %v1708_v1 = vsel %vm1564_vm9, %v1703_v48, %v1707_v16  ;;  %v5567_v62 = vor.u32 %v5566_v28, %v5565_v37  ;;  %v7371_v40 = vpack.c.b16 %v3516_v0, %v3516_v0 }
 0x274   : > { %8216 = vst [vmem:[#allocation31_spill] sm:$0xff] %v7354_v34  ;;  %v1400_v34 = vld [vmem:[#allocation2 + $0x98] sm:$0x1]  ;;  %v3613_v53 = vsel %vm1564_vm9, %v3608_v7, %v3612_v14 }
 0x275   : > { %v2443_v7 = vrot.slane %v5567_v62, 1  ;;  %v3622_v16 = vshll.u32 %v7371_v40, 16  ;;  %v7390_v62 = vld [vmem:[#allocation2 + $0x6c] sm:$0xf0] }
 0x276   : > { %v2872_v11 = vpop.f32.mrf.mxu3  ;;  %3302 = vmatmul.bf16.gmra.mxu2 %v1854_v21 }
 0x277   : > { %v7360_v30 = vadd.f32 %v2872_v11, %v7071_v24  ;;  %v1544_v24 = vunpack.c.l.b16 %v1400_v34  ;;  %v8217_v11 = vld [vmem:[#allocation24_spill] sm:$0xff]  ;;  %v3093_v34 = vadd.f32 %v7020_v23, %v7255_v39  ;;  %v1856_v23 = vrot.slane %v7343_v35, 1 }
 0x278   : > { %v3179_v61 = vpop.f32.mrf.mxu1  ;;  %v2444_v58 = vrot.slane %v8217_v11, 1  ;;  %v3624_v11 = vrot.slane %v3622_v16, 1 }
 0x279   : > { %v3180_v29 = vadd.f32 %v3179_v61, %v3091_v60  ;;  %v3263_v22 = vpop.f32.mrf.mxu2  ;;  %v7376_v21 = vpack.c.b16 %v1544_v24, %v1544_v24  ;;  %v3617_v60 = vshll.u32 %v7369_v46, 16 }
 0x27a   : > { %v7367_v63 = vadd.f32 %v3263_v22, %v7323_v36  ;;  %v8218_v36 = vld [vmem:[#allocation33_spill] sm:$0xff] }
 0x27b   : > { %3218 = vmatmul.bf16.gmra.mxu1 %v1708_v1  ;;  %v5821_v37 = vor.u32 %v5820_v5, %v8218_v36  ;;  %v1717_v0 = vshll.u32 %v7376_v21, 16  ;;  %v7388_v1 = vld [vmem:[#allocation2 + $0x6c] sm:$0xff]   ;;  %v3619_v39 = vrot.slane %v3617_v60, 1  ;;  %v5405_v22 = vld [vmem:[#allocation9 + $0x28] sm:$0xff] }
 0x27c   : > { %4540 = vmatpush.bf16.msra.mxu2 %v5405_v22  ;;  %v1401_v60 = vld [vmem:[#allocation2 + $0xa4] sm:$0x1] }
 0x27d   : > { %4177 = vmatmul.bf16.gmra.mxu0 %v3613_v53  ;;  %v2445_v53 = vsel %vm1821_vm10, %v2443_v7, %v2444_v58  ;;  %v1855_v24 = vrot.slane %v5821_v37, 1  ;;  %v1719_v58 = vrot.slane %v1717_v0, 1  ;;  %v3096_v37 = vadd.f32 %v7039_v47, %v7278_v19  ;;  %v8219_v0 = vld [vmem:[#allocation30_spill] sm:$0xff]  ;;  %v5392_v47 = vld [vmem:[#allocation8 + $0x200] sm:$0xff] }
 0x27e   : > { %v2874_v61 = vpop.f32.mrf.mxu3  ;;  %v3629_v19 = vshll.u32 %v7388_v1, 16  ;;  %4240 = vmatpush.bf16.msra.mxu1 %v5392_v47 }
 0x27f   : > { %v7379_v48 = vadd.f32 %v2874_v61, %v7084_v25  ;;  %v3615_v61 = vshrl.u32 %v7369_v46, 16 }
 0x280   : > { %v3181_v14 = vpop.f32.mrf.mxu1 }
 0x281   : > { %v3182_v28 = vadd.f32 %v3181_v14, %v3093_v34  ;;  %v3265_v25 = vpop.f32.mrf.mxu2  ;;  %v1857_v34 = vsel %vm1821_vm10, %v1855_v24, %v1856_v23  ;;  %v3620_v35 = vor.u32 %v3619_v39, %v3615_v61  ;;  %v7403_v14 = vpop.f32.mrf.mxu0  ;;  %v1720_v24 = vsel %vm1564_vm9, %v8219_v0, %v1719_v58 }
 0x282   : > { %v7394_v5 = vadd.f32 %v3265_v25, %v7345_v9  ;;  %v1545_v23 = vunpack.c.l.b16 %v1401_v60  ;;  %v1724_v39 = vshll.u32 %v7054_v2, 16  ;;  %v3098_v58 = vadd.f32 %v7058_v17, %v7295_v15  ;;  %v5531_v60 = vld [vmem:[#allocation2 + $0x90] sm:$0xe] }
 0x283   : > { %2916 = vmatmul.bf16.gmra.mxu3 %v2445_v53  ;;  %v3373_v53 = vld [vmem:[#allocation2 + $0x74] sm:$0x1]  ;;  %v3625_v16 = vsel %vm1564_vm9, %v3620_v35, %v3624_v11  ;;  %v1859_v17 = vrot.slane %v7376_v21, 1  ;;  %v3627_v15 = vshrl.u32 %v7388_v1, 16 }
 0x284   : > { %v3517_v22 = vunpack.c.l.b16 %v3373_v53 }
 0x286   : > { %v2877_v7 = vpop.f32.mrf.mxu3  ;;  %3307 = vmatmul.bf16.gmra.mxu2 %v1857_v34  ;;  %v5530_v34 = vld [vmem:[#allocation2 + $0x90] sm:$0xf0]  ;;  %v7419_v35 = vpack.c.b16 %v3517_v22, %v3517_v22 }
 0x287   : > { %v7399_v36 = vadd.f32 %v2877_v7, %v7097_v3  ;;  %v5532_v53 = vor.u32 %v5531_v60, %v5530_v34 }
 0x288   : > { %v3184_v9 = vpop.f32.mrf.mxu1  ;;  %v3634_v22 = vshll.u32 %v7419_v35, 16 }
 0x289   : > { %v3185_v25 = vadd.f32 %v3184_v9, %v3096_v37  ;;  %v3268_v3 = vpop.f32.mrf.mxu2  ;;  %v7412_v37 = vpack.c.b16 %v1545_v23, %v1545_v23  ;;  %v7423_v0 = vpop.f32.mrf.mxu0  ;;  %v1726_v23 = vrot.slane %v1724_v39, 1 }
 0x28a   : > { %v7408_v7 = vadd.f32 %v3268_v3, %v3180_v29  ;;  %v3636_v21 = vrot.slane %v3634_v22, 1 }
 0x28b   : > { %3223 = vmatmul.bf16.gmra.mxu1 %v1720_v24  ;;  %v1722_v24 = vshrl.u32 %v7054_v2, 16  ;;  %v1729_v3 = vshll.u32 %v7412_v37, 16  ;;  %v3374_v2 = vld [vmem:[#allocation2 + $0x80] sm:$0x1] }
 0x28c   : > { %8220 = vst [vmem:[#allocation25_spill] sm:$0xff] %v7408_v7 }
 0x28d   : > { %4182 = vmatmul.bf16.gmra.mxu0 %v3625_v16  ;;  %v3631_v16 = vrot.slane %v3629_v19, 1 }
 0x28e   : > { %v2879_v61 = vpop.f32.mrf.mxu3 }
 0x28f   : > { %v7415_v11 = vadd.f32 %v2879_v61, %v7112_v41  ;;  %v1858_v61 = vrot.slane %v5532_v53, 1  ;;  %v3632_v19 = vor.u32 %v3631_v16, %v3627_v15  ;;  %v3518_v16 = vunpack.c.l.b16 %v3374_v2 }
 0x290   : > { %v3186_v29 = vpop.f32.mrf.mxu1  ;;  %v1736_v15 = vshll.u32 %v7092_v56, 16  ;;  %v1734_v2 = vshrl.u32 %v7092_v56, 16 }
 0x291   : > { %v7421_v9 = vadd.f32 %v3186_v29, %v3098_v58  ;;  %v3270_v41 = vpop.f32.mrf.mxu2  ;;  %v1727_v58 = vor.u32 %v1726_v23, %v1722_v24  ;;  %v1731_v29 = vrot.slane %v1729_v3, 1  ;;  %v1860_v39 = vsel %vm1821_vm10, %v1858_v61, %v1859_v17 }
 0x292   : > { %v7431_v47 = vadd.f32 %v3270_v41, %v3182_v28  ;;  %v5823_v28 = vld [vmem:[#allocation2 + $0x9c] sm:$0xe]  ;;  %v3637_v53 = vsel %vm1564_vm9, %v3632_v19, %v3636_v21 }
 0x293   : > { %8221 = vst [vmem:[#allocation21_spill] sm:$0xff] %v7421_v9  ;;  %4063 = vmatmul.bf16.vlgmr.msra.gmra.mxu3 %v7124_v8  ;;  %v3101_v8 = vadd.f32 %v7073_v18, %v7319_v27  ;;  %v1402_v9 = vld [vmem:[#allocation2 + $0xb0] sm:$0x1]  ;;  %v1732_v24 = vsel %vm1564_vm9, %v1727_v58, %v1731_v29  ;;  %v7445_v18 = vld [vmem:[#allocation2 + $0x78] sm:$0xff]   ;;  %v7447_v27 = vpack.c.b16 %v3518_v16, %v3518_v16 }
 0x294   : > { %v1546_v23 = vunpack.c.l.b16 %v1402_v9  ;;  %v3103_v9 = vadd.f32 %v7086_v6, %v7337_v12  ;;  %v5824_v19 = vor.u32 %v5823_v28, %v7056_v20  ;;  %v1862_v6 = vrot.slane %v7412_v37, 1  ;;  %v5404_v12 = vld [vmem:[#allocation9 + $0x20] sm:$0xff] }
 0x295   : > { %v3646_v29 = vshll.u32 %v7447_v27, 16  ;;  %v3639_v28 = vshrl.u32 %v7445_v18, 16  ;;  %4541 = vmatpush.bf16.msra.mxu2 %v5404_v12  ;;  %v5534_v12 = vld [vmem:[#allocation2 + $0xa8] sm:$0xe] }
 0x296   : > { %v2882_v34 = vpop.f32.mrf.mxu3  ;;  %3312 = vmatmul.bf16.gmra.mxu2 %v1860_v39  ;;  %v7450_v22 = vpack.c.b16 %v1546_v23, %v1546_v23  ;;  %v1738_v39 = vrot.slane %v1736_v15, 1 }
 0x297   : > { %v7435_v60 = vadd.f32 %v2882_v34, %v7122_v31  ;;  %v7441_v31 = vpop.f32.mrf.mxu0  ;;  %v3648_v16 = vrot.slane %v3646_v29, 1 }
 0x298   : > { %v3189_v7 = vpop.f32.mrf.mxu1 }
 0x299   : > { %v3190_v41 = vadd.f32 %v3189_v7, %v3101_v8  ;;  %v3273_v3 = vpop.f32.mrf.mxu2  ;;  %v1741_v8 = vshll.u32 %v7450_v22, 16 }
 0x29a   : > { %v7443_v17 = vadd.f32 %v3273_v3, %v3185_v25  ;;  %v3641_v25 = vshll.u32 %v7445_v18, 16 }
 0x29b   : > { %3228 = vmatmul.bf16.gmra.mxu1 %v1732_v24  ;;  %v1739_v24 = vor.u32 %v1738_v39, %v1734_v2  ;;  %v1743_v56 = vrot.slane %v1741_v8, 1 }
 0x29c   : > { %v3643_v20 = vrot.slane %v3641_v25, 1  ;;  %v1403_v25 = vld [vmem:[#allocation2 + $0xbc] sm:$0x1] }
 0x29d   : > { %4187 = vmatmul.bf16.gmra.mxu0 %v3637_v53  ;;  %v1861_v53 = vrot.slane %v5824_v19, 1  ;;  %v8225_v19 = vld [vmem:[#allocation48_spill] sm:$0xff]  ;;  %v1744_v2 = vsel %vm1564_vm9, %v1739_v24, %v1743_v56  ;;  %v1547_v39 = vunpack.c.l.b16 %v1403_v25 }
 0x29e   : > { %v2884_v7 = vpop.f32.mrf.mxu3  ;;  %v3644_v37 = vor.u32 %v3643_v20, %v3639_v28 }
 0x29f   : > { %v7453_v61 = vadd.f32 %v2884_v7, %v7147_v10  ;;  %v8223_v10 = vld [vmem:[#allocation53_spill] sm:$0xff]  ;;  %v7469_v23 = vpop.f32.mrf.mxu0  ;;  %v1863_v15 = vsel %vm1821_vm10, %v1861_v53, %v1862_v6  ;;  %v8224_v7 = vld [vmem:[#allocation56_spill] sm:$0xff]  ;;  %v5533_v6 = vld [vmem:[#allocation2 + $0xa8] sm:$0xf0] }
 0x2a0   : > { %v3191_v34 = vpop.f32.mrf.mxu1  ;;  %v3649_v29 = vsel %vm1564_vm9, %v3644_v37, %v3648_v16  ;;  %v8228_v16 = vld [vmem:[#allocation51_spill] sm:$0xff]  ;;  %v5535_v56 = vor.u32 %v5534_v12, %v5533_v6  ;;  %v3658_v6 = vshll.u32 %v7187_v44, 16 }
 0x2a1   : > { %v7459_v58 = vadd.f32 %v3191_v34, %v3103_v9  ;;  %v7464_v21 = vpop.f32.mrf.mxu2  ;;  %v3106_v34 = vadd.f32 %v8225_v19, %v7360_v30  ;;  %v8227_v30 = vld [vmem:[#allocation49_spill] sm:$0xff]  ;;  %v3108_v24 = vadd.f32 %v8228_v16, %v7379_v48 }
 0x2a2   : > { %v1748_v20 = vshll.u32 %v8227_v30, 16 }
 0x2a3   : > { %8222 = vst [vmem:[#allocation23_spill] sm:$0xff] %v7459_v58  ;;  %4068 = vmatmul.bf16.gmra.mxu3 %v8223_v10 }
 0x2a6   : > { %v2887_v3 = vpop.f32.mrf.mxu3  ;;  %3317 = vmatmul.bf16.gmra.mxu2 %v1863_v15  ;;  %v7483_v15 = vpack.c.b16 %v1547_v39, %v1547_v39 }
 0x2a7   : > { %v7473_v9 = vadd.f32 %v2887_v3, %v8224_v7  ;;  %v8226_v3 = vld [vmem:[#allocation59_spill] sm:$0xff] }
 0x2a8   : > { %v3194_v10 = vpop.f32.mrf.mxu1  ;;  %v3653_v7 = vshll.u32 %v8226_v3, 16  ;;  %v3651_v48 = vshrl.u32 %v8226_v3, 16 }
 0x2a9   : > { %v3195_v58 = vadd.f32 %v3194_v10, %v3106_v34  ;;  %v3278_v8 = vpop.f32.mrf.mxu2  ;;  %v7490_v34 = vpop.f32.mrf.mxu0  ;;  %v1746_v10 = vshrl.u32 %v8227_v30, 16 }
 0x2aa   : > { %v7479_v53 = vadd.f32 %v3278_v8, %v3190_v41  ;;  %v3655_v25 = vrot.slane %v3653_v7, 1  ;;  %v1865_v8 = vrot.slane %v7450_v22, 1 }
 0x2ab   : > { %3233 = vmatmul.bf16.gmra.mxu1 %v1744_v2  ;;  %v1753_v2 = vshll.u32 %v7483_v15, 16 }
 0x2ac   : > { %v3656_v12 = vor.u32 %v3655_v25, %v3651_v48 }
 0x2ad   : > { %4192 = vmatmul.bf16.gmra.mxu0 %v3649_v29  ;;  %v1750_v29 = vrot.slane %v1748_v20, 1  ;;  %v1755_v7 = vrot.slane %v1753_v2, 1  ;;  %v7514_v2 = vld [vmem:[#allocation2 + $0x90] sm:$0xff]  }
 0x2ae   : > { %v2889_v28 = vpop.f32.mrf.mxu3 }
 0x2af   : > { %v7486_v19 = vadd.f32 %v2889_v28, %v7183_v32  ;;  %v1864_v32 = vrot.slane %v5535_v56, 1  ;;  %v1751_v16 = vor.u32 %v1750_v29, %v1746_v10  ;;  %v3660_v56 = vrot.slane %v3658_v6, 1  ;;  %v8233_v6 = vld [vmem:[#allocation57_spill] sm:$0xff] }
 0x2b0   : > { %v3196_v41 = vpop.f32.mrf.mxu1 }
 0x2b1   : > { %v7492_v37 = vadd.f32 %v3196_v41, %v3108_v24  ;;  %v7496_v39 = vpop.f32.mrf.mxu2  ;;  %v3376_v24 = vld [vmem:[#allocation2 + $0x98] sm:$0x1]  ;;  %v1866_v30 = vsel %vm1821_vm10, %v1864_v32, %v1865_v8  ;;  %v8231_v41 = vld [vmem:[#allocation55_spill] sm:$0xff]  ;;  %v3661_v44 = vsel %vm1564_vm9, %v3656_v12, %v3660_v56  ;;  %v7509_v48 = vpop.f32.mrf.mxu0  ;;  %v1756_v10 = vsel %vm1564_vm9, %v1751_v16, %v1755_v7 }
 0x2b2   : > { %8230 = vst [vmem:[#allocation24_spill] sm:$0xff] %v7496_v39  ;;  %v3520_v25 = vunpack.c.l.b16 %v3376_v24  ;;  %v3113_v12 = vadd.f32 %v8233_v6, %v7415_v11 }
 0x2b3   : > { %8229 = vst [vmem:[#allocation32_spill] sm:$0xff] %v7492_v37  ;;  %4073 = vmatmul.bf16.gmra.mxu3 %v7203_v43  ;;  %v3111_v43 = vadd.f32 %v8231_v41, %v7399_v36  ;;  %v5826_v37 = vld [vmem:[#allocation2 + $0xb4] sm:$0xe]  ;;  %v5575_v41 = vld [vmem:[#allocation2 + $0x18] sm:$0xf0] }
 0x2b4   : > { %v7516_v36 = vpack.c.b16 %v3520_v25, %v3520_v25  ;;  %v5403_v25 = vld [vmem:[#allocation9 + $0x18] sm:$0xff] }
 0x2b5   : > { %4542 = vmatpush.bf16.msra.mxu2 %v5403_v25 }
 0x2b6   : > { %v2892_v28 = vpop.f32.mrf.mxu3  ;;  %3322 = vmatmul.bf16.gmra.mxu2 %v1866_v30  ;;  %v3665_v30 = vshll.u32 %v7514_v2, 16 }
 0x2b7   : > { %v7504_v20 = vadd.f32 %v2892_v28, %v7201_v59  ;;  %v8234_v28 = vld [vmem:[#allocation50_spill] sm:$0xff] }
 0x2b8   : > { %v3199_v22 = vpop.f32.mrf.mxu1  ;;  %v5827_v24 = vor.u32 %v5826_v37, %v8234_v28  ;;  %v8237_v28 = vld [vmem:[#allocation52_spill] sm:$0xff] }
 0x2b9   : > { %v3200_v39 = vadd.f32 %v3199_v22, %v3111_v43  ;;  %v3283_v29 = vpop.f32.mrf.mxu2  ;;  %v3667_v22 = vrot.slane %v3665_v30, 1  ;;  %v7532_v11 = vpop.f32.mrf.mxu0 }
 0x2ba   : > { %v7512_v59 = vadd.f32 %v3283_v29, %v3195_v58  ;;  %v3670_v58 = vshll.u32 %v7516_v36, 16  ;;  %v1867_v56 = vrot.slane %v5827_v24, 1 }
 0x2bb   : > { %3238 = vmatmul.bf16.gmra.mxu1 %v1756_v10  ;;  %v3663_v10 = vshrl.u32 %v7514_v2, 16 }
 0x2bc   : > { %8232 = vst [vmem:[#allocation33_spill] sm:$0xff] %v7512_v59  ;;  %v3672_v29 = vrot.slane %v3670_v58, 1 }
 0x2bd   : > { %4197 = vmatmul.bf16.gmra.mxu0 %v3661_v44  ;;  %v5576_v44 = vld [vmem:[#allocation2 + $0x18] sm:$0xe]  ;;  %v3668_v30 = vor.u32 %v3667_v22, %v3663_v10  ;;  %v8240_v10 = vld [vmem:[#allocation62_spill] sm:$0xff] }
 0x2be   : > { %v2894_v32 = vpop.f32.mrf.mxu3  ;;  %v5577_v37 = vor.u32 %v5576_v44, %v5575_v41 }
 0x2bf   : > { %v7519_v8 = vadd.f32 %v2894_v32, %v7231_v13  ;;  %v1868_v13 = vrot.slane %v7483_v15, 1  ;;  %v5746_v32 = vld [vmem:[#allocation2 + $0x9c] sm:$0xff]   ;;  %v3116_v15 = vadd.f32 %v7193_v55, %v7435_v60  ;;  %v3673_v58 = vsel %vm1564_vm9, %v3668_v30, %v3672_v29  ;;  %v5829_v60 = vld [vmem:[#allocation2 + $0x24] sm:$0xe] }
 0x2c0   : > { %v3201_v16 = vpop.f32.mrf.mxu1  ;;  %v3452_v6 = vunpack.c.l.b16 %v5746_v32  ;;  %v3798_v44 = vrot.slane %v5577_v37, 1  ;;  %v8238_v32 = vld [vmem:[#allocation34_spill] sm:$0xff] }
 0x2c1   : > { %v7525_v7 = vadd.f32 %v3201_v16, %v3113_v12  ;;  %v7528_v43 = vpop.f32.mrf.mxu2  ;;  %v3799_v16 = vrot.slane %v8237_v28, 1  ;;  %v7551_v22 = vpop.f32.mrf.mxu0 }
 0x2c2   : > { %8236 = vst [vmem:[#allocation53_spill] sm:$0xff] %v7528_v43  ;;  %v8239_v43 = vunpack.c.h.b16 %v8238_v32  ;;  %v8244_v32 = vld [vmem:[#allocation58_spill] sm:$0xff] }
 0x2c3   : > { %8235 = vst [vmem:[#allocation30_spill] sm:$0xff] %v7525_v7  ;;  %4078 = vmatmul.bf16.gmra.mxu3 %v7225_v52  ;;  %v1869_v52 = vsel %vm1821_vm10, %v1867_v56, %v1868_v13  ;;  %v3800_v56 = vsel %vm1821_vm10, %v3798_v44, %v3799_v16 }
 0x2c4   : > { %v7545_v59 = vpack.c.b16 %v8239_v43, %v3452_v6  ;;  %v3118_v43 = vadd.f32 %v8240_v10, %v7453_v61  ;;  %v3802_v61 = vrot.slane %v8244_v32, 1 }
 0x2c6   : > { %v2897_v12 = vpop.f32.mrf.mxu3  ;;  %3327 = vmatmul.bf16.gmra.mxu2 %v1869_v52  ;;  %v3677_v55 = vshll.u32 %v7545_v59, 16  ;;  %v8243_v52 = vld [vmem:[#allocation54_spill] sm:$0xff] }
 0x2c7   : > { %v7538_v24 = vadd.f32 %v2897_v12, %v7249_v49  ;;  %v3675_v12 = vshrl.u32 %v7545_v59, 16 }
 0x2c8   : > { %v3204_v41 = vpop.f32.mrf.mxu1  ;;  %v3679_v28 = vrot.slane %v3677_v55, 1  ;;  %v3121_v55 = vadd.f32 %v7246_v38, %v7473_v9 }
 0x2c9   : > { %v3205_v7 = vadd.f32 %v3204_v41, %v3116_v15  ;;  %v3288_v13 = vpop.f32.mrf.mxu2  ;;  %v5830_v15 = vor.u32 %v5829_v60, %v8243_v52  ;;  %v7572_v10 = vpop.f32.mrf.mxu0 }
 0x2ca   : > { %v7548_v49 = vadd.f32 %v3288_v13, %v3200_v39  ;;  %v8242_v39 = vld [vmem:[#allocation35_spill] sm:$0xff]  ;;  %v3680_v41 = vor.u32 %v3679_v28, %v3675_v12  ;;  %v8245_v13 = vld [vmem:[#allocation36_spill] sm:$0xff] }
 0x2cb   : > { %4241 = vmatmul.bf16.vlgmr.msra.gmra.mxu1 %v3800_v56  ;;  %v3682_v16 = vshll.u32 %v8242_v39, 16  ;;  %v3378_v56 = vld [vmem:[#allocation2 + $0xb0] sm:$0x1]  ;;  %v7576_v28 = vld [vmem:[#allocation2 + $0xa8] sm:$0xff]  }
 0x2cc   : > { %v3689_v38 = vshll.u32 %v7576_v28, 16 }
 0x2cd   : > { %4202 = vmatmul.bf16.gmra.mxu0 %v3673_v58  ;;  %v3801_v58 = vrot.slane %v5830_v15, 1  ;;  %v8246_v15 = vld [vmem:[#allocation38_spill] sm:$0xff] }
 0x2ce   : > { %v2899_v37 = vpop.f32.mrf.mxu3 }
 0x2cf   : > { %v7554_v25 = vadd.f32 %v2899_v37, %v7270_v50  ;;  %v3684_v50 = vrot.slane %v3682_v16, 1  ;;  %v3803_v12 = vsel %vm1821_vm10, %v3801_v58, %v3802_v61  ;;  %v3687_v58 = vshrl.u32 %v7576_v28, 16 }
 0x2d0   : > { %v3206_v29 = vpop.f32.mrf.mxu1  ;;  %v3691_v61 = vrot.slane %v3689_v38, 1  ;;  %v8250_v38 = vld [vmem:[#allocation41_spill] sm:$0xff] }
 0x2d1   : > { %v7558_v6 = vadd.f32 %v3206_v29, %v3118_v43  ;;  %v7563_v30 = vpop.f32.mrf.mxu2  ;;  %v3685_v29 = vsel %vm1564_vm9, %v3680_v41, %v3684_v50  ;;  %v3123_v41 = vadd.f32 %v7274_v33, %v7486_v19  ;;  %v5747_v19 = vld [vmem:[#allocation2 + $0xb4] sm:$0xff]  }
 0x2d3   : > { %8241 = vst [vmem:[#allocation56_spill] sm:$0xff] %v7558_v6  ;;  %4083 = vmatmul.bf16.gmra.mxu3 %v7287_v42  ;;  %v3522_v42 = vunpack.c.l.b16 %v3378_v56  ;;  %v5578_v56 = vld [vmem:[#allocation2 + $0x30] sm:$0xf0] }
 0x2d5   : > { %v7580_v52 = vpack.c.b16 %v3522_v42, %v3522_v42  ;;  %v5402_v42 = vld [vmem:[#allocation9 + $0x10] sm:$0xff] }
 0x2d6   : > { %v2902_v44 = vpop.f32.mrf.mxu3  ;;  %4543 = vmatpush.bf16.msra.mxu2 %v5402_v42 }
 0x2d7   : > { %v7568_v37 = vadd.f32 %v2902_v44, %v8245_v13  ;;  %v7592_v13 = vpop.f32.mrf.mxu0 }
 0x2d8   : > { %v3209_v60 = vpop.f32.mrf.mxu1 }
 0x2d9   : > { %v3210_v43 = vadd.f32 %v3209_v60, %v3121_v55  ;;  %v3293_v39 = vpop.f32.mrf.mxu2  ;;  %v5579_v60 = vld [vmem:[#allocation2 + $0x30] sm:$0xe] }
 0x2da   : > { %v7578_v16 = vadd.f32 %v3293_v39, %v3205_v7  ;;  %v3694_v7 = vshll.u32 %v7580_v52, 16  ;;  %v3456_v39 = vunpack.c.l.b16 %v5747_v19 }
 0x2db   : > { %4246 = vmatmul.bf16.gmra.mxu1 %v3803_v12  ;;  %v3692_v12 = vor.u32 %v3691_v61, %v3687_v58 }
 0x2dc   : > { %v3696_v33 = vrot.slane %v3694_v7, 1 }
 0x2dd   : > { %4207 = vmatmul.bf16.gmra.mxu0 %v3685_v29  ;;  %v5580_v29 = vor.u32 %v5579_v60, %v5578_v56  ;;  %v8251_v60 = vld [vmem:[#allocation39_spill] sm:$0xff] }
 0x2de   : > { %v2904_v9 = vpop.f32.mrf.mxu3  ;;  %v3697_v56 = vsel %vm1564_vm9, %v3692_v12, %v3696_v33  ;;  %v8252_v58 = vunpack.c.h.b16 %v8251_v60  ;;  %v3128_v12 = vadd.f32 %v7326_v45, %v7519_v8  ;;  %v8259_v8 = vld [vmem:[#allocation26_spill] sm:$0xff] }
 0x2df   : > { %v7584_v44 = vadd.f32 %v2904_v9, %v8246_v15  ;;  %v8249_v15 = vld [vmem:[#allocation61_spill] sm:$0xff]  ;;  %v3804_v6 = vrot.slane %v5580_v29, 1  ;;  %v7609_v42 = vpop.f32.mrf.mxu0 }
 0x2e0   : > { %v3211_v50 = vpop.f32.mrf.mxu1  ;;  %v7606_v61 = vpack.c.b16 %v8252_v58, %v3456_v39 }
 0x2e1   : > { %v7588_v32 = vadd.f32 %v3211_v50, %v3123_v41  ;;  %v7594_v55 = vpop.f32.mrf.mxu2  ;;  %v3805_v41 = vrot.slane %v8249_v15, 1 }
 0x2e2   : > { %8248 = vst [vmem:[#allocation59_spill] sm:$0xff] %v7594_v55 }
 0x2e3   : > { %8247 = vst [vmem:[#allocation48_spill] sm:$0xff] %v7588_v32  ;;  %4088 = vmatmul.bf16.gmra.mxu3 %v7308_v26  ;;  %v3126_v32 = vadd.f32 %v7301_v51, %v7504_v20  ;;  %v3806_v7 = vsel %vm1821_vm10, %v3804_v6, %v3805_v41  ;;  %v3701_v51 = vshll.u32 %v7606_v61, 16  ;;  %v5832_v20 = vld [vmem:[#allocation2 + $0x3c] sm:$0xe]  ;;  %v3699_v6 = vshrl.u32 %v7606_v61, 16 }
 0x2e4   : > { %v8256_v41 = vld [vmem:[#allocation40_spill] sm:$0xff] }
 0x2e5   : > { %v3703_v15 = vrot.slane %v3701_v51, 1  ;;  %v3131_v51 = vadd.f32 %v7351_v57, %v7538_v24  ;;  %v8262_v57 = vld [vmem:[#allocation45_spill] sm:$0xff] }
 0x2e6   : > { %v2907_v9 = vpop.f32.mrf.mxu3 }
 0x2e7   : > { %v7599_v50 = vadd.f32 %v2907_v9, %v8250_v38  ;;  %v3706_v38 = vshll.u32 %v8256_v41, 16  ;;  %v3704_v58 = vor.u32 %v3703_v15, %v3699_v6  ;;  %v7637_v15 = vld [vmem:[#allocation2 + $0xc0] sm:$0xff]  }
 0x2e8   : > { %v3214_v55 = vpop.f32.mrf.mxu1 }
 0x2e9   : > { %v3215_v26 = vadd.f32 %v3214_v55, %v3126_v32  ;;  %v3298_v19 = vpop.f32.mrf.mxu2  ;;  %v8254_v32 = vld [vmem:[#allocation43_spill] sm:$0xff] }
 0x2ea   : > { %v7611_v9 = vadd.f32 %v3298_v19, %v3210_v43  ;;  %v8257_v43 = vld [vmem:[#allocation63_spill] sm:$0xff]  ;;  %v7627_v19 = vpop.f32.mrf.mxu0 }
 0x2eb   : > { %4251 = vmatmul.bf16.gmra.mxu1 %v3806_v7  ;;  %v3708_v7 = vrot.slane %v3706_v38, 1 }
 0x2ec   : > { %8253 = vst [vmem:[#allocation49_spill] sm:$0xff] %v7611_v9 }
 0x2ed   : > { %4212 = vmatmul.bf16.gmra.mxu0 %v3697_v56  ;;  %v5833_v56 = vor.u32 %v5832_v20, %v8257_v43  ;;  %v3709_v43 = vsel %vm1564_vm9, %v3704_v58, %v3708_v7  ;;  %v3133_v58 = vadd.f32 %v7373_v54, %v7554_v25 }
 0x2ee   : > { %v2909_v29 = vpop.f32.mrf.mxu3 }
 0x2ef   : > { %v7615_v55 = vadd.f32 %v2909_v29, %v8254_v32  ;;  %v3807_v45 = vrot.slane %v5833_v56, 1  ;;  %v3808_v32 = vrot.slane %v8259_v8, 1 }
 0x2f0   : > { %v3216_v33 = vpop.f32.mrf.mxu1 }
 0x2f1   : > { %v7619_v39 = vadd.f32 %v3216_v33, %v3128_v12  ;;  %v7624_v60 = vpop.f32.mrf.mxu2  ;;  %v3380_v12 = vld [vmem:[#allocation2 + $0xc8] sm:$0x1]  ;;  %v8260_v33 = vld [vmem:[#allocation44_spill] sm:$0xff]  ;;  %v3809_v6 = vsel %vm1821_vm10, %v3807_v45, %v3808_v32 }
 0x2f2   : > { %8258 = vst [vmem:[#allocation55_spill] sm:$0xff] %v7624_v60  ;;  %v7649_v7 = vpop.f32.mrf.mxu0 }
 0x2f3   : > { %8255 = vst [vmem:[#allocation51_spill] sm:$0xff] %v7619_v39  ;;  %4093 = vmatmul.bf16.gmra.mxu3 %v7369_v46  ;;  %v3524_v46 = vunpack.c.l.b16 %v3380_v12  ;;  %v3711_v12 = vshrl.u32 %v7637_v15, 16 }
 0x2f5   : > { %v7641_v8 = vpack.c.b16 %v3524_v46, %v3524_v46  ;;  %v5582_v46 = vld [vmem:[#allocation2 + $0x48] sm:$0xe] }
 0x2f6   : > { %v2912_v29 = vpop.f32.mrf.mxu3 }
 0x2f7   : > { %v7631_v39 = vadd.f32 %v2912_v29, %v8260_v33  ;;  %v3713_v29 = vshll.u32 %v7637_v15, 16 }
 0x2f8   : > { %v3219_v20 = vpop.f32.mrf.mxu1 }
 0x2f9   : > { %v3220_v41 = vadd.f32 %v3219_v20, %v3131_v51  ;;  %v3303_v38 = vpop.f32.mrf.mxu2  ;;  %v3718_v51 = vshll.u32 %v7641_v8, 16  ;;  %v5581_v20 = vld [vmem:[#allocation2 + $0x48] sm:$0xf0] }
 0x2fa   : > { %v7639_v56 = vadd.f32 %v3303_v38, %v3215_v26  ;;  %v3715_v26 = vrot.slane %v3713_v29, 1  ;;  %v5401_v38 = vld [vmem:[#allocation9 + $0x8] sm:$0xff]  ;;  %v3136_v29 = vadd.f32 %v7403_v14, %v7568_v37  ;;  %v7665_v9 = vpop.f32.mrf.mxu0  ;;  %v3138_v14 = vadd.f32 %v7423_v0, %v7584_v44 }
 0x2fb   : > { %4256 = vmatmul.bf16.gmra.mxu1 %v3809_v6  ;;  %v5583_v6 = vor.u32 %v5582_v46, %v5581_v20  ;;  %v3720_v54 = vrot.slane %v3718_v51, 1  ;;  %4544 = vmatpush.bf16.msra.mxu2 %v5401_v38  ;;  %v5835_v20 = vld [vmem:[#allocation2 + $0x54] sm:$0xe] }
 0x2fc   : > { %8261 = vst [vmem:[#allocation57_spill] sm:$0xff] %v7639_v56  ;;  %v8267_v38 = vld [vmem:[#allocation47_spill] sm:$0xff] }
 0x2fd   : > { %4217 = vmatmul.bf16.gmra.mxu0 %v3709_v43  ;;  %v3810_v60 = vrot.slane %v5583_v6, 1  ;;  %v8268_v6 = vld [vmem:[#allocation22_spill] sm:$0xff] }
 0x2fe   : > { %v2914_v33 = vpop.f32.mrf.mxu3 }
 0x2ff   : > { %v7645_v24 = vadd.f32 %v2914_v33, %v8262_v57  ;;  %v3716_v33 = vor.u32 %v3715_v26, %v3711_v12  ;;  %v8265_v57 = vld [vmem:[#allocation64_spill] sm:$0xff] }
 0x300   : > { %v3221_v45 = vpop.f32.mrf.mxu1  ;;  %v3811_v56 = vrot.slane %v8265_v57, 1  ;;  %v3141_v57 = vadd.f32 %v7441_v31, %v7599_v50  ;;  %v5585_v31 = vld [vmem:[#allocation2 + $0x60] sm:$0xe] }
 0x301   : > { %v7651_v32 = vadd.f32 %v3221_v45, %v3133_v58  ;;  %v7655_v43 = vpop.f32.mrf.mxu2  ;;  %v8266_v58 = vld [vmem:[#allocation46_spill] sm:$0xff] }
 0x302   : > { %8264 = vst [vmem:[#allocation52_spill] sm:$0xff] %v7655_v43  ;;  %v3812_v12 = vsel %vm1821_vm10, %v3810_v60, %v3811_v56 }
 0x303   : > { %8263 = vst [vmem:[#allocation50_spill] sm:$0xff] %v7651_v32  ;;  %4098 = vmatmul.bf16.gmra.mxu3 %v7388_v1  ;;  %v3721_v1 = vsel %vm1564_vm9, %v3716_v33, %v3720_v54  ;;  %v5836_v33 = vor.u32 %v5835_v20, %v8268_v6 }
 0x305   : > { %v3813_v56 = vrot.slane %v5836_v33, 1 }
 0x306   : > { %v2917_v25 = vpop.f32.mrf.mxu3 }
 0x307   : > { %v7660_v45 = vadd.f32 %v2917_v25, %v8266_v58 }
 0x308   : > { %v3224_v32 = vpop.f32.mrf.mxu1 }
 0x309   : > { %v3225_v43 = vadd.f32 %v3224_v32, %v3136_v29  ;;  %v3308_v26 = vpop.f32.mrf.mxu2 }
 0x30a   : > { %v7668_v51 = vadd.f32 %v3308_v26, %v3220_v41  ;;  %v3814_v41 = vrot.slane %v7341_v4, 1  ;;  %v5584_v4 = vld [vmem:[#allocation2 + $0x60] sm:$0xf0] }
 0x30b   : > { %4261 = vmatmul.bf16.gmra.mxu1 %v3812_v12  ;;  %v5586_v50 = vor.u32 %v5585_v31, %v5584_v4 }
 0x30c   : > { %v3815_v0 = vsel %vm1821_vm10, %v3813_v56, %v3814_v41 }
 0x30d   : > { %4222 = vmatmul.bf16.gmra.mxu0 %v3721_v1 }
 0x30e   : > { %v2919_v46 = vpop.f32.mrf.mxu3 }
 0x30f   : > { %v2920_v25 = vadd.f32 %v2919_v46, %v8267_v38  ;;  %v5400_v38 = vld [vmem:[#allocation9] sm:$0xff] }
 0x310   : > { %v3226_v37 = vpop.f32.mrf.mxu1  ;;  %4545 = vmatpush.bf16.msra.mxu2 %v5400_v38 }
 0x311   : > { %v7673_v32 = vadd.f32 %v3226_v37, %v3138_v14  ;;  %v7676_v54 = vpop.f32.mrf.mxu2  ;;  %v3146_v37 = vadd.f32 %v7490_v34, %v7631_v39 }
 0x313   : > { %4103 = vmatmul.bf16.gmra.mxu3 %v7445_v18  ;;  %v3143_v18 = vadd.f32 %v7469_v23, %v7615_v55  ;;  %v3816_v55 = vrot.slane %v5586_v50, 1 }
 0x316   : > { %v4064_v60 = vpop.f32.mrf.mxu3 }
 0x318   : > { %v3229_v58 = vpop.f32.mrf.mxu1 }
 0x319   : > { %v3230_v29 = vadd.f32 %v3229_v58, %v3141_v57  ;;  %v3313_v44 = vpop.f32.mrf.mxu2  ;;  %v3148_v58 = vadd.f32 %v7509_v48, %v7645_v24 }
 0x31a   : > { %v7683_v1 = vadd.f32 %v3313_v44, %v3225_v43  ;;  %v3817_v43 = vrot.slane %v7371_v40, 1 }
 0x31b   : > { %4266 = vmatmul.bf16.gmra.mxu1 %v3815_v0 }
 0x31c   : > { %v3818_v33 = vsel %vm1821_vm10, %v3816_v55, %v3817_v43 }
 0x31e   : > { %v7685_v12 = vpop.f32.mrf.mxu3 }
 0x320   : > { %v3231_v26 = vpop.f32.mrf.mxu1 }
 0x321   : > { %v7689_v20 = vadd.f32 %v3231_v26, %v3143_v18  ;;  %v7691_v46 = vpop.f32.mrf.mxu2  ;;  %v3151_v26 = vadd.f32 %v7532_v11, %v7660_v45  ;;  %v5588_v11 = vld [vmem:[#allocation2 + $0x78] sm:$0xe] }
 0x323   : > { %4108 = vmatmul.bf16.gmra.mxu3 %v8226_v3  ;;  %v5838_v3 = vld [vmem:[#allocation2 + $0x6c] sm:$0xe] }
 0x324   : > { %v5839_v44 = vor.u32 %v5838_v3, %v7390_v62 }
 0x326   : > { %v7694_v14 = vpop.f32.mrf.mxu3  ;;  %v3819_v18 = vrot.slane %v5839_v44, 1 }
 0x328   : > { %v3234_v23 = vpop.f32.mrf.mxu1 }
 0x329   : > { %v3235_v6 = vadd.f32 %v3234_v23, %v3146_v37  ;;  %v3318_v56 = vpop.f32.mrf.mxu2  ;;  %v5587_v37 = vld [vmem:[#allocation2 + $0x78] sm:$0xf0] }
 0x32a   : > { %v7700_v41 = vadd.f32 %v3318_v56, %v3230_v29  ;;  %v3820_v29 = vrot.slane %v7419_v35, 1  ;;  %v7723_v35 = vpop.f32.mrf.mxu0  ;;  %v5589_v45 = vor.u32 %v5588_v11, %v5587_v37  ;;  %v4159_v11 = vadd.f32 %v7609_v42, %v7694_v14 }
 0x32b   : > { %4271 = vmatmul.bf16.gmra.mxu1 %v3818_v33  ;;  %v4154_v33 = vadd.f32 %v7572_v10, %v4064_v60  ;;  %v4156_v10 = vadd.f32 %v7592_v13, %v7685_v12 }
 0x32c   : > { %v3821_v48 = vsel %vm1821_vm10, %v3819_v18, %v3820_v29  ;;  %v7741_v29 = vld [vmem:[%s8107_s6] ss:$0 sm:$0xff] }
 0x32e   : > { %v4071_v57 = vpop.f32.mrf.mxu3 }
 0x330   : > { %v3236_v0 = vpop.f32.mrf.mxu1 }
 0x331   : > { %v7704_v40 = vadd.f32 %v3236_v0, %v3148_v58  ;;  %v7707_v34 = vpop.f32.mrf.mxu2 }
 0x332   : > { %v7735_v44 = vpop.f32.mrf.mxu0 }
 0x333   : > { %4113 = vmatmul.bf16.gmra.mxu3 %v7514_v2  ;;  %v3153_v2 = vadd.f32 %v7551_v22, %v2920_v25  ;;  %v3822_v22 = vrot.slane %v5589_v45, 1 }
 0x336   : > { %v7710_v39 = vpop.f32.mrf.mxu3 }
 0x338   : > { %v3239_v4 = vpop.f32.mrf.mxu1 }
 0x339   : > { %v3240_v31 = vadd.f32 %v3239_v4, %v3151_v26  ;;  %v3323_v24 = vpop.f32.mrf.mxu2  ;;  %v7748_v4 = vld [vmem:[#allocation12] ss:$0 sm:$0xff] }
 0x33a   : > { %v7716_v50 = vadd.f32 %v3323_v24, %v3235_v6  ;;  %v3823_v6 = vrot.slane %v7447_v27, 1  ;;  %v7754_v37 = vpop.f32.mrf.mxu0 }
 0x33b   : > { %4276 = vmatmul.bf16.gmra.mxu1 %v3821_v48  ;;  %v8270_v48 = vld [vmem:[#allocation29_spill] sm:$0xff] }
 0x33c   : > { %v3824_v3 = vsel %vm1821_vm10, %v3822_v22, %v3823_v6 }
 0x33e   : > { %v7718_v62 = vpop.f32.mrf.mxu3 }
 0x340   : > { %v3241_v38 = vpop.f32.mrf.mxu1 }
 0x341   : > { %v7721_v43 = vadd.f32 %v3241_v38, %v3153_v2  ;;  %v7725_v23 = vpop.f32.mrf.mxu2 }
 0x343   : > { %4118 = vmatmul.bf16.gmra.mxu3 %v7545_v59  ;;  %v8269_v59 = vld [vmem:[#allocation28_spill] sm:$0xff] }
 0x346   : > { %v7728_v55 = vpop.f32.mrf.mxu3 }
 0x348   : > { %v4242_v56 = vpop.f32.mrf.mxu1 }
 0x349   : > { %v4243_v25 = vadd.f32 %v4242_v56, %v4154_v33  ;;  %v3328_v58 = vpop.f32.mrf.mxu2 }
 0x34a   : > { %v7733_v0 = vadd.f32 %v3328_v58, %v3240_v31  ;;  %v4161_v58 = vadd.f32 %v7627_v19, %v4071_v57  ;;  %v3829_v19 = vrot.slane %v7516_v36, 1  ;;  %v4164_v57 = vadd.f32 %v7649_v7, %v7710_v39 }
 0x34b   : > { %4281 = vmatmul.bf16.gmra.mxu1 %v3824_v3  ;;  %v4322_v18 = vadd.f32 %v4243_v25, %v8269_v59  ;;  %v8271_v25 = vld [vmem:[#allocation60_spill] sm:$0xff]  ;;  %v4166_v7 = vadd.f32 %v7665_v9, %v7718_v62 }
 0x34d   : > { %v4358_v26 = vmul.f32 %v7741_v29, %v4322_v18  ;;  %v7764_v18 = vpop.f32.mrf.mxu0 }
 0x34e   : > { %v7743_v27 = vpop.f32.mrf.mxu3 }
 0x34f   : > { %v4394_v2 = vadd.f32 %v7748_v4, %v4358_v26  ;;  %v8273_v26 = vld [vmem:[#allocation31_spill] sm:$0xff] }
 0x350   : > { %v4244_v60 = vpop.f32.mrf.mxu1 }
 0x351   : > { %v4245_v31 = vadd.f32 %v4244_v60, %v4156_v10  ;;  %v4426_v6 = vmax.f32 %v4394_v2, 0.0  ;;  %v5590_v60 = vld [vmem:[#allocation2 + $0x90] sm:$0xf0] }
 0x353   : > { %v4323_v24 = vadd.f32 %v4245_v31, %v8270_v48  ;;  %4123 = vmatmul.bf16.gmra.mxu3 %v7576_v28  ;;  %v8272_v28 = vld [vmem:[#allocation27_spill] sm:$0xff] }
 0x354   : > { %v5591_v48 = vld [vmem:[#allocation2 + $0x90] sm:$0xe] }
 0x355   : > { %v4359_v38 = vmul.f32 %v7741_v29, %v4323_v24  ;;  %v5592_v24 = vor.u32 %v5591_v48, %v5590_v60 }
 0x356   : > { %v7759_v12 = vpop.f32.mrf.mxu3 }
 0x357   : > { %v4395_v13 = vadd.f32 %v7748_v4, %v4359_v38 }
 0x358   : > { %v4247_v45 = vpop.f32.mrf.mxu1 }
 0x359   : > { %v4427_v33 = vmax.f32 %v4395_v13, 0.0  ;;  %v4248_v56 = vadd.f32 %v4247_v45, %v4159_v11  ;;  %v3828_v45 = vrot.slane %v5592_v24, 1 }
 0x35b   : > { %v4458_v22 = vpack.c.bf16 %v4427_v33, %v4426_v6  ;;  %4286 = vmatmul.bf16.gmra.mxu1 %v8271_v25  ;;  %v4324_v3 = vadd.f32 %v4248_v56, %v8272_v28 }
 0x35d   : > { %4546 = vmatmul.bf16.vlgmr.msra.gmra.mxu2 %v4458_v22  ;;  %v4360_v42 = vmul.f32 %v7741_v29, %v4324_v3  ;;  %v7778_v22 = vpop.f32.mrf.mxu0 }
 0x35e   : > { %v7767_v14 = vpop.f32.mrf.mxu3 }
 0x35f   : > { %v4396_v38 = vadd.f32 %v7748_v4, %v4360_v42 }
 0x360   : > { %v4249_v59 = vpop.f32.mrf.mxu1 }
 0x361   : > { %v4250_v10 = vadd.f32 %v4249_v59, %v4161_v58  ;;  %v4428_v33 = vmax.f32 %v4396_v38, 0.0 }
 0x363   : > { %v4325_v31 = vadd.f32 %v4250_v10, %v8273_v26  ;;  %4128 = vmatmul.bf16.gmra.mxu3 %v7606_v61  ;;  %v3830_v61 = vsel %vm1821_vm10, %v3828_v45, %v3829_v19  ;;  %v4169_v26 = vadd.f32 %v7723_v35, %v7728_v55  ;;  %v5593_v35 = vld [vmem:[#allocation2 + $0xa8] sm:$0xf0]  ;;  %v5594_v55 = vld [vmem:[#allocation2 + $0xa8] sm:$0xe] }
 0x365   : > { %v4361_v2 = vmul.f32 %v7741_v29, %v4325_v31  ;;  %v7788_v42 = vpop.f32.mrf.mxu0 }
 0x366   : > { %v7780_v25 = vpop.f32.mrf.mxu3 }
 0x367   : > { %v4397_v11 = vadd.f32 %v7748_v4, %v4361_v2  ;;  %v8275_v2 = vld [vmem:[#allocation25_spill] sm:$0xff] }
 0x368   : > { %v4252_v13 = vpop.f32.mrf.mxu1 }
 0x369   : > { %v4253_v6 = vadd.f32 %v4252_v13, %v4164_v57  ;;  %v4429_v56 = vmax.f32 %v4397_v11, 0.0  ;;  %v4171_v57 = vadd.f32 %v7735_v44, %v7743_v27  ;;  %v4174_v44 = vadd.f32 %v7754_v37, %v7759_v12 }
 0x36a   : > { %v4176_v37 = vadd.f32 %v7764_v18, %v7767_v14 }
 0x36b   : > { %4291 = vmatmul.bf16.gmra.mxu1 %v3830_v61  ;;  %v4459_v28 = vpack.c.bf16 %v4429_v56, %v4428_v33  ;;  %v4326_v36 = vadd.f32 %v4253_v6, %v7367_v63  ;;  %v5595_v33 = vor.u32 %v5594_v55, %v5593_v35  ;;  %v3381_v55 = vld [vmem:[#allocation2 + $0xd4] sm:$0x1] }
 0x36c   : > { %v3525_v18 = vunpack.c.l.b16 %v3381_v55 }
 0x36d   : > { %4551 = vmatmul.bf16.gmra.mxu2 %v4459_v28  ;;  %v4362_v3 = vmul.f32 %v7741_v29, %v4326_v36  ;;  %v7799_v19 = vpop.f32.mrf.mxu0  ;;  %v3834_v36 = vrot.slane %v5595_v33, 1 }
 0x36e   : > { %v7790_v10 = vpop.f32.mrf.mxu3  ;;  %v3541_v33 = vpack.c.b16 %v3525_v18, %v3525_v18 }
 0x36f   : > { %v4398_v63 = vadd.f32 %v7748_v4, %v4362_v3 }
 0x370   : > { %v4254_v39 = vpop.f32.mrf.mxu1 }
 0x371   : > { %v4255_v58 = vadd.f32 %v4254_v39, %v4166_v7  ;;  %v4430_v48 = vmax.f32 %v4398_v63, 0.0  ;;  %v3835_v7 = vrot.slane %v7580_v52, 1  ;;  %v3364_v52 = vld [vmem:[#allocation2 + $0xcc] sm:$0xff]  }
 0x372   : > { %v3723_v14 = vshrl.u32 %v3364_v52, 16 }
 0x373   : > { %v4327_v59 = vadd.f32 %v4255_v58, %v7394_v5  ;;  %4133 = vmatmul.bf16.gmra.mxu3 %v7637_v15  ;;  %v8274_v5 = vld [vmem:[#allocation37_spill] sm:$0xff]  ;;  %v3836_v63 = vsel %vm1821_vm10, %v3834_v36, %v3835_v7  ;;  %v3730_v7 = vshll.u32 %v3541_v33, 16 }
 0x375   : > { %v4363_v60 = vmul.f32 %v7741_v29, %v4327_v59  ;;  %v7813_v3 = vpop.f32.mrf.mxu0 }
 0x376   : > { %v7803_v11 = vpop.f32.mrf.mxu3 }
 0x377   : > { %v4399_v9 = vadd.f32 %v7748_v4, %v4363_v60 }
 0x378   : > { %v4257_v62 = vpop.f32.mrf.mxu1 }
 0x379   : > { %v4258_v31 = vadd.f32 %v4257_v62, %v4169_v26  ;;  %v4431_v24 = vmax.f32 %v4399_v9, 0.0  ;;  %v7819_v62 = vld [vmem:[#allocation2 + $0xcc] sm:$0xf0] }
 0x37b   : > { %4296 = vmatmul.bf16.gmra.mxu1 %v8274_v5  ;;  %v4460_v15 = vpack.c.bf16 %v4431_v24, %v4430_v48  ;;  %v4328_v38 = vadd.f32 %v4258_v31, %v8275_v2  ;;  %v8276_v31 = vld [vmem:[#allocation21_spill] sm:$0xff] }
 0x37c   : > { %v3276_v48 = vadd.f32 %v7464_v21, %v8276_v31  ;;  %v4179_v21 = vadd.f32 %v7778_v22, %v7780_v25  ;;  %v4181_v25 = vadd.f32 %v7788_v42, %v7790_v10  ;;  %v4184_v10 = vadd.f32 %v7799_v19, %v7803_v11  ;;  %v8281_v11 = vld [vmem:[#allocation32_spill] sm:$0xff] }
 0x37d   : > { %4556 = vmatmul.bf16.gmra.mxu2 %v4460_v15  ;;  %v4364_v45 = vmul.f32 %v7741_v29, %v4328_v38  ;;  %v3725_v15 = vshll.u32 %v3364_v52, 16  ;;  %v7826_v2 = vpop.f32.mrf.mxu0 }
 0x37e   : > { %v7815_v58 = vpop.f32.mrf.mxu3 }
 0x37f   : > { %v4400_v28 = vadd.f32 %v7748_v4, %v4364_v45 }
 0x380   : > { %v4259_v13 = vpop.f32.mrf.mxu1 }
 0x381   : > { %v4260_v6 = vadd.f32 %v4259_v13, %v4171_v57  ;;  %v4432_v60 = vmax.f32 %v4400_v28, 0.0  ;;  %v3727_v13 = vrot.slane %v3725_v15, 1 }
 0x383   : > { %v4329_v56 = vadd.f32 %v4260_v6, %v7431_v47  ;;  %4138 = vmatmul.bf16.gmra.mxu3 %v3364_v52  ;;  %v3728_v36 = vor.u32 %v3727_v13, %v3723_v14  ;;  %v8278_v52 = vld [vmem:[#allocation23_spill] sm:$0xff] }
 0x385   : > { %v4365_v61 = vmul.f32 %v7741_v29, %v4329_v56 }
 0x386   : > { %v7828_v38 = vpop.f32.mrf.mxu3 }
 0x387   : > { %v4401_v27 = vadd.f32 %v7748_v4, %v4365_v61 }
 0x388   : > { %v4262_v39 = vpop.f32.mrf.mxu1 }
 0x389   : > { %v4263_v59 = vadd.f32 %v4262_v39, %v4174_v44  ;;  %v4433_v47 = vmax.f32 %v4401_v27, 0.0  ;;  %v8277_v44 = vld [vmem:[#allocation42_spill] sm:$0xff]  ;;  %v3732_v39 = vrot.slane %v3730_v7, 1  ;;  %v8282_v7 = vld [vmem:[#allocation53_spill] sm:$0xff] }
 0x38b   : > { %4301 = vmatmul.bf16.gmra.mxu1 %v3836_v63  ;;  %v4461_v26 = vpack.c.bf16 %v4433_v47, %v4432_v60  ;;  %v4330_v9 = vadd.f32 %v4263_v59, %v7443_v17  ;;  %v4190_v59 = vpop.f32.mrf.mxu0  ;;  %v3733_v22 = vsel %vm1564_vm9, %v3728_v36, %v3732_v39  ;;  %v5596_v63 = vld [vmem:[#allocation2 + $0xc0] sm:$0xf0] }
 0x38c   : > { %4227 = vmatmul.bf16.gmra.mxu0 %v3733_v22 }
 0x38d   : > { %4561 = vmatmul.bf16.gmra.mxu2 %v4461_v26  ;;  %v4366_v24 = vmul.f32 %v7741_v29, %v4330_v9  ;;  %v5597_v26 = vld [vmem:[#allocation2 + $0xc0] sm:$0xe] }
 0x38e   : > { %v4101_v60 = vpop.f32.mrf.mxu3 }
 0x38f   : > { %v4402_v35 = vadd.f32 %v7748_v4, %v4366_v24  ;;  %v5598_v24 = vor.u32 %v5597_v26, %v5596_v63  ;;  %v3844_v26 = vrot.slane %v3541_v33, 1 }
 0x390   : > { %v4264_v12 = vpop.f32.mrf.mxu1 }
 0x391   : > { %v4265_v5 = vadd.f32 %v4264_v12, %v4176_v37  ;;  %v4434_v61 = vmax.f32 %v4402_v35, 0.0  ;;  %v8279_v37 = vld [vmem:[#allocation24_spill] sm:$0xff] }
 0x392   : > { %v3281_v12 = vadd.f32 %v8279_v37, %v8278_v52 }
 0x393   : > { %v4331_v17 = vadd.f32 %v4265_v5, %v3276_v48  ;;  %v4193_v42 = vpop.f32.mrf.mxu0 }
 0x395   : > { %v4367_v57 = vmul.f32 %v7741_v29, %v4331_v17  ;;  %v3840_v17 = vrot.slane %v5598_v24, 1 }
 0x396   : > { %v4104_v35 = vpop.f32.mrf.mxu3 }
 0x397   : > { %v4403_v45 = vadd.f32 %v7748_v4, %v4367_v57  ;;  %v3841_v57 = vrot.slane %v7641_v8, 1  ;;  %v4186_v8 = vadd.f32 %v7813_v3, %v7815_v58  ;;  %v4189_v3 = vadd.f32 %v7826_v2, %v7828_v38 }
 0x398   : > { %v4267_v6 = vpop.f32.mrf.mxu1 }
 0x399   : > { %v4268_v56 = vadd.f32 %v4267_v6, %v4179_v21  ;;  %v4435_v28 = vmax.f32 %v4403_v45, 0.0  ;;  %v5841_v45 = vld [vmem:[#allocation2 + $0xcc] sm:$0xe]  ;;  %v3842_v6 = vsel %vm1821_vm10, %v3840_v17, %v3841_v57 }
 0x39a   : > { %v5842_v19 = vor.u32 %v5841_v45, %v7819_v62  ;;  %v8283_v57 = vld [vmem:[#allocation30_spill] sm:$0xff]  ;;  %v4194_v45 = vadd.f32 %v4193_v42, %v4104_v35 }
 0x39b   : > { %4306 = vmatmul.bf16.gmra.mxu1 %v8277_v44  ;;  %v4462_v27 = vpack.c.bf16 %v4435_v28, %v4434_v61  ;;  %v4332_v47 = vadd.f32 %v4268_v56, %v7479_v53  ;;  %v8280_v61 = vld [vmem:[#allocation33_spill] sm:$0xff]  ;;  %v3286_v44 = vadd.f32 %v8282_v7, %v8281_v11  ;;  %v3291_v2 = vadd.f32 %v7563_v30, %v8283_v57  ;;  %v8284_v11 = vld [vmem:[#allocation56_spill] sm:$0xff]  ;;  %v8285_v7 = vld [vmem:[#allocation59_spill] sm:$0xff] }
 0x39c   : > { %v3843_v63 = vrot.slane %v5842_v19, 1 }
 0x39d   : > { %4566 = vmatmul.bf16.gmra.mxu2 %v4462_v27  ;;  %v4368_v31 = vmul.f32 %v7741_v29, %v4332_v47  ;;  %v4195_v27 = vpop.f32.mrf.mxu0 }
 0x39e   : > { %v4106_v39 = vpop.f32.mrf.mxu3  ;;  %v3845_v37 = vsel %vm1821_vm10, %v3843_v63, %v3844_v26 }
 0x39f   : > { %v4404_v15 = vadd.f32 %v7748_v4, %v4368_v31 }
 0x3a0   : > { %v4269_v9 = vpop.f32.mrf.mxu1 }
 0x3a1   : > { %v4270_v48 = vadd.f32 %v4269_v9, %v4181_v25  ;;  %v4436_v13 = vmax.f32 %v4404_v15, 0.0  ;;  %v4191_v15 = vadd.f32 %v4190_v59, %v4101_v60 }
 0x3a3   : > { %v4333_v5 = vadd.f32 %v4270_v48, %v3281_v12 }
 0x3a5   : > { %v4369_v53 = vmul.f32 %v7741_v29, %v4333_v5  ;;  %v4198_v24 = vpop.f32.mrf.mxu0 }
 0x3a6   : > { %v4109_v5 = vpop.f32.mrf.mxu3 }
 0x3a7   : > { %v4405_v55 = vadd.f32 %v7748_v4, %v4369_v53  ;;  %v4199_v63 = vadd.f32 %v4198_v24, %v4109_v5  ;;  %v7885_v24 = vld [vmem:[#allocation14] ss:$0 sm:$0xff] }
 0x3a8   : > { %v4272_v18 = vpop.f32.mrf.mxu1 }
 0x3a9   : > { %v4273_v14 = vadd.f32 %v4272_v18, %v4184_v10  ;;  %v4437_v21 = vmax.f32 %v4405_v55, 0.0 }
 0x3ab   : > { %4311 = vmatmul.bf16.gmra.mxu1 %v3842_v6  ;;  %v4463_v56 = vpack.c.bf16 %v4437_v21, %v4436_v13  ;;  %v4334_v28 = vadd.f32 %v4273_v14, %v8280_v61 }
 0x3ad   : > { %4571 = vmatmul.bf16.gmra.mxu2 %v4463_v56  ;;  %v4370_v47 = vmul.f32 %v7741_v29, %v4334_v28  ;;  %v4200_v18 = vpop.f32.mrf.mxu0 }
 0x3ae   : > { %v4111_v14 = vpop.f32.mrf.mxu3 }
 0x3af   : > { %v4406_v52 = vadd.f32 %v7748_v4, %v4370_v47 }
 0x3b0   : > { %v4274_v36 = vpop.f32.mrf.mxu1 }
 0x3b1   : > { %v4275_v22 = vadd.f32 %v4274_v36, %v4186_v8  ;;  %v4438_v31 = vmax.f32 %v4406_v52, 0.0  ;;  %v4196_v8 = vadd.f32 %v4195_v27, %v4106_v39 }
 0x3b3   : > { %v4335_v25 = vadd.f32 %v4275_v22, %v3286_v44  ;;  %v3296_v44 = vadd.f32 %v8285_v7, %v8284_v11 }
 0x3b5   : > { %v4371_v9 = vmul.f32 %v7741_v29, %v4335_v25  ;;  %v4203_v28 = vpop.f32.mrf.mxu0 }
 0x3b6   : > { %v4114_v36 = vpop.f32.mrf.mxu3 }
 0x3b7   : > { %v4407_v58 = vadd.f32 %v7748_v4, %v4371_v9 }
 0x3b8   : > { %v4277_v62 = vpop.f32.mrf.mxu1 }
 0x3b9   : > { %v4278_v12 = vadd.f32 %v4277_v62, %v4189_v3  ;;  %v4439_v48 = vmax.f32 %v4407_v58, 0.0 }
 0x3bb   : > { %4316 = vmatmul.bf16.gmra.mxu1 %v3845_v37  ;;  %v4464_v53 = vpack.c.bf16 %v4439_v48, %v4438_v31  ;;  %v4336_v33 = vadd.f32 %v4278_v12, %v7548_v49  ;;  %v8286_v37 = vld [vmem:[#allocation49_spill] sm:$0xff]  ;;  %v4201_v48 = vadd.f32 %v4200_v18, %v4111_v14 }
 0x3bc   : > { %v7883_v31 = vld [vmem:[%s8109_s8] ss:$0 sm:$0xff]  ;;  %v5748_v14 = vld [vmem:[%s6338_s11] sm:$0xff] }
 0x3bd   : > { %4576 = vmatmul.bf16.gmra.mxu2 %v4464_v53  ;;  %v4372_v38 = vmul.f32 %v7741_v29, %v4336_v33  ;;  %v4205_v27 = vpop.f32.mrf.mxu0  ;;  %v8287_v33 = vld [vmem:[#allocation48_spill] sm:$0xff] }
 0x3be   : > { %v4116_v39 = vpop.f32.mrf.mxu3 }
 0x3bf   : > { %v4408_v21 = vadd.f32 %v7748_v4, %v4372_v38 }
 0x3c0   : > { %v4279_v17 = vpop.f32.mrf.mxu1 }
 0x3c1   : > { %v4280_v10 = vadd.f32 %v4279_v17, %v4191_v15  ;;  %v4440_v59 = vmax.f32 %v4408_v21, 0.0  ;;  %v8288_v15 = vld [vmem:[#allocation55_spill] sm:$0xff] }
 0x3c2   : > { %v3301_v17 = vadd.f32 %v8288_v15, %v8287_v33  ;;  %v5750_v33 = vld [vmem:[%s6338_s11 + $0x10] sm:$0xff] }
 0x3c3   : > { %v4337_v55 = vadd.f32 %v4280_v10, %v3291_v2 }
 0x3c5   : > { %v4373_v13 = vmul.f32 %v7741_v29, %v4337_v55  ;;  %v4208_v10 = vpop.f32.mrf.mxu0 }
 0x3c6   : > { %v4119_v55 = vpop.f32.mrf.mxu3 }
 0x3c7   : > { %v4409_v6 = vadd.f32 %v7748_v4, %v4373_v13 }
 0x3c8   : > { %v4282_v49 = vpop.f32.mrf.mxu1 }
 0x3c9   : > { %v4283_v56 = vadd.f32 %v4282_v49, %v4194_v45  ;;  %v4441_v60 = vmax.f32 %v4409_v6, 0.0  ;;  %v4204_v49 = vadd.f32 %v4203_v28, %v4114_v36 }
 0x3cb   : > { %v4465_v61 = vpack.c.bf16 %v4441_v60, %v4440_v59  ;;  %v4338_v30 = vadd.f32 %v4283_v56, %v7578_v16  ;;  %v7877_v16 = vpop.f32.mrf.mxu2 }
 0x3cd   : > { %4581 = vmatmul.bf16.gmra.mxu2 %v4465_v61  ;;  %v4374_v47 = vmul.f32 %v7741_v29, %v4338_v30  ;;  %v4210_v36 = vpop.f32.mrf.mxu0 }
 0x3cf   : > { %v4410_v25 = vadd.f32 %v7748_v4, %v4374_v47  ;;  %v8289_v47 = vld [vmem:[#allocation57_spill] sm:$0xff] }
 0x3d0   : > { %v4284_v19 = vpop.f32.mrf.mxu1 }
 0x3d1   : > { %v4285_v42 = vadd.f32 %v4284_v19, %v4196_v8  ;;  %v4442_v3 = vmax.f32 %v4410_v25, 0.0  ;;  %v4206_v25 = vadd.f32 %v4205_v27, %v4116_v39 }
 0x3d3   : > { %v4339_v35 = vadd.f32 %v4285_v42, %v3296_v44  ;;  %v4121_v44 = vpop.f32.mrf.mxu3 }
 0x3d5   : > { %v4375_v22 = vmul.f32 %v7741_v29, %v4339_v35  ;;  %v5749_v35 = vld [vmem:[%s6338_s11 + $0x8] sm:$0xff]  ;;  %v4213_v15 = vpop.f32.mrf.mxu0 }
 0x3d7   : > { %v4411_v26 = vadd.f32 %v7748_v4, %v4375_v22 }
 0x3d8   : > { %v4287_v9 = vpop.f32.mrf.mxu1 }
 0x3d9   : > { %v4288_v52 = vadd.f32 %v4287_v9, %v4199_v63  ;;  %v4443_v58 = vmax.f32 %v4411_v26, 0.0 }
 0x3db   : > { %v4466_v62 = vpack.c.bf16 %v4443_v58, %v4442_v3  ;;  %v4340_v12 = vadd.f32 %v4288_v52, %v8286_v37  ;;  %v8290_v52 = vld [vmem:[#allocation51_spill] sm:$0xff]  ;;  %v8291_v3 = vld [vmem:[#allocation52_spill] sm:$0xff] }
 0x3dc   : > { %v3306_v58 = vadd.f32 %v8291_v3, %v8290_v52 }
 0x3dd   : > { %4586 = vmatmul.bf16.gmra.mxu2 %v4466_v62  ;;  %v4376_v57 = vmul.f32 %v7741_v29, %v4340_v12 }
 0x3df   : > { %v4412_v6 = vadd.f32 %v7748_v4, %v4376_v57  ;;  %v4124_v57 = vpop.f32.mrf.mxu3 }
 0x3e0   : > { %v4289_v5 = vpop.f32.mrf.mxu1  ;;  %v4547_v53 = vpop.f32.mrf.mxu2 }
 0x3e1   : > { %v4290_v2 = vadd.f32 %v4289_v5, %v4201_v48  ;;  %v4631_v38 = vmul.f32 %v7883_v31, %v4547_v53  ;;  %v4444_v19 = vmax.f32 %v4412_v6, 0.0 }
 0x3e3   : > { %v4341_v13 = vadd.f32 %v4290_v2, %v3301_v17  ;;  %v4667_v21 = vadd.f32 %v7885_v24, %v4631_v38  ;;  %v4209_v17 = vadd.f32 %v4208_v10, %v4119_v55  ;;  %v4211_v55 = vadd.f32 %v4210_v36, %v4121_v44  ;;  %v5752_v44 = vld [vmem:[%s6338_s11 + $0x20] sm:$0xff] }
 0x3e5   : > { %v4377_v18 = vmul.f32 %v7741_v29, %v4341_v13  ;;  %v4699_v45 = vadd.f32 %v5748_v14, %v4667_v21 }
 0x3e7   : > { %v4731_v56 = vmax.f32 %v4699_v45, 0.0  ;;  %v4413_v59 = vadd.f32 %v7748_v4, %v4377_v18 }
 0x3e8   : > { %v4292_v60 = vpop.f32.mrf.mxu1  ;;  %v4549_v61 = vpop.f32.mrf.mxu2 }
 0x3e9   : > { %4763 = vst [vmem:[%s7898_s12] sm:$0xff] %v4731_v56  ;;  %v4293_v30 = vadd.f32 %v4292_v60, %v4204_v49  ;;  %v4632_v8 = vmul.f32 %v7883_v31, %v4549_v61  ;;  %v4445_v11 = vmax.f32 %v4413_v59, 0.0  ;;  %v5751_v60 = vld [vmem:[%s6338_s11 + $0x18] sm:$0xff] }
 0x3eb   : > { %v4668_v7 = vadd.f32 %v7885_v24, %v4632_v8  ;;  %v4467_v28 = vpack.c.bf16 %v4445_v11, %v4444_v19  ;;  %v4342_v42 = vadd.f32 %v4293_v30, %v8289_v47  ;;  %v8292_v19 = vld [vmem:[#allocation50_spill] sm:$0xff] }
 0x3ec   : > { %v3311_v11 = vadd.f32 %v7676_v54, %v8292_v19  ;;  %v4214_v54 = vadd.f32 %v4213_v15, %v4124_v57 }
 0x3ed   : > { %v4700_v22 = vadd.f32 %v5749_v35, %v4668_v7  ;;  %4591 = vmatmul.bf16.gmra.mxu2 %v4467_v28  ;;  %v4378_v62 = vmul.f32 %v7741_v29, %v4342_v42  ;;  %v4215_v7 = vpop.f32.mrf.mxu0  ;;  %v4126_v28 = vpop.f32.mrf.mxu3 }
 0x3ef   : > { %v4732_v63 = vmax.f32 %v4700_v22, 0.0  ;;  %v4414_v39 = vadd.f32 %v7748_v4, %v4378_v62 }
 0x3f0   : > { %v4294_v26 = vpop.f32.mrf.mxu1  ;;  %v4552_v9 = vpop.f32.mrf.mxu2 }
 0x3f1   : > { %4764 = vst [vmem:[%s7898_s12 + $0x8] sm:$0xff] %v4732_v63  ;;  %v4295_v37 = vadd.f32 %v4294_v26, %v4206_v25  ;;  %v4633_v12 = vmul.f32 %v7883_v31, %v4552_v9  ;;  %v4446_v45 = vmax.f32 %v4414_v39, 0.0  ;;  %v5753_v39 = vld [vmem:[%s6338_s11 + $0x28] sm:$0xff] }
 0x3f3   : > { %v4343_v48 = vadd.f32 %v4295_v37, %v3306_v58  ;;  %v4669_v5 = vadd.f32 %v7885_v24, %v4633_v12 }
 0x3f5   : > { %v4379_v53 = vmul.f32 %v7741_v29, %v4343_v48  ;;  %v4701_v27 = vadd.f32 %v5750_v33, %v4669_v5  ;;  %v4218_v48 = vpop.f32.mrf.mxu0  ;;  %v4129_v5 = vpop.f32.mrf.mxu3 }
 0x3f7   : > { %v4733_v2 = vmax.f32 %v4701_v27, 0.0  ;;  %v4415_v38 = vadd.f32 %v7748_v4, %v4379_v53 }
 0x3f8   : > { %v4297_v13 = vpop.f32.mrf.mxu1  ;;  %v4554_v21 = vpop.f32.mrf.mxu2 }
 0x3f9   : > { %4765 = vst [vmem:[%s7898_s12 + $0x10] sm:$0xff] %v4733_v2  ;;  %v4298_v18 = vadd.f32 %v4297_v13, %v4209_v17  ;;  %v4634_v14 = vmul.f32 %v7883_v31, %v4554_v21  ;;  %v4447_v6 = vmax.f32 %v4415_v38, 0.0  ;;  %v4216_v17 = vadd.f32 %v4215_v7, %v4126_v28 }
 0x3fa   : > { %v3316_v13 = vadd.f32 %v7691_v46, %v7673_v32  ;;  %v4219_v32 = vadd.f32 %v4218_v48, %v4129_v5 }
 0x3fb   : > { %v4670_v49 = vadd.f32 %v7885_v24, %v4634_v14  ;;  %v4468_v56 = vpack.c.bf16 %v4447_v6, %v4446_v45  ;;  %v4344_v59 = vadd.f32 %v4298_v18, %v7668_v51 }
 0x3fd   : > { %v4702_v10 = vadd.f32 %v5751_v60, %v4670_v49  ;;  %4596 = vmatmul.bf16.gmra.mxu2 %v4468_v56  ;;  %v4380_v47 = vmul.f32 %v7741_v29, %v4344_v59  ;;  %v4220_v6 = vpop.f32.mrf.mxu0  ;;  %v4131_v49 = vpop.f32.mrf.mxu3  ;;  %v5754_v59 = vld [vmem:[%s6338_s11 + $0x30] sm:$0xff] }
 0x3ff   : > { %v4734_v61 = vmax.f32 %v4702_v10, 0.0  ;;  %v4416_v63 = vadd.f32 %v7748_v4, %v4380_v47 }
 0x400   : > { %v4299_v30 = vpop.f32.mrf.mxu1  ;;  %v4557_v8 = vpop.f32.mrf.mxu2 }
 0x401   : > { %4766 = vst [vmem:[%s7898_s12 + $0x18] sm:$0xff] %v4734_v61  ;;  %v4300_v42 = vadd.f32 %v4299_v30, %v4211_v55  ;;  %v4635_v51 = vmul.f32 %v7883_v31, %v4557_v8  ;;  %v4448_v37 = vmax.f32 %v4416_v63, 0.0 }
 0x403   : > { %v4345_v35 = vadd.f32 %v4300_v42, %v3311_v11  ;;  %v4671_v22 = vadd.f32 %v7885_v24, %v4635_v51  ;;  %v5755_v51 = vld [vmem:[%s6338_s11 + $0x38] sm:$0xff] }
 0x405   : > { %v4381_v36 = vmul.f32 %v7741_v29, %v4345_v35  ;;  %v4703_v25 = vadd.f32 %v5752_v44, %v4671_v22  ;;  %v4223_v22 = vpop.f32.mrf.mxu0  ;;  %v4134_v44 = vpop.f32.mrf.mxu3 }
 0x406   : > { %v4224_v5 = vadd.f32 %v4223_v22, %v4134_v44 }
 0x407   : > { %v4735_v26 = vmax.f32 %v4703_v25, 0.0  ;;  %v4417_v9 = vadd.f32 %v7748_v4, %v4381_v36  ;;  %v4221_v36 = vadd.f32 %v4220_v6, %v4131_v49 }
 0x408   : > { %v4302_v52 = vpop.f32.mrf.mxu1  ;;  %v4559_v3 = vpop.f32.mrf.mxu2 }
 0x409   : > { %4767 = vst [vmem:[%s7898_s12 + $0x20] sm:$0xff] %v4735_v26  ;;  %v4303_v58 = vadd.f32 %v4302_v52, %v4214_v54  ;;  %v4636_v62 = vmul.f32 %v7883_v31, %v4559_v3  ;;  %v4449_v12 = vmax.f32 %v4417_v9, 0.0  ;;  %v3321_v26 = vadd.f32 %v7707_v34, %v7689_v20 }
 0x40b   : > { %v4672_v53 = vadd.f32 %v7885_v24, %v4636_v62  ;;  %v4469_v33 = vpack.c.bf16 %v4449_v12, %v4448_v37  ;;  %v4346_v27 = vadd.f32 %v4303_v58, %v7683_v1  ;;  %v5756_v37 = vld [vmem:[%s6338_s11 + $0x40] sm:$0xff] }
 0x40d   : > { %v4704_v15 = vadd.f32 %v5753_v39, %v4672_v53  ;;  %4601 = vmatmul.bf16.gmra.mxu2 %v4469_v33  ;;  %v4382_v21 = vmul.f32 %v7741_v29, %v4346_v27 }
 0x40f   : > { %v4736_v57 = vmax.f32 %v4704_v15, 0.0  ;;  %v4418_v10 = vadd.f32 %v7748_v4, %v4382_v21 }
 0x410   : > { %v4304_v2 = vpop.f32.mrf.mxu1  ;;  %v4562_v38 = vpop.f32.mrf.mxu2 }
 0x411   : > { %4768 = vst [vmem:[%s7898_s12 + $0x28] sm:$0xff] %v4736_v57  ;;  %v4305_v18 = vadd.f32 %v4304_v2, %v4216_v17  ;;  %v4637_v14 = vmul.f32 %v7883_v31, %v4562_v38  ;;  %v4450_v11 = vmax.f32 %v4418_v10, 0.0  ;;  %v4225_v57 = vpop.f32.mrf.mxu0  ;;  %v4136_v2 = vpop.f32.mrf.mxu3 }
 0x413   : > { %v4347_v45 = vadd.f32 %v4305_v18, %v3316_v13  ;;  %v4673_v1 = vadd.f32 %v7885_v24, %v4637_v14  ;;  %v5757_v18 = vld [vmem:[%s6338_s11 + $0x48] sm:$0xff] }
 0x415   : > { %v4383_v56 = vmul.f32 %v7741_v29, %v4347_v45  ;;  %v4705_v60 = vadd.f32 %v5754_v59, %v4673_v1  ;;  %v4226_v45 = vadd.f32 %v4225_v57, %v4136_v2 }
 0x417   : > { %v4737_v46 = vmax.f32 %v4705_v60, 0.0  ;;  %v4419_v55 = vadd.f32 %v7748_v4, %v4383_v56  ;;  %v3326_v56 = vadd.f32 %v7725_v23, %v7704_v40 }
 0x418   : > { %v4307_v61 = vpop.f32.mrf.mxu1  ;;  %v4564_v30 = vpop.f32.mrf.mxu2 }
 0x419   : > { %4769 = vst [vmem:[%s7898_s12 + $0x30] sm:$0xff] %v4737_v46  ;;  %v4308_v8 = vadd.f32 %v4307_v61, %v4219_v32  ;;  %v4638_v19 = vmul.f32 %v7883_v31, %v4564_v30  ;;  %v4451_v7 = vmax.f32 %v4419_v55, 0.0  ;;  %v4139_v32 = vpop.f32.mrf.mxu3 }
 0x41b   : > { %v4674_v28 = vadd.f32 %v7885_v24, %v4638_v19  ;;  %v4470_v47 = vpack.c.bf16 %v4451_v7, %v4450_v11  ;;  %v4348_v42 = vadd.f32 %v4308_v8, %v7700_v41  ;;  %v5758_v8 = vld [vmem:[%s6338_s11 + $0x50] sm:$0xff] }
 0x41d   : > { %v4706_v35 = vadd.f32 %v5755_v51, %v4674_v28  ;;  %4606 = vmatmul.bf16.gmra.mxu2 %v4470_v47  ;;  %v4384_v9 = vmul.f32 %v7741_v29, %v4348_v42 }
 0x41f   : > { %v4738_v25 = vmax.f32 %v4706_v35, 0.0  ;;  %v4420_v48 = vadd.f32 %v7748_v4, %v4384_v9 }
 0x420   : > { %v4309_v63 = vpop.f32.mrf.mxu1  ;;  %v4567_v54 = vpop.f32.mrf.mxu2 }
 0x421   : > { %4770 = vst [vmem:[%s7898_s12 + $0x38] sm:$0xff] %v4738_v25  ;;  %v4310_v52 = vadd.f32 %v4309_v63, %v4221_v36  ;;  %v4639_v41 = vmul.f32 %v7883_v31, %v4567_v54  ;;  %v4452_v15 = vmax.f32 %v4420_v48, 0.0  ;;  %v4141_v44 = vpop.f32.mrf.mxu3  ;;  %v5759_v54 = vld [vmem:[%s6338_s11 + $0x58] sm:$0xff] }
 0x423   : > { %v4349_v3 = vadd.f32 %v4310_v52, %v3321_v26  ;;  %v4675_v58 = vadd.f32 %v7885_v24, %v4639_v41 }
 0x425   : > { %v4385_v62 = vmul.f32 %v7741_v29, %v4349_v3  ;;  %v4707_v12 = vadd.f32 %v5756_v37, %v4675_v58  ;;  %v3331_v58 = vadd.f32 %v7877_v16, %v7721_v43 }
 0x427   : > { %v4739_v53 = vmax.f32 %v4707_v12, 0.0  ;;  %v4421_v20 = vadd.f32 %v7748_v4, %v4385_v62 }
 0x428   : > { %v4312_v34 = vpop.f32.mrf.mxu1  ;;  %v4569_v33 = vpop.f32.mrf.mxu2 }
 0x429   : > { %4771 = vst [vmem:[%s7898_s12 + $0x40] sm:$0xff] %v4739_v53  ;;  %v4313_v27 = vadd.f32 %v4312_v34, %v4224_v5  ;;  %v4640_v39 = vmul.f32 %v7883_v31, %v4569_v33  ;;  %v4453_v17 = vmax.f32 %v4421_v20, 0.0  ;;  %v5760_v53 = vld [vmem:[%s6338_s11 + $0x60] sm:$0xff] }
 0x42b   : > { %v4676_v38 = vadd.f32 %v7885_v24, %v4640_v39  ;;  %v4471_v13 = vpack.c.bf16 %v4453_v17, %v4452_v15  ;;  %v4350_v21 = vadd.f32 %v4313_v27, %v7716_v50  ;;  %v4228_v50 = vpop.f32.mrf.mxu0 }
 0x42c   : > { %v4229_v61 = vadd.f32 %v4228_v50, %v4139_v32 }
 0x42d   : > { %v4708_v14 = vadd.f32 %v5757_v18, %v4676_v38  ;;  %4611 = vmatmul.bf16.gmra.mxu2 %v4471_v13  ;;  %v4386_v59 = vmul.f32 %v7741_v29, %v4350_v21  ;;  %v5762_v18 = vld [vmem:[%s6338_s11 + $0x70] sm:$0xff] }
 0x42f   : > { %v4740_v1 = vmax.f32 %v4708_v14, 0.0  ;;  %v4422_v40 = vadd.f32 %v7748_v4, %v4386_v59 }
 0x430   : > { %v4314_v6 = vpop.f32.mrf.mxu1  ;;  %v4572_v49 = vpop.f32.mrf.mxu2 }
 0x431   : > { %4772 = vst [vmem:[%s7898_s12 + $0x48] sm:$0xff] %v4740_v1  ;;  %v4315_v60 = vadd.f32 %v4314_v6, %v4226_v45  ;;  %v4641_v10 = vmul.f32 %v7883_v31, %v4572_v49  ;;  %v4454_v51 = vmax.f32 %v4422_v40, 0.0  ;;  %v5765_v40 = vld [vmem:[%s6338_s11 + $0x88] sm:$0xff] }
 0x433   : > { %v4351_v46 = vadd.f32 %v4315_v60, %v3326_v56  ;;  %v4677_v55 = vadd.f32 %v7885_v24, %v4641_v10  ;;  %v4230_v25 = vpop.f32.mrf.mxu0  ;;  %v5763_v56 = vld [vmem:[%s6338_s11 + $0x78] sm:$0xff] }
 0x434   : > { %v4231_v9 = vadd.f32 %v4230_v25, %v4141_v44  ;;  %v5767_v25 = vld [vmem:[%s6338_s11 + $0x98] sm:$0xff] }
 0x435   : > { %v4387_v30 = vmul.f32 %v7741_v29, %v4351_v46  ;;  %v4709_v19 = vadd.f32 %v5758_v8, %v4677_v55  ;;  %v5764_v46 = vld [vmem:[%s6338_s11 + $0x80] sm:$0xff] }
 0x437   : > { %v4741_v23 = vmax.f32 %v4709_v19, 0.0  ;;  %v4423_v11 = vadd.f32 %v7748_v4, %v4387_v30 }
 0x438   : > { %v4317_v7 = vpop.f32.mrf.mxu1  ;;  %v4574_v28 = vpop.f32.mrf.mxu2 }
 0x439   : > { %4773 = vst [vmem:[%s7898_s12 + $0x50] sm:$0xff] %v4741_v23  ;;  %v4318_v47 = vadd.f32 %v4317_v7, %v4229_v61  ;;  %v4642_v42 = vmul.f32 %v7883_v31, %v4574_v28  ;;  %v4455_v35 = vmax.f32 %v4423_v11, 0.0 }
 0x43b   : > { %v4678_v22 = vadd.f32 %v7885_v24, %v4642_v42  ;;  %v4472_v36 = vpack.c.bf16 %v4455_v35, %v4454_v51  ;;  %v4352_v63 = vadd.f32 %v4318_v47, %v7733_v0  ;;  %v5766_v42 = vld [vmem:[%s6338_s11 + $0x90] sm:$0xff] }
 0x43d   : > { %v4710_v26 = vadd.f32 %v5759_v54, %v4678_v22  ;;  %4616 = vmatmul.bf16.gmra.mxu2 %v4472_v36  ;;  %v4388_v62 = vmul.f32 %v7741_v29, %v4352_v63 }
 0x43f   : > { %v4742_v52 = vmax.f32 %v4710_v26, 0.0  ;;  %v4424_v34 = vadd.f32 %v7748_v4, %v4388_v62 }
 0x440   : > { %v4319_v41 = vpop.f32.mrf.mxu1  ;;  %v4577_v3 = vpop.f32.mrf.mxu2 }
 0x441   : > { %4774 = vst [vmem:[%s7898_s12 + $0x58] sm:$0xff] %v4742_v52  ;;  %v4320_v37 = vadd.f32 %v4319_v41, %v4231_v9  ;;  %v4643_v12 = vmul.f32 %v7883_v31, %v4577_v3  ;;  %v4456_v39 = vmax.f32 %v4424_v34, 0.0  ;;  %v5768_v41 = vld [vmem:[%s6338_s11 + $0xa0] sm:$0xff] }
 0x443   : > { %v4353_v0 = vadd.f32 %v4320_v37, %v3331_v58  ;;  %v4679_v48 = vadd.f32 %v7885_v24, %v4643_v12 }
 0x445   : > { %v4389_v5 = vmul.f32 %v7741_v29, %v4353_v0  ;;  %v4711_v20 = vadd.f32 %v5760_v53, %v4679_v48  ;;  %v5761_v29 = vld [vmem:[%s6338_s11 + $0x68] sm:$0xff] }
 0x446   : > { %v5769_v0 = vld [vmem:[%s6338_s11 + $0xa8] sm:$0xff] }
 0x447   : > { %v4743_v33 = vmax.f32 %v4711_v20, 0.0  ;;  %v4425_v43 = vadd.f32 %v7748_v4, %v4389_v5 }
 0x448   : > { %v4579_v16 = vpop.f32.mrf.mxu2 }
 0x449   : > { %4775 = vst [vmem:[%s7898_s12 + $0x60] sm:$0xff] %v4743_v33  ;;  %v4644_v27 = vmul.f32 %v7883_v31, %v4579_v16  ;;  %v4457_v15 = vmax.f32 %v4425_v43, 0.0  ;;  %v5770_v33 = vld [vmem:[%s6338_s11 + $0xb0] sm:$0xff] }
 0x44b   : > { %v4680_v17 = vadd.f32 %v7885_v24, %v4644_v27  ;;  %v4473_v57 = vpack.c.bf16 %v4457_v15, %v4456_v39 }
 0x44d   : > { %v4712_v2 = vadd.f32 %v5761_v29, %v4680_v17  ;;  %4621 = vmatmul.bf16.gmra.mxu2 %v4473_v57  ;;  %v5771_v17 = vld [vmem:[%s6338_s11 + $0xb8] sm:$0xff] }
 0x44f   : > { %v4744_v38 = vmax.f32 %v4712_v2, 0.0 }
 0x450   : > { %v4582_v13 = vpop.f32.mrf.mxu2 }
 0x451   : > { %4776 = vst [vmem:[%s7898_s12 + $0x68] sm:$0xff] %v4744_v38  ;;  %v4645_v4 = vmul.f32 %v7883_v31, %v4582_v13 }
 0x453   : > { %v4681_v21 = vadd.f32 %v7885_v24, %v4645_v4  ;;  %v5772_v4 = vld [vmem:[%s6338_s11 + $0xc0] sm:$0xff] }
 0x455   : > { %v4713_v14 = vadd.f32 %v5762_v18, %v4681_v21 }
 0x457   : > { %v4745_v45 = vmax.f32 %v4713_v14, 0.0 }
 0x458   : > { %v4584_v1 = vpop.f32.mrf.mxu2 }
 0x459   : > { %4777 = vst [vmem:[%s7898_s12 + $0x70] sm:$0xff] %v4745_v45  ;;  %v4646_v6 = vmul.f32 %v7883_v31, %v4584_v1 }
 0x45b   : > { %v4682_v49 = vadd.f32 %v7885_v24, %v4646_v6  ;;  %v5773_v6 = vld [vmem:[%s6338_s11 + $0xc8] sm:$0xff] }
 0x45d   : > { %v4714_v59 = vadd.f32 %v5763_v56, %v4682_v49 }
 0x45f   : > { %v4746_v60 = vmax.f32 %v4714_v59, 0.0 }
 0x460   : > { %v4587_v10 = vpop.f32.mrf.mxu2 }
 0x461   : > { %4778 = vst [vmem:[%s7898_s12 + $0x78] sm:$0xff] %v4746_v60  ;;  %v4647_v32 = vmul.f32 %v7883_v31, %v4587_v10 }
 0x463   : > { %v4683_v50 = vadd.f32 %v7885_v24, %v4647_v32  ;;  %v5774_v32 = vld [vmem:[%s6338_s11 + $0xd0] sm:$0xff] }
 0x465   : > { %v4715_v55 = vadd.f32 %v5764_v46, %v4683_v50 }
 0x467   : > { %v4747_v61 = vmax.f32 %v4715_v55, 0.0 }
 0x468   : > { %v4589_v30 = vpop.f32.mrf.mxu2 }
 0x469   : > { %4779 = vst [vmem:[%s7898_s12 + $0x80] sm:$0xff] %v4747_v61  ;;  %v4648_v8 = vmul.f32 %v7883_v31, %v4589_v30 }
 0x46b   : > { %v4684_v19 = vadd.f32 %v7885_v24, %v4648_v8  ;;  %v5775_v8 = vld [vmem:[%s6338_s11 + $0xd8] sm:$0xff] }
 0x46d   : > { %v4716_v23 = vadd.f32 %v5765_v40, %v4684_v19 }
 0x46f   : > { %v4748_v11 = vmax.f32 %v4716_v23, 0.0 }
 0x470   : > { %v4592_v7 = vpop.f32.mrf.mxu2 }
 0x471   : > { %4780 = vst [vmem:[%s7898_s12 + $0x88] sm:$0xff] %v4748_v11  ;;  %v4649_v28 = vmul.f32 %v7883_v31, %v4592_v7 }
 0x473   : > { %v4685_v47 = vadd.f32 %v7885_v24, %v4649_v28  ;;  %v5776_v28 = vld [vmem:[%s6338_s11 + $0xe0] sm:$0xff] }
 0x475   : > { %v4717_v51 = vadd.f32 %v5766_v42, %v4685_v47 }
 0x477   : > { %v4749_v35 = vmax.f32 %v4717_v51, 0.0 }
 0x478   : > { %v4594_v22 = vpop.f32.mrf.mxu2 }
 0x479   : > { %4781 = vst [vmem:[%s7898_s12 + $0x90] sm:$0xff] %v4749_v35  ;;  %v4650_v36 = vmul.f32 %v7883_v31, %v4594_v22 }
 0x47b   : > { %v4686_v44 = vadd.f32 %v7885_v24, %v4650_v36  ;;  %v5777_v36 = vld [vmem:[%s6338_s11 + $0xe8] sm:$0xff] }
 0x47d   : > { %v4718_v63 = vadd.f32 %v5767_v25, %v4686_v44 }
 0x47f   : > { %v4750_v54 = vmax.f32 %v4718_v63, 0.0 }
 0x480   : > { %v4597_v26 = vpop.f32.mrf.mxu2 }
 0x481   : > { %4782 = vst [vmem:[%s7898_s12 + $0x98] sm:$0xff] %v4750_v54  ;;  %v4651_v9 = vmul.f32 %v7883_v31, %v4597_v26 }
 0x483   : > { %v4687_v52 = vadd.f32 %v7885_v24, %v4651_v9  ;;  %v5778_v9 = vld [vmem:[%s6338_s11 + $0xf0] sm:$0xff] }
 0x485   : > { %v4719_v3 = vadd.f32 %v5768_v41, %v4687_v52 }
 0x487   : > { %v4751_v58 = vmax.f32 %v4719_v3, 0.0 }
 0x488   : > { %v4599_v62 = vpop.f32.mrf.mxu2 }
 0x489   : > { %4783 = vst [vmem:[%s7898_s12 + $0xa0] sm:$0xff] %v4751_v58  ;;  %v4652_v37 = vmul.f32 %v7883_v31, %v4599_v62 }
 0x48b   : > { %v4688_v12 = vadd.f32 %v7885_v24, %v4652_v37  ;;  %v5779_v37 = vld [vmem:[%s6338_s11 + $0xf8] sm:$0xff] }
 0x48d   : > { %v4720_v48 = vadd.f32 %v5769_v0, %v4688_v12 }
 0x48f   : > { %v4752_v5 = vmax.f32 %v4720_v48, 0.0 }
 0x490   : > { %v4602_v53 = vpop.f32.mrf.mxu2 }
 0x491   : > { %4784 = vst [vmem:[%s7898_s12 + $0xa8] sm:$0xff] %v4752_v5  ;;  %v4653_v20 = vmul.f32 %v7883_v31, %v4602_v53 }
 0x493   : > { %v4689_v34 = vadd.f32 %v7885_v24, %v4653_v20 }
 0x495   : > { %v4721_v43 = vadd.f32 %v5770_v33, %v4689_v34 }
 0x497   : > { %v4753_v16 = vmax.f32 %v4721_v43, 0.0 }
 0x498   : > { %v4604_v27 = vpop.f32.mrf.mxu2 }
 0x499   : > { %4785 = vst [vmem:[%s7898_s12 + $0xb0] sm:$0xff] %v4753_v16  ;;  %v4654_v39 = vmul.f32 %v7883_v31, %v4604_v27 }
 0x49b   : > { %v4690_v15 = vadd.f32 %v7885_v24, %v4654_v39 }
 0x49d   : > { %v4722_v57 = vadd.f32 %v5771_v17, %v4690_v15 }
 0x49f   : > { %v4754_v29 = vmax.f32 %v4722_v57, 0.0 }
 0x4a0   : > { %v4607_v2 = vpop.f32.mrf.mxu2 }
 0x4a1   : > { %4786 = vst [vmem:[%s7898_s12 + $0xb8] sm:$0xff] %v4754_v29  ;;  %v4655_v38 = vmul.f32 %v7883_v31, %v4607_v2 }
 0x4a3   : > { %v4691_v13 = vadd.f32 %v7885_v24, %v4655_v38 }
 0x4a5   : > { %v4723_v21 = vadd.f32 %v5772_v4, %v4691_v13 }
 0x4a7   : > { %v4755_v18 = vmax.f32 %v4723_v21, 0.0 }
 0x4a8   : > { %v4609_v14 = vpop.f32.mrf.mxu2 }
 0x4a9   : > { %4787 = vst [vmem:[%s7898_s12 + $0xc0] sm:$0xff] %v4755_v18  ;;  %v4656_v45 = vmul.f32 %v7883_v31, %v4609_v14 }
 0x4ab   : > { %v4692_v1 = vadd.f32 %v7885_v24, %v4656_v45 }
 0x4ad   : > { %v4724_v49 = vadd.f32 %v5773_v6, %v4692_v1 }
 0x4af   : > { %v4756_v56 = vmax.f32 %v4724_v49, 0.0 }
 0x4b0   : > { %v4612_v59 = vpop.f32.mrf.mxu2 }
 0x4b1   : > { %4788 = vst [vmem:[%s7898_s12 + $0xc8] sm:$0xff] %v4756_v56  ;;  %v4657_v60 = vmul.f32 %v7883_v31, %v4612_v59 }
 0x4b3   : > { %v4693_v10 = vadd.f32 %v7885_v24, %v4657_v60 }
 0x4b5   : > { %v4725_v50 = vadd.f32 %v5774_v32, %v4693_v10 }
 0x4b7   : > { %v4757_v46 = vmax.f32 %v4725_v50, 0.0 }
 0x4b8   : > { %v4614_v55 = vpop.f32.mrf.mxu2 }
 0x4b9   : > { %4789 = vst [vmem:[%s7898_s12 + $0xd0] sm:$0xff] %v4757_v46  ;;  %v4658_v61 = vmul.f32 %v7883_v31, %v4614_v55 }
 0x4bb   : > { %v4694_v30 = vadd.f32 %v7885_v24, %v4658_v61 }
 0x4bd   : > { %v4726_v19 = vadd.f32 %v5775_v8, %v4694_v30 }
 0x4bf   : > { %v4758_v40 = vmax.f32 %v4726_v19, 0.0 }
 0x4c0   : > { %v4617_v23 = vpop.f32.mrf.mxu2 }
 0x4c1   : > { %4790 = vst [vmem:[%s7898_s12 + $0xd8] sm:$0xff] %v4758_v40  ;;  %v4659_v11 = vmul.f32 %v7883_v31, %v4617_v23 }
 0x4c3   : > { %v4695_v7 = vadd.f32 %v7885_v24, %v4659_v11 }
 0x4c5   : > { %v4727_v47 = vadd.f32 %v5776_v28, %v4695_v7 }
 0x4c7   : > { %v4759_v42 = vmax.f32 %v4727_v47, 0.0 }
 0x4c8   : > { %v4619_v51 = vpop.f32.mrf.mxu2 }
 0x4c9   : > { %4791 = vst [vmem:[%s7898_s12 + $0xe0] sm:$0xff] %v4759_v42  ;;  %v4660_v35 = vmul.f32 %v7883_v31, %v4619_v51 }
 0x4cb   : > { %v4696_v22 = vadd.f32 %v7885_v24, %v4660_v35 }
 0x4cd   : > { %v4728_v44 = vadd.f32 %v5777_v36, %v4696_v22 }
 0x4cf   : > { %v4760_v25 = vmax.f32 %v4728_v44, 0.0 }
 0x4d0   : > { %v4622_v63 = vpop.f32.mrf.mxu2 }
 0x4d1   : > { %4792 = vst [vmem:[%s7898_s12 + $0xe8] sm:$0xff] %v4760_v25  ;;  %v4661_v54 = vmul.f32 %v7883_v31, %v4622_v63 }
 0x4d3   : > { %v4697_v26 = vadd.f32 %v7885_v24, %v4661_v54 }
 0x4d5   : > { %v4729_v52 = vadd.f32 %v5778_v9, %v4697_v26 }
 0x4d7   : > { %v4761_v41 = vmax.f32 %v4729_v52, 0.0 }
 0x4d8   : > { %v4624_v3 = vpop.f32.mrf.mxu2 }
 0x4d9   : > { %4793 = vst [vmem:[%s7898_s12 + $0xf0] sm:$0xff] %v4761_v41  ;;  %v4662_v58 = vmul.f32 %v7883_v31, %v4624_v3 }
 0x4db   : > { %v4698_v62 = vadd.f32 %v7885_v24, %v4662_v58 }
 0x4dd   : > { %v4730_v12 = vadd.f32 %v5779_v37, %v4698_v62 }
 0x4df   : > { %v4762_v0 = vmax.f32 %v4730_v12, 0.0 }
 0x4e1   : > { %4794 = vst [vmem:[%s7898_s12 + $0xf8] sm:$0xff] %v4762_v0 }
 0x4e2   : > { %6080 = shalt.err (!%p6077_p9)
}
 0x4e3   : > { %s6147_s17 = smov 128   ;;  %s6148_s11 = smov 8  }
 0x4e4   : > { %5649 = dma.vmem_to_hbm [thread:$0]  (%p6301_p4), %s4809_s7, 4096, %s4811_s2, %s4796_s20, %s6147_s17, %s6147_s17, %s6148_s11  }
 0x4e5 PF: > { %s4825_s12 = sand.u32 1, %s6122_s13   ;;  %p8293_p10 = scmp.ge.s32.totalorder %s6134_s16, 2 }
 0x4e6   : > { %s4826_s19 = scalar_lea.sflag [#allocation5], %s4825_s12 }
 0x4e7   : > { %p5675_p13 = pnand %p8293_p10, %p6305_p6 }
 0x4e9   : > { %p5676_p11 = pneg %p5675_p13 }
 0x4eb   : > { %6114 = dma.done.wait (%p5676_p11), %s4826_s19, 4096  }
 0x4ec   : > { %6116 = vsyncadd (%p5676_p11), %s4826_s19, 4294963200  ;;  %p26_p0 = scmp.ge.s32.totalorder %s6275_s24, 4   ;;  %s8294_s13 = smov %s6126_s14 }
 0x4ed   : > { %s8295_s14 = smov %s6130_s15  ;;  %s8296_s15 = smov %s6286_s29 }
 0x4ee   : > { %s8297_s16 = smov %s6275_s24  ;;  %28 = sbr.rel (!%p26_p0) target bundleno = 14 (0xe), region = 134 }
 0x4f3   :  { %4832 = vsyncpa [#allocation4], 1 }
 0x4f4   :  { %4834 = vsyncpa [#allocation4 + $0x1], 1 }
 0x4f5   :  { %4835 = vsyncpa [#allocation7], 1 }
 0x4f6   :  { %4836 = vsyncpa [#allocation10], 1 }
 0x4f7   :  { %4837 = vsyncpa [#allocation13], 1 }
 0x4f8   :  { %4838 = vsyncpa [#allocation5], 1 }
 0x4f9   :  { %4840 = vsyncpa [#allocation5 + $0x1], 1 }

</bundles_post_ra>
